<compile_context>
chip_gen: v7x
topology: tpu7x:2x2x1
jax: 0.10.0
libtpu: 0.0.40
codegen_flags: <defaults>
</compile_context>

<pallas_src>
import numpy as np
import jax
import jax.numpy as jnp
from jax import lax
from jax.experimental import pallas as pl
from jax.experimental.pallas import tpu as pltpu


# ----------------------------------------------------------------------------
# Kernels
# ----------------------------------------------------------------------------
def _make_trunk_kernel(W, pad):
    """Trunk kernel factory; closes over the static image width and scratch padding."""
    offs = [dy * W + dx for dy in (-1, 0, 1) for dx in (-1, 0, 1)]   # tap k = ky*3+kx

    def kernel(x_ref, act_ref, v_ref, g_ref,
               w1_ref, b1_ref,
               rw1_ref, bn1s_ref, bn1b_ref,
               rw2_ref, bn2s_ref, bn2b_ref,
               out_ref, xpad_ref):
        # x_ref   : (HW, C)     NHWC-flattened latent rows of batch b = program_id(0)
        # act_ref : (B, A)      one-hot actions (resident)
        # v_ref   : (9, HW, 1)  per-tap border-validity column
        # g_ref   : (A, HW, C)  precomputed conv1 response to each constant action plane
        # xpad_ref: (HW+2*pad, C) zero-padded scratch used for the shifted window loads
        HW, C = out_ref.shape
        A = g_ref.shape[0]

        # Zero the scratch once per grid step: its margins supply the conv zero padding
        # for every shifted-window load below (interiors are overwritten each conv).
        xpad_ref[...] = jnp.zeros_like(xpad_ref)

        def conv3x3(inp, w_ref_):
            # out = sum_k (validity_k * shift_k(inp)) @ W_k   -- shifts are offset loads,
            # not matmuls; dots run bf16 on the MXU with f32 accumulation.
            xpad_ref[pl.ds(pad, HW), :] = inp
            acc = None
            for k in range(9):
                win = xpad_ref[pl.ds(pad + offs[k], HW), :]
                piece = (v_ref[k] * win).astype(jnp.bfloat16)
                d = jnp.dot(piece, w_ref_[k], preferred_element_type=jnp.float32)
                acc = d if acc is None else acc + d
            return acc

        # ---- conv1: latent channels ----
        h = conv3x3(x_ref[...].astype(jnp.float32), w1_ref)

        # ---- conv1: spatially-constant action planes (hoisted) ----
        act_row = act_ref[pl.ds(pl.program_id(0), 1), :].astype(jnp.float32)   # (1, A)
        ab = act_row[:, 0:1] * g_ref[0]
        for a in range(1, A):
            ab = ab + act_row[:, a:a + 1] * g_ref[a]
        h = h + ab + b1_ref[...]

        # ---- ResBlock: conv -> bn -> relu -> conv -> bn -> +input -> relu ----
        r = conv3x3(h, rw1_ref)
        r = jnp.maximum(r * bn1s_ref[...] + bn1b_ref[...], 0.0)
        r = conv3x3(r, rw2_ref)
        r = r * bn2s_ref[...] + bn2b_ref[...]
        out_ref[...] = jnp.maximum(r + h, 0.0).astype(out_ref.dtype)

    return kernel


def _reward_head_kernel(x_ref, w1_ref, b1_ref, w2_ref, b2_ref, o_ref):
    # fc2(relu(fc1(x))) on lane-dense (padded-to-128) weights, bf16 MXU, f32 accumulate.
    h = jnp.dot(x_ref[...].astype(jnp.bfloat16), w1_ref[...],
                preferred_element_type=jnp.float32) + b1_ref[...]
    h = jnp.maximum(h, 0.0)
    o_ref[...] = (jnp.dot(h.astype(jnp.bfloat16), w2_ref[...],
                          preferred_element_type=jnp.float32)
                  + b2_ref[...]).astype(o_ref.dtype)


# ----------------------------------------------------------------------------
# One-time parameter / constant preparation
# ----------------------------------------------------------------------------
def _build_validity(H, W):
    """valid[k, p] = 1 iff the 3x3 tap k at output position p reads inside the image."""
    HW = H * W
    v = np.zeros((9, HW), np.float32)
    for ky in range(3):
        for kx in range(3):
            dy, dx = ky - 1, kx - 1
            k = ky * 3 + kx
            for y in range(H):
                for x in range(W):
                    if 0 <= y + dy < H and 0 <= x + dx < W:
                        v[k, y * W + x] = 1.0
    return v


def prepare_params(p, H, W):
    """Convert torch-layout params into kernel-ready layouts ONCE (no per-call work)."""
    C = p['conv1_w'].shape[0]
    A = p['conv1_w'].shape[1] - C
    R = p['fc1_w'].shape[0]
    S = p['fc2_w'].shape[0]
    HW = H * W
    F = C * HW
    eps = 1e-5

    def rup(n, m=128):
        return ((n + m - 1) // m) * m

    Rp, Sp = rup(R), rup(S)

    def conv_taps(w):   # (Cout, Cin, 3, 3) -> (9, Cin, Cout), tap order k = ky*3 + kx
        return jnp.transpose(w, (2, 3, 1, 0)).reshape(9, w.shape[1], w.shape[0]).astype(jnp.float32)

    w1 = conv_taps(p['conv1_w'])                    # (9, C+A, C)
    w1_lat = w1[:, :C, :]
    w1_act = w1[:, C:, :]                           # (9, A, C)

    v_np = _build_validity(H, W)                    # (9, HW)
    v = jnp.asarray(v_np)

    # Precomputed conv1 response to each constant (zero-padded) one-hot action plane:
    # G[a, p, c] = sum_k valid[k, p] * w1_act[k, a, c]
    g = jnp.einsum('kp,kac->apc', v, w1_act).astype(jnp.float32)   # (A, HW, C)

    bn1_s = (p['bn1_gamma'] / jnp.sqrt(p['bn1_var'] + eps)).astype(jnp.float32)
    bn1_b = (p['bn1_beta'] - p['bn1_mean'] * bn1_s).astype(jnp.float32)
    bn2_s = (p['bn2_gamma'] / jnp.sqrt(p['bn2_var'] + eps)).astype(jnp.float32)
    bn2_b = (p['bn2_beta'] - p['bn2_mean'] * bn2_s).astype(jnp.float32)

    # fc1 was defined against the torch NCHW flatten (c, y, x); permute once to the
    # kernel's NHWC flatten (y, x, c), and zero-pad R/S to lane-dense multiples of 128.
    wfc1 = p['fc1_w'].T.reshape(C, H, W, R).transpose(1, 2, 0, 3).reshape(F, R)
    wfc1_p = jnp.zeros((F, Rp), jnp.float32).at[:, :R].set(wfc1)
    bfc1_p = jnp.zeros((1, Rp), jnp.float32).at[:, :R].set(p['fc1_b'].reshape(1, R))
    wfc2_p = jnp.zeros((Rp, Sp), jnp.float32).at[:R, :S].set(p['fc2_w'].T)
    bfc2_p = jnp.zeros((1, Sp), jnp.float32).at[:, :S].set(p['fc2_b'].reshape(1, S))

    return dict(
        v=v.reshape(9, HW, 1),
        g=g,
        w1_lat=w1_lat.astype(jnp.bfloat16),
        b1=p['conv1_b'].reshape(1, C).astype(jnp.float32),
        rw1=conv_taps(p['res_conv1_w']).astype(jnp.bfloat16),
        rw2=conv_taps(p['res_conv2_w']).astype(jnp.bfloat16),
        bn1_s=bn1_s.reshape(1, C), bn1_b=bn1_b.reshape(1, C),
        bn2_s=bn2_s.reshape(1, C), bn2_b=bn2_b.reshape(1, C),
        wfc1=wfc1_p.astype(jnp.bfloat16), bfc1=bfc1_p,
        wfc2=wfc2_p.astype(jnp.bfloat16), bfc2=bfc2_p,
    )


# ----------------------------------------------------------------------------
# Forward pass
# ----------------------------------------------------------------------------
def atari_dynamics_forward(latent, actions_one_hot, kp, out_dim):
    B, C, H, W = latent.shape
    A = actions_one_hot.shape[1]
    HW = H * W
    Rp = kp['wfc1'].shape[1]
    Sp = kp['wfc2'].shape[1]
    pad = ((W + 1 + 7) // 8) * 8            # padded-scratch margin (>= W+1, mult of 8)

    # Interface conversion: NCHW -> NHWC-flat (rows = (b, y, x), cols = c).
    x_flat = latent.astype(jnp.float32).transpose(0, 2, 3, 1).reshape(B * HW, C)
    acts = actions_one_hot.astype(jnp.float32)

    full2 = lambda b: (0, 0)
    full3 = lambda b: (0, 0, 0)

    nl_flat = pl.pallas_call(
        _make_trunk_kernel(W, pad),
        out_shape=jax.ShapeDtypeStruct((B * HW, C), jnp.float32),
        grid_spec=pltpu.PrefetchScalarGridSpec(
            num_scalar_prefetch=0,
            grid=(B,),
            in_specs=[
                pl.BlockSpec((HW, C), lambda b: (b, 0)),     # latent rows of batch b (streams)
                pl.BlockSpec((B, A), full2),                 # one-hot actions (resident)
                pl.BlockSpec((9, HW, 1), full3),             # per-tap border validity
                pl.BlockSpec((A, HW, C), full3),             # precomputed action responses
                pl.BlockSpec((9, C, C), full3),              # conv1 weights (latent), bf16
                pl.BlockSpec((1, C), full2),                 # conv1 bias
                pl.BlockSpec((9, C, C), full3),              # res conv1, bf16
                pl.BlockSpec((1, C), full2),                 # bn1 scale
                pl.BlockSpec((1, C), full2),                 # bn1 offset
                pl.BlockSpec((9, C, C), full3),              # res conv2, bf16
                pl.BlockSpec((1, C), full2),                 # bn2 scale
                pl.BlockSpec((1, C), full2),                 # bn2 offset
            ],
            out_specs=pl.BlockSpec((HW, C), lambda b: (b, 0)),
            scratch_shapes=[pltpu.VMEM((HW + 2 * pad, C), jnp.float32)],
        ),
        compiler_params=pltpu.CompilerParams(dimension_semantics=("parallel",)),
    )(x_flat, acts, kp['v'], kp['g'],
      kp['w1_lat'], kp['b1'],
      kp['rw1'], kp['bn1_s'], kp['bn1_b'],
      kp['rw2'], kp['bn2_s'], kp['bn2_b'])

    # Reward head (fc1 weights were permuted to the NHWC flatten at prep time).
    # (B*HW, C) -> (B, HW*C) is a free row-major bitcast.
    x2 = nl_flat.reshape(B, HW * C)
    logits_pad = pl.pallas_call(
        _reward_head_kernel,
        out_shape=jax.ShapeDtypeStruct((B, Sp), jnp.float32),
        grid_spec=pltpu.PrefetchScalarGridSpec(
            num_scalar_prefetch=0,
            grid=(1,),
            in_specs=[
                pl.BlockSpec((B, HW * C), lambda i: (0, 0)),
                pl.BlockSpec((HW * C, Rp), lambda i: (0, 0)),
                pl.BlockSpec((1, Rp), lambda i: (0, 0)),
                pl.BlockSpec((Rp, Sp), lambda i: (0, 0)),
                pl.BlockSpec((1, Sp), lambda i: (0, 0)),
            ],
            out_specs=pl.BlockSpec((B, Sp), lambda i: (0, 0)),
        ),
        compiler_params=pltpu.CompilerParams(dimension_semantics=("arbitrary",)),
    )(x2, kp['wfc1'], kp['bfc1'], kp['wfc2'], kp['bfc2'])

    reward_logits = logits_pad[:, :out_dim]
    new_latent = nl_flat.reshape(B, H, W, C).transpose(0, 3, 1, 2)   # back to NCHW
    return new_latent, reward_logits


# ----------------------------------------------------------------------------
# Torch-layout parameter init + pure-JAX reference (for the correctness check)
# ----------------------------------------------------------------------------
def init_params(key, latent_depth, action_space_size, latent_hw, support_width, reward_head_width):
    C, A = latent_depth, action_space_size
    H = W = latent_hw
    F = C * H * W
    R = reward_head_width
    S = 2 * support_width + 1
    ks = jax.random.split(key, 16)

    def u(k, shape, fan_in):
        b = 1.0 / float(np.sqrt(fan_in))
        return jax.random.uniform(k, shape, jnp.float32, -b, b)

    return dict(
        conv1_w=u(ks[0], (C, C + A, 3, 3), (C + A) * 9),
        conv1_b=u(ks[1], (C,), (C + A) * 9),
        res_conv1_w=u(ks[2], (C, C, 3, 3), C * 9),
        res_conv2_w=u(ks[3], (C, C, 3, 3), C * 9),
        bn1_gamma=jax.random.uniform(ks[4], (C,), jnp.float32, 0.5, 1.5),
        bn1_beta=0.1 * jax.random.normal(ks[5], (C,), jnp.float32),
        bn1_mean=0.1 * jax.random.normal(ks[6], (C,), jnp.float32),
        bn1_var=jax.random.uniform(ks[7], (C,), jnp.float32, 0.5, 1.5),
        bn2_gamma=jax.random.uniform(ks[8], (C,), jnp.float32, 0.5, 1.5),
        bn2_beta=0.1 * jax.random.normal(ks[9], (C,), jnp.float32),
        bn2_mean=0.1 * jax.random.normal(ks[10], (C,), jnp.float32),
        bn2_var=jax.random.uniform(ks[11], (C,), jnp.float32, 0.5, 1.5),
        fc1_w=u(ks[12], (R, F), F),
        fc1_b=u(ks[13], (R,), F),
        fc2_w=u(ks[14], (S, R), R),
        fc2_b=u(ks[15], (S,), R),
    )


def reference_forward(latent, actions_one_hot, p):
    B, C, H, W = latent.shape
    eps = 1e-5
    hp = lax.Precision.HIGHEST

    def conv(x, w, b=None):
        y = lax.conv_general_dilated(x, w, (1, 1), ((1, 1), (1, 1)),
                                     dimension_numbers=('NCHW', 'OIHW', 'NCHW'),
                                     precision=hp)
        return y if b is None else y + b[None, :, None, None]

    def bn(x, g, beta, mean, var):
        return ((x - mean[None, :, None, None]) / jnp.sqrt(var[None, :, None, None] + eps)
                * g[None, :, None, None] + beta[None, :, None, None])

    action_images = jnp.ones((B, H, W), jnp.float32)
    spread = jnp.einsum('bhw,ba->bahw', action_images, actions_one_hot)
    res_input = jnp.concatenate([latent, spread], axis=1)
    out = conv(res_input, p['conv1_w'], p['conv1_b'])
    r = conv(out, p['res_conv1_w'])
    r = jnp.maximum(bn(r, p['bn1_gamma'], p['bn1_beta'], p['bn1_mean'], p['bn1_var']), 0.0)
    r = conv(r, p['res_conv2_w'])
    r = bn(r, p['bn2_gamma'], p['bn2_beta'], p['bn2_mean'], p['bn2_var'])
    new_latent = jnp.maximum(r + out, 0.0)
    flat = new_latent.reshape(B, -1)
    h = jnp.maximum(jnp.dot(flat, p['fc1_w'].T, precision=hp) + p['fc1_b'], 0.0)
    logits = jnp.dot(h, p['fc2_w'].T, precision=hp) + p['fc2_b']
    return new_latent, logits


# ----------------------------------------------------------------------------
if __name__ == "__main__":
    latent_depth = 32
    action_space = 4
    H = W = 8                    # latent_area = 64
    support_width = 10           # full_support_width = 21
    reward_head_width = 50
    batch = 2
    full_support = 2 * support_width + 1

    key = jax.random.PRNGKey(0)
    k_lat, k_act, k_par = jax.random.split(key, 3)
    latent = jax.random.normal(k_lat, (batch, latent_depth, H, W), jnp.float32)
    action_ids = jax.random.randint(k_act, (batch,), 0, action_space)
    actions_one_hot = jax.nn.one_hot(action_ids, action_space, dtype=jnp.float32)

    params = init_params(k_par, latent_depth, action_space, H, support_width, reward_head_width)
    kparams = prepare_params(params, H, W)

    fwd = jax.jit(lambda lat, act: atari_dynamics_forward(lat, act, kparams, full_support))
    new_latent, reward_logits = fwd(latent, actions_one_hot)
    new_latent = jax.block_until_ready(new_latent)
    reward_logits = jax.block_until_ready(reward_logits)

    ref_latent, ref_logits = reference_forward(latent, actions_one_hot, params)

    assert new_latent.shape == (batch, latent_depth, H, W)
    assert reward_logits.shape == (batch, full_support)
    assert jnp.allclose(new_latent, ref_latent, atol=1e-2, rtol=1e-2), \
        float(jnp.max(jnp.abs(new_latent - ref_latent)))
    assert jnp.allclose(reward_logits, ref_logits, atol=1e-2, rtol=1e-2), \
        float(jnp.max(jnp.abs(reward_logits - ref_logits)))

    print("KERNEL_OK")
</pallas_src>

<mosaic_0001>
module attributes {stable_mosaic.version = 11 : i64} {
  func.func @_reward_head_kernel(%arg0: i32, %arg1: memref<2x2048xf32, #tpu.memory_space<vmem>>, %arg2: memref<2048x128xbf16, #tpu.memory_space<vmem>>, %arg3: memref<1x128xf32, #tpu.memory_space<vmem>>, %arg4: memref<128x128xbf16, #tpu.memory_space<vmem>>, %arg5: memref<1x128xf32, #tpu.memory_space<vmem>>, %arg6: memref<2x128xf32, #tpu.memory_space<vmem>>) attributes {dimension_semantics = [#tpu.dimension_semantics<arbitrary>], iteration_bounds = array<i64: 1>, scalar_prefetch = 0 : i64, scratch_operands = 0 : i64, tpu.core_type = #tpu.core_type<tc>, window_params = [{pipeline_mode = #tpu.pipeline_mode<synchronous>, transform_indices = @transform_0, window_bounds = array<i64: 2, 2048>}, {pipeline_mode = #tpu.pipeline_mode<synchronous>, transform_indices = @transform_1, window_bounds = array<i64: 2048, 128>}, {pipeline_mode = #tpu.pipeline_mode<synchronous>, transform_indices = @transform_2, window_bounds = array<i64: 1, 128>}, {pipeline_mode = #tpu.pipeline_mode<synchronous>, transform_indices = @transform_3, window_bounds = array<i64: 128, 128>}, {pipeline_mode = #tpu.pipeline_mode<synchronous>, transform_indices = @transform_4, window_bounds = array<i64: 1, 128>}, {pipeline_mode = #tpu.pipeline_mode<synchronous>, transform_indices = @transform_5, window_bounds = array<i64: 2, 128>}]} {
    %c0 = arith.constant 0 : index
    %c0_0 = arith.constant 0 : index
    %0 = vector.load %arg1[%c0, %c0_0] : memref<2x2048xf32, #tpu.memory_space<vmem>>, vector<2x2048xf32>
    %1 = arith.truncf %0 : vector<2x2048xf32> to vector<2x2048xbf16>
    %c0_1 = arith.constant 0 : index
    %c0_2 = arith.constant 0 : index
    %2 = vector.load %arg2[%c0_1, %c0_2] : memref<2048x128xbf16, #tpu.memory_space<vmem>>, vector<2048x128xbf16>
    %cst = arith.constant dense<0.000000e+00> : vector<2x128xf32>
    %3 = tpu.matmul %1, %2, %cst {dimension_numbers = #tpu.dot_dimension_numbers<[1], [0], [0], [1], [0, 0, 1, 1], [], []>} : vector<2x2048xbf16>, vector<2048x128xbf16>, vector<2x128xf32> -> vector<2x128xf32>
    %c0_3 = arith.constant 0 : index
    %c0_4 = arith.constant 0 : index
    %4 = vector.load %arg3[%c0_3, %c0_4] : memref<1x128xf32, #tpu.memory_space<vmem>>, vector<1x128xf32>
    %5 = vector.broadcast %4 : vector<1x128xf32> to vector<2x128xf32>
    %6 = arith.addf %3, %5 : vector<2x128xf32>
    %cst_5 = arith.constant 0.000000e+00 : f32
    %7 = vector.broadcast %cst_5 : f32 to vector<2x128xf32>
    %8 = arith.maximumf %6, %7 : vector<2x128xf32>
    %9 = arith.truncf %8 : vector<2x128xf32> to vector<2x128xbf16>
    %c0_6 = arith.constant 0 : index
    %c0_7 = arith.constant 0 : index
    %10 = vector.load %arg4[%c0_6, %c0_7] : memref<128x128xbf16, #tpu.memory_space<vmem>>, vector<128x128xbf16>
    %cst_8 = arith.constant dense<0.000000e+00> : vector<2x128xf32>
    %11 = tpu.matmul %9, %10, %cst_8 {dimension_numbers = #tpu.dot_dimension_numbers<[1], [0], [0], [1], [0, 0, 1, 1], [], []>} : vector<2x128xbf16>, vector<128x128xbf16>, vector<2x128xf32> -> vector<2x128xf32>
    %c0_9 = arith.constant 0 : index
    %c0_10 = arith.constant 0 : index
    %12 = vector.load %arg5[%c0_9, %c0_10] : memref<1x128xf32, #tpu.memory_space<vmem>>, vector<1x128xf32>
    %13 = vector.broadcast %12 : vector<1x128xf32> to vector<2x128xf32>
    %14 = arith.addf %11, %13 : vector<2x128xf32>
    %c0_11 = arith.constant 0 : index
    %c0_12 = arith.constant 0 : index
    %15 = vector.load %arg6[%c0_11, %c0_12] : memref<2x128xf32, #tpu.memory_space<vmem>>, vector<2x128xf32>
    tpu.vector_store %arg6[%c0_11, %c0_12], %14 {strides = array<i32>} : memref<2x128xf32, #tpu.memory_space<vmem>>, vector<2x128xf32>,
    return
  }
  func.func @transform_0(%arg0: i32) -> (i32, i32) {
    %c0_i32 = arith.constant 0 : i32
    %c0_i32_0 = arith.constant 0 : i32
    %c0_i32_1 = arith.constant 0 : i32
    return %c0_i32, %c0_i32_0 : i32, i32
  }
  func.func @transform_1(%arg0: i32) -> (i32, i32) {
    %c0_i32 = arith.constant 0 : i32
    %c0_i32_0 = arith.constant 0 : i32
    %c0_i32_1 = arith.constant 0 : i32
    return %c0_i32, %c0_i32_0 : i32, i32
  }
  func.func @transform_2(%arg0: i32) -> (i32, i32) {
    %c0_i32 = arith.constant 0 : i32
    %c0_i32_0 = arith.constant 0 : i32
    %c0_i32_1 = arith.constant 0 : i32
    return %c0_i32, %c0_i32_0 : i32, i32
  }
  func.func @transform_3(%arg0: i32) -> (i32, i32) {
    %c0_i32 = arith.constant 0 : i32
    %c0_i32_0 = arith.constant 0 : i32
    %c0_i32_1 = arith.constant 0 : i32
    return %c0_i32, %c0_i32_0 : i32, i32
  }
  func.func @transform_4(%arg0: i32) -> (i32, i32) {
    %c0_i32 = arith.constant 0 : i32
    %c0_i32_0 = arith.constant 0 : i32
    %c0_i32_1 = arith.constant 0 : i32
    return %c0_i32, %c0_i32_0 : i32, i32
  }
  func.func @transform_5(%arg0: i32) -> (i32, i32) {
    %c0_i32 = arith.constant 0 : i32
    %c0_i32_0 = arith.constant 0 : i32
    %c0_i32_1 = arith.constant 0 : i32
    return %c0_i32, %c0_i32_0 : i32, i32
  }
}

module attributes {stable_mosaic.version = 11 : i64} {
  func.func @kernel(%arg0: i32, %arg1: memref<64x32xf32, #tpu.memory_space<vmem>>, %arg2: memref<2x4xf32, #tpu.memory_space<vmem>>, %arg3: memref<9x64x1xf32, #tpu.memory_space<vmem>>, %arg4: memref<4x64x32xf32, #tpu.memory_space<vmem>>, %arg5: memref<9x32x32xbf16, #tpu.memory_space<vmem>>, %arg6: memref<1x32xf32, #tpu.memory_space<vmem>>, %arg7: memref<9x32x32xbf16, #tpu.memory_space<vmem>>, %arg8: memref<1x32xf32, #tpu.memory_space<vmem>>, %arg9: memref<1x32xf32, #tpu.memory_space<vmem>>, %arg10: memref<9x32x32xbf16, #tpu.memory_space<vmem>>, %arg11: memref<1x32xf32, #tpu.memory_space<vmem>>, %arg12: memref<1x32xf32, #tpu.memory_space<vmem>>, %arg13: memref<64x32xf32, #tpu.memory_space<vmem>>, %arg14: memref<96x32xf32, #tpu.memory_space<vmem>>) attributes {dimension_semantics = [#tpu.dimension_semantics<parallel>], iteration_bounds = array<i64: 2>, scalar_prefetch = 0 : i64, scratch_operands = 1 : i64, tpu.core_type = #tpu.core_type<tc>, window_params = [{transform_indices = @transform_0, window_bounds = array<i64: 64, 32>}, {pipeline_mode = #tpu.pipeline_mode<synchronous>, transform_indices = @transform_1, window_bounds = array<i64: 2, 4>}, {pipeline_mode = #tpu.pipeline_mode<synchronous>, transform_indices = @transform_2, window_bounds = array<i64: 9, 64, 1>}, {pipeline_mode = #tpu.pipeline_mode<synchronous>, transform_indices = @transform_3, window_bounds = array<i64: 4, 64, 32>}, {pipeline_mode = #tpu.pipeline_mode<synchronous>, transform_indices = @transform_4, window_bounds = array<i64: 9, 32, 32>}, {pipeline_mode = #tpu.pipeline_mode<synchronous>, transform_indices = @transform_5, window_bounds = array<i64: 1, 32>}, {pipeline_mode = #tpu.pipeline_mode<synchronous>, transform_indices = @transform_6, window_bounds = array<i64: 9, 32, 32>}, {pipeline_mode = #tpu.pipeline_mode<synchronous>, transform_indices = @transform_7, window_bounds = array<i64: 1, 32>}, {pipeline_mode = #tpu.pipeline_mode<synchronous>, transform_indices = @transform_8, window_bounds = array<i64: 1, 32>}, {pipeline_mode = #tpu.pipeline_mode<synchronous>, transform_indices = @transform_9, window_bounds = array<i64: 9, 32, 32>}, {pipeline_mode = #tpu.pipeline_mode<synchronous>, transform_indices = @transform_10, window_bounds = array<i64: 1, 32>}, {pipeline_mode = #tpu.pipeline_mode<synchronous>, transform_indices = @transform_11, window_bounds = array<i64: 1, 32>}, {transform_indices = @transform_12, window_bounds = array<i64: 64, 32>}]} {
    %cst = arith.constant 0.000000e+00 : f32
    %0 = vector.broadcast %cst : f32 to vector<96x32xf32>
    %c0 = arith.constant 0 : index
    %c0_0 = arith.constant 0 : index
    %1 = vector.load %arg14[%c0, %c0_0] : memref<96x32xf32, #tpu.memory_space<vmem>>, vector<96x32xf32>
    tpu.vector_store %arg14[%c0, %c0_0], %0 {strides = array<i32>} : memref<96x32xf32, #tpu.memory_space<vmem>>, vector<96x32xf32>,
    %c0_1 = arith.constant 0 : index
    %c0_2 = arith.constant 0 : index
    %2 = vector.load %arg1[%c0_1, %c0_2] : memref<64x32xf32, #tpu.memory_space<vmem>>, vector<64x32xf32>
    %c16 = arith.constant 16 : index
    %c0_3 = arith.constant 0 : index
    %3 = vector.load %arg14[%c16, %c0_3] : memref<96x32xf32, #tpu.memory_space<vmem>>, vector<64x32xf32>
    tpu.vector_store %arg14[%c16, %c0_3], %2 {strides = array<i32>} : memref<96x32xf32, #tpu.memory_space<vmem>>, vector<64x32xf32>,
    %c7 = arith.constant 7 : index
    %c0_4 = arith.constant 0 : index
    %4 = vector.load %arg14[%c7, %c0_4] : memref<96x32xf32, #tpu.memory_space<vmem>>, vector<64x32xf32>
    %c0_5 = arith.constant 0 : index
    %c0_6 = arith.constant 0 : index
    %c0_7 = arith.constant 0 : index
    %5 = vector.load %arg3[%c0_5, %c0_6, %c0_7] : memref<9x64x1xf32, #tpu.memory_space<vmem>>, vector<1x64x1xf32>
    %6 = vector.shape_cast %5 : vector<1x64x1xf32> to vector<64x1xf32>
    %7 = vector.broadcast %6 : vector<64x1xf32> to vector<64x32xf32>
    %8 = arith.mulf %7, %4 : vector<64x32xf32>
    %9 = arith.truncf %8 : vector<64x32xf32> to vector<64x32xbf16>
    %c0_8 = arith.constant 0 : index
    %c0_9 = arith.constant 0 : index
    %c0_10 = arith.constant 0 : index
    %10 = vector.load %arg5[%c0_8, %c0_9, %c0_10] : memref<9x32x32xbf16, #tpu.memory_space<vmem>>, vector<1x32x32xbf16>
    %11 = vector.shape_cast %10 : vector<1x32x32xbf16> to vector<32x32xbf16>
    %cst_11 = arith.constant dense<0.000000e+00> : vector<64x32xf32>
    %12 = tpu.matmul %9, %11, %cst_11 {dimension_numbers = #tpu.dot_dimension_numbers<[1], [0], [0], [1], [0, 0, 1, 1], [], []>} : vector<64x32xbf16>, vector<32x32xbf16>, vector<64x32xf32> -> vector<64x32xf32>
    %c8 = arith.constant 8 : index
    %c0_12 = arith.constant 0 : index
    %13 = vector.load %arg14[%c8, %c0_12] : memref<96x32xf32, #tpu.memory_space<vmem>>, vector<64x32xf32>
    %c1 = arith.constant 1 : index
    %c0_13 = arith.constant 0 : index
    %c0_14 = arith.constant 0 : index
    %14 = vector.load %arg3[%c1, %c0_13, %c0_14] : memref<9x64x1xf32, #tpu.memory_space<vmem>>, vector<1x64x1xf32>
    %15 = vector.shape_cast %14 : vector<1x64x1xf32> to vector<64x1xf32>
    %16 = vector.broadcast %15 : vector<64x1xf32> to vector<64x32xf32>
    %17 = arith.mulf %16, %13 : vector<64x32xf32>
    %18 = arith.truncf %17 : vector<64x32xf32> to vector<64x32xbf16>
    %c1_15 = arith.constant 1 : index
    %c0_16 = arith.constant 0 : index
    %c0_17 = arith.constant 0 : index
    %19 = vector.load %arg5[%c1_15, %c0_16, %c0_17] : memref<9x32x32xbf16, #tpu.memory_space<vmem>>, vector<1x32x32xbf16>
    %20 = vector.shape_cast %19 : vector<1x32x32xbf16> to vector<32x32xbf16>
    %cst_18 = arith.constant dense<0.000000e+00> : vector<64x32xf32>
    %21 = tpu.matmul %18, %20, %cst_18 {dimension_numbers = #tpu.dot_dimension_numbers<[1], [0], [0], [1], [0, 0, 1, 1], [], []>} : vector<64x32xbf16>, vector<32x32xbf16>, vector<64x32xf32> -> vector<64x32xf32>
    %22 = arith.addf %12, %21 : vector<64x32xf32>
    %c9 = arith.constant 9 : index
    %c0_19 = arith.constant 0 : index
    %23 = vector.load %arg14[%c9, %c0_19] : memref<96x32xf32, #tpu.memory_space<vmem>>, vector<64x32xf32>
    %c2 = arith.constant 2 : index
    %c0_20 = arith.constant 0 : index
    %c0_21 = arith.constant 0 : index
    %24 = vector.load %arg3[%c2, %c0_20, %c0_21] : memref<9x64x1xf32, #tpu.memory_space<vmem>>, vector<1x64x1xf32>
    %25 = vector.shape_cast %24 : vector<1x64x1xf32> to vector<64x1xf32>
    %26 = vector.broadcast %25 : vector<64x1xf32> to vector<64x32xf32>
    %27 = arith.mulf %26, %23 : vector<64x32xf32>
    %28 = arith.truncf %27 : vector<64x32xf32> to vector<64x32xbf16>
    %c2_22 = arith.constant 2 : index
    %c0_23 = arith.constant 0 : index
    %c0_24 = arith.constant 0 : index
    %29 = vector.load %arg5[%c2_22, %c0_23, %c0_24] : memref<9x32x32xbf16, #tpu.memory_space<vmem>>, vector<1x32x32xbf16>
    %30 = vector.shape_cast %29 : vector<1x32x32xbf16> to vector<32x32xbf16>
    %cst_25 = arith.constant dense<0.000000e+00> : vector<64x32xf32>
    %31 = tpu.matmul %28, %30, %cst_25 {dimension_numbers = #tpu.dot_dimension_numbers<[1], [0], [0], [1], [0, 0, 1, 1], [], []>} : vector<64x32xbf16>, vector<32x32xbf16>, vector<64x32xf32> -> vector<64x32xf32>
    %32 = arith.addf %22, %31 : vector<64x32xf32>
    %c15 = arith.constant 15 : index
    %c0_26 = arith.constant 0 : index
    %33 = vector.load %arg14[%c15, %c0_26] : memref<96x32xf32, #tpu.memory_space<vmem>>, vector<64x32xf32>
    %c3 = arith.constant 3 : index
    %c0_27 = arith.constant 0 : index
    %c0_28 = arith.constant 0 : index
    %34 = vector.load %arg3[%c3, %c0_27, %c0_28] : memref<9x64x1xf32, #tpu.memory_space<vmem>>, vector<1x64x1xf32>
    %35 = vector.shape_cast %34 : vector<1x64x1xf32> to vector<64x1xf32>
    %36 = vector.broadcast %35 : vector<64x1xf32> to vector<64x32xf32>
    %37 = arith.mulf %36, %33 : vector<64x32xf32>
    %38 = arith.truncf %37 : vector<64x32xf32> to vector<64x32xbf16>
    %c3_29 = arith.constant 3 : index
    %c0_30 = arith.constant 0 : index
    %c0_31 = arith.constant 0 : index
    %39 = vector.load %arg5[%c3_29, %c0_30, %c0_31] : memref<9x32x32xbf16, #tpu.memory_space<vmem>>, vector<1x32x32xbf16>
    %40 = vector.shape_cast %39 : vector<1x32x32xbf16> to vector<32x32xbf16>
    %cst_32 = arith.constant dense<0.000000e+00> : vector<64x32xf32>
    %41 = tpu.matmul %38, %40, %cst_32 {dimension_numbers = #tpu.dot_dimension_numbers<[1], [0], [0], [1], [0, 0, 1, 1], [], []>} : vector<64x32xbf16>, vector<32x32xbf16>, vector<64x32xf32> -> vector<64x32xf32>
    %42 = arith.addf %32, %41 : vector<64x32xf32>
    %c16_33 = arith.constant 16 : index
    %c0_34 = arith.constant 0 : index
    %43 = vector.load %arg14[%c16_33, %c0_34] : memref<96x32xf32, #tpu.memory_space<vmem>>, vector<64x32xf32>
    %c4 = arith.constant 4 : index
    %c0_35 = arith.constant 0 : index
    %c0_36 = arith.constant 0 : index
    %44 = vector.load %arg3[%c4, %c0_35, %c0_36] : memref<9x64x1xf32, #tpu.memory_space<vmem>>, vector<1x64x1xf32>
    %45 = vector.shape_cast %44 : vector<1x64x1xf32> to vector<64x1xf32>
    %46 = vector.broadcast %45 : vector<64x1xf32> to vector<64x32xf32>
    %47 = arith.mulf %46, %43 : vector<64x32xf32>
    %48 = arith.truncf %47 : vector<64x32xf32> to vector<64x32xbf16>
    %c4_37 = arith.constant 4 : index
    %c0_38 = arith.constant 0 : index
    %c0_39 = arith.constant 0 : index
    %49 = vector.load %arg5[%c4_37, %c0_38, %c0_39] : memref<9x32x32xbf16, #tpu.memory_space<vmem>>, vector<1x32x32xbf16>
    %50 = vector.shape_cast %49 : vector<1x32x32xbf16> to vector<32x32xbf16>
    %cst_40 = arith.constant dense<0.000000e+00> : vector<64x32xf32>
    %51 = tpu.matmul %48, %50, %cst_40 {dimension_numbers = #tpu.dot_dimension_numbers<[1], [0], [0], [1], [0, 0, 1, 1], [], []>} : vector<64x32xbf16>, vector<32x32xbf16>, vector<64x32xf32> -> vector<64x32xf32>
    %52 = arith.addf %42, %51 : vector<64x32xf32>
    %c17 = arith.constant 17 : index
    %c0_41 = arith.constant 0 : index
    %53 = vector.load %arg14[%c17, %c0_41] : memref<96x32xf32, #tpu.memory_space<vmem>>, vector<64x32xf32>
    %c5 = arith.constant 5 : index
    %c0_42 = arith.constant 0 : index
    %c0_43 = arith.constant 0 : index
    %54 = vector.load %arg3[%c5, %c0_42, %c0_43] : memref<9x64x1xf32, #tpu.memory_space<vmem>>, vector<1x64x1xf32>
    %55 = vector.shape_cast %54 : vector<1x64x1xf32> to vector<64x1xf32>
    %56 = vector.broadcast %55 : vector<64x1xf32> to vector<64x32xf32>
    %57 = arith.mulf %56, %53 : vector<64x32xf32>
    %58 = arith.truncf %57 : vector<64x32xf32> to vector<64x32xbf16>
    %c5_44 = arith.constant 5 : index
    %c0_45 = arith.constant 0 : index
    %c0_46 = arith.constant 0 : index
    %59 = vector.load %arg5[%c5_44, %c0_45, %c0_46] : memref<9x32x32xbf16, #tpu.memory_space<vmem>>, vector<1x32x32xbf16>
    %60 = vector.shape_cast %59 : vector<1x32x32xbf16> to vector<32x32xbf16>
    %cst_47 = arith.constant dense<0.000000e+00> : vector<64x32xf32>
    %61 = tpu.matmul %58, %60, %cst_47 {dimension_numbers = #tpu.dot_dimension_numbers<[1], [0], [0], [1], [0, 0, 1, 1], [], []>} : vector<64x32xbf16>, vector<32x32xbf16>, vector<64x32xf32> -> vector<64x32xf32>
    %62 = arith.addf %52, %61 : vector<64x32xf32>
    %c23 = arith.constant 23 : index
    %c0_48 = arith.constant 0 : index
    %63 = vector.load %arg14[%c23, %c0_48] : memref<96x32xf32, #tpu.memory_space<vmem>>, vector<64x32xf32>
    %c6 = arith.constant 6 : index
    %c0_49 = arith.constant 0 : index
    %c0_50 = arith.constant 0 : index
    %64 = vector.load %arg3[%c6, %c0_49, %c0_50] : memref<9x64x1xf32, #tpu.memory_space<vmem>>, vector<1x64x1xf32>
    %65 = vector.shape_cast %64 : vector<1x64x1xf32> to vector<64x1xf32>
    %66 = vector.broadcast %65 : vector<64x1xf32> to vector<64x32xf32>
    %67 = arith.mulf %66, %63 : vector<64x32xf32>
    %68 = arith.truncf %67 : vector<64x32xf32> to vector<64x32xbf16>
    %c6_51 = arith.constant 6 : index
    %c0_52 = arith.constant 0 : index
    %c0_53 = arith.constant 0 : index
    %69 = vector.load %arg5[%c6_51, %c0_52, %c0_53] : memref<9x32x32xbf16, #tpu.memory_space<vmem>>, vector<1x32x32xbf16>
    %70 = vector.shape_cast %69 : vector<1x32x32xbf16> to vector<32x32xbf16>
    %cst_54 = arith.constant dense<0.000000e+00> : vector<64x32xf32>
    %71 = tpu.matmul %68, %70, %cst_54 {dimension_numbers = #tpu.dot_dimension_numbers<[1], [0], [0], [1], [0, 0, 1, 1], [], []>} : vector<64x32xbf16>, vector<32x32xbf16>, vector<64x32xf32> -> vector<64x32xf32>
    %72 = arith.addf %62, %71 : vector<64x32xf32>
    %c24 = arith.constant 24 : index
    %c0_55 = arith.constant 0 : index
    %73 = vector.load %arg14[%c24, %c0_55] : memref<96x32xf32, #tpu.memory_space<vmem>>, vector<64x32xf32>
    %c7_56 = arith.constant 7 : index
    %c0_57 = arith.constant 0 : index
    %c0_58 = arith.constant 0 : index
    %74 = vector.load %arg3[%c7_56, %c0_57, %c0_58] : memref<9x64x1xf32, #tpu.memory_space<vmem>>, vector<1x64x1xf32>
    %75 = vector.shape_cast %74 : vector<1x64x1xf32> to vector<64x1xf32>
    %76 = vector.broadcast %75 : vector<64x1xf32> to vector<64x32xf32>
    %77 = arith.mulf %76, %73 : vector<64x32xf32>
    %78 = arith.truncf %77 : vector<64x32xf32> to vector<64x32xbf16>
    %c7_59 = arith.constant 7 : index
    %c0_60 = arith.constant 0 : index
    %c0_61 = arith.constant 0 : index
    %79 = vector.load %arg5[%c7_59, %c0_60, %c0_61] : memref<9x32x32xbf16, #tpu.memory_space<vmem>>, vector<1x32x32xbf16>
    %80 = vector.shape_cast %79 : vector<1x32x32xbf16> to vector<32x32xbf16>
    %cst_62 = arith.constant dense<0.000000e+00> : vector<64x32xf32>
    %81 = tpu.matmul %78, %80, %cst_62 {dimension_numbers = #tpu.dot_dimension_numbers<[1], [0], [0], [1], [0, 0, 1, 1], [], []>} : vector<64x32xbf16>, vector<32x32xbf16>, vector<64x32xf32> -> vector<64x32xf32>
    %82 = arith.addf %72, %81 : vector<64x32xf32>
    %c25 = arith.constant 25 : index
    %c0_63 = arith.constant 0 : index
    %83 = vector.load %arg14[%c25, %c0_63] : memref<96x32xf32, #tpu.memory_space<vmem>>, vector<64x32xf32>
    %c8_64 = arith.constant 8 : index
    %c0_65 = arith.constant 0 : index
    %c0_66 = arith.constant 0 : index
    %84 = vector.load %arg3[%c8_64, %c0_65, %c0_66] : memref<9x64x1xf32, #tpu.memory_space<vmem>>, vector<1x64x1xf32>
    %85 = vector.shape_cast %84 : vector<1x64x1xf32> to vector<64x1xf32>
    %86 = vector.broadcast %85 : vector<64x1xf32> to vector<64x32xf32>
    %87 = arith.mulf %86, %83 : vector<64x32xf32>
    %88 = arith.truncf %87 : vector<64x32xf32> to vector<64x32xbf16>
    %c8_67 = arith.constant 8 : index
    %c0_68 = arith.constant 0 : index
    %c0_69 = arith.constant 0 : index
    %89 = vector.load %arg5[%c8_67, %c0_68, %c0_69] : memref<9x32x32xbf16, #tpu.memory_space<vmem>>, vector<1x32x32xbf16>
    %90 = vector.shape_cast %89 : vector<1x32x32xbf16> to vector<32x32xbf16>
    %cst_70 = arith.constant dense<0.000000e+00> : vector<64x32xf32>
    %91 = tpu.matmul %88, %90, %cst_70 {dimension_numbers = #tpu.dot_dimension_numbers<[1], [0], [0], [1], [0, 0, 1, 1], [], []>} : vector<64x32xbf16>, vector<32x32xbf16>, vector<64x32xf32> -> vector<64x32xf32>
    %92 = arith.addf %82, %91 : vector<64x32xf32>
    %93 = arith.index_cast %arg0 : i32 to index
    %c0_71 = arith.constant 0 : index
    %94 = vector.load %arg2[%93, %c0_71] : memref<2x4xf32, #tpu.memory_space<vmem>>, vector<1x4xf32>
    %95 = vector.extract_strided_slice %94 {offsets = [0, 0], sizes = [1, 1], strides = [1, 1]} : vector<1x4xf32> to vector<1x1xf32>
    %c0_72 = arith.constant 0 : index
    %c0_73 = arith.constant 0 : index
    %c0_74 = arith.constant 0 : index
    %96 = vector.load %arg4[%c0_72, %c0_73, %c0_74] : memref<4x64x32xf32, #tpu.memory_space<vmem>>, vector<1x64x32xf32>
    %97 = vector.shape_cast %96 : vector<1x64x32xf32> to vector<64x32xf32>
    %98 = vector.broadcast %95 : vector<1x1xf32> to vector<64x32xf32>
    %99 = arith.mulf %98, %97 : vector<64x32xf32>
    %100 = vector.extract_strided_slice %94 {offsets = [0, 1], sizes = [1, 1], strides = [1, 1]} : vector<1x4xf32> to vector<1x1xf32>
    %c1_75 = arith.constant 1 : index
    %c0_76 = arith.constant 0 : index
    %c0_77 = arith.constant 0 : index
    %101 = vector.load %arg4[%c1_75, %c0_76, %c0_77] : memref<4x64x32xf32, #tpu.memory_space<vmem>>, vector<1x64x32xf32>
    %102 = vector.shape_cast %101 : vector<1x64x32xf32> to vector<64x32xf32>
    %103 = vector.broadcast %100 : vector<1x1xf32> to vector<64x32xf32>
    %104 = arith.mulf %103, %102 : vector<64x32xf32>
    %105 = arith.addf %99, %104 : vector<64x32xf32>
    %106 = vector.extract_strided_slice %94 {offsets = [0, 2], sizes = [1, 1], strides = [1, 1]} : vector<1x4xf32> to vector<1x1xf32>
    %c2_78 = arith.constant 2 : index
    %c0_79 = arith.constant 0 : index
    %c0_80 = arith.constant 0 : index
    %107 = vector.load %arg4[%c2_78, %c0_79, %c0_80] : memref<4x64x32xf32, #tpu.memory_space<vmem>>, vector<1x64x32xf32>
    %108 = vector.shape_cast %107 : vector<1x64x32xf32> to vector<64x32xf32>
    %109 = vector.broadcast %106 : vector<1x1xf32> to vector<64x32xf32>
    %110 = arith.mulf %109, %108 : vector<64x32xf32>
    %111 = arith.addf %105, %110 : vector<64x32xf32>
    %112 = vector.extract_strided_slice %94 {offsets = [0, 3], sizes = [1, 1], strides = [1, 1]} : vector<1x4xf32> to vector<1x1xf32>
    %c3_81 = arith.constant 3 : index
    %c0_82 = arith.constant 0 : index
    %c0_83 = arith.constant 0 : index
    %113 = vector.load %arg4[%c3_81, %c0_82, %c0_83] : memref<4x64x32xf32, #tpu.memory_space<vmem>>, vector<1x64x32xf32>
    %114 = vector.shape_cast %113 : vector<1x64x32xf32> to vector<64x32xf32>
    %115 = vector.broadcast %112 : vector<1x1xf32> to vector<64x32xf32>
    %116 = arith.mulf %115, %114 : vector<64x32xf32>
    %117 = arith.addf %111, %116 : vector<64x32xf32>
    %118 = arith.addf %92, %117 : vector<64x32xf32>
    %c0_84 = arith.constant 0 : index
    %c0_85 = arith.constant 0 : index
    %119 = vector.load %arg6[%c0_84, %c0_85] : memref<1x32xf32, #tpu.memory_space<vmem>>, vector<1x32xf32>
    %120 = vector.broadcast %119 : vector<1x32xf32> to vector<64x32xf32>
    %121 = arith.addf %118, %120 : vector<64x32xf32>
    %c16_86 = arith.constant 16 : index
    %c0_87 = arith.constant 0 : index
    %122 = vector.load %arg14[%c16_86, %c0_87] : memref<96x32xf32, #tpu.memory_space<vmem>>, vector<64x32xf32>
    tpu.vector_store %arg14[%c16_86, %c0_87], %121 {strides = array<i32>} : memref<96x32xf32, #tpu.memory_space<vmem>>, vector<64x32xf32>,
    %c7_88 = arith.constant 7 : index
    %c0_89 = arith.constant 0 : index
    %123 = vector.load %arg14[%c7_88, %c0_89] : memref<96x32xf32, #tpu.memory_space<vmem>>, vector<64x32xf32>
    %c0_90 = arith.constant 0 : index
    %c0_91 = arith.constant 0 : index
    %c0_92 = arith.constant 0 : index
    %124 = vector.load %arg3[%c0_90, %c0_91, %c0_92] : memref<9x64x1xf32, #tpu.memory_space<vmem>>, vector<1x64x1xf32>
    %125 = vector.shape_cast %124 : vector<1x64x1xf32> to vector<64x1xf32>
    %126 = vector.broadcast %125 : vector<64x1xf32> to vector<64x32xf32>
    %127 = arith.mulf %126, %123 : vector<64x32xf32>
    %128 = arith.truncf %127 : vector<64x32xf32> to vector<64x32xbf16>
    %c0_93 = arith.constant 0 : index
    %c0_94 = arith.constant 0 : index
    %c0_95 = arith.constant 0 : index
    %129 = vector.load %arg7[%c0_93, %c0_94, %c0_95] : memref<9x32x32xbf16, #tpu.memory_space<vmem>>, vector<1x32x32xbf16>
    %130 = vector.shape_cast %129 : vector<1x32x32xbf16> to vector<32x32xbf16>
    %cst_96 = arith.constant dense<0.000000e+00> : vector<64x32xf32>
    %131 = tpu.matmul %128, %130, %cst_96 {dimension_numbers = #tpu.dot_dimension_numbers<[1], [0], [0], [1], [0, 0, 1, 1], [], []>} : vector<64x32xbf16>, vector<32x32xbf16>, vector<64x32xf32> -> vector<64x32xf32>
    %c8_97 = arith.constant 8 : index
    %c0_98 = arith.constant 0 : index
    %132 = vector.load %arg14[%c8_97, %c0_98] : memref<96x32xf32, #tpu.memory_space<vmem>>, vector<64x32xf32>
    %c1_99 = arith.constant 1 : index
    %c0_100 = arith.constant 0 : index
    %c0_101 = arith.constant 0 : index
    %133 = vector.load %arg3[%c1_99, %c0_100, %c0_101] : memref<9x64x1xf32, #tpu.memory_space<vmem>>, vector<1x64x1xf32>
    %134 = vector.shape_cast %133 : vector<1x64x1xf32> to vector<64x1xf32>
    %135 = vector.broadcast %134 : vector<64x1xf32> to vector<64x32xf32>
    %136 = arith.mulf %135, %132 : vector<64x32xf32>
    %137 = arith.truncf %136 : vector<64x32xf32> to vector<64x32xbf16>
    %c1_102 = arith.constant 1 : index
    %c0_103 = arith.constant 0 : index
    %c0_104 = arith.constant 0 : index
    %138 = vector.load %arg7[%c1_102, %c0_103, %c0_104] : memref<9x32x32xbf16, #tpu.memory_space<vmem>>, vector<1x32x32xbf16>
    %139 = vector.shape_cast %138 : vector<1x32x32xbf16> to vector<32x32xbf16>
    %cst_105 = arith.constant dense<0.000000e+00> : vector<64x32xf32>
    %140 = tpu.matmul %137, %139, %cst_105 {dimension_numbers = #tpu.dot_dimension_numbers<[1], [0], [0], [1], [0, 0, 1, 1], [], []>} : vector<64x32xbf16>, vector<32x32xbf16>, vector<64x32xf32> -> vector<64x32xf32>
    %141 = arith.addf %131, %140 : vector<64x32xf32>
    %c9_106 = arith.constant 9 : index
    %c0_107 = arith.constant 0 : index
    %142 = vector.load %arg14[%c9_106, %c0_107] : memref<96x32xf32, #tpu.memory_space<vmem>>, vector<64x32xf32>
    %c2_108 = arith.constant 2 : index
    %c0_109 = arith.constant 0 : index
    %c0_110 = arith.constant 0 : index
    %143 = vector.load %arg3[%c2_108, %c0_109, %c0_110] : memref<9x64x1xf32, #tpu.memory_space<vmem>>, vector<1x64x1xf32>
    %144 = vector.shape_cast %143 : vector<1x64x1xf32> to vector<64x1xf32>
    %145 = vector.broadcast %144 : vector<64x1xf32> to vector<64x32xf32>
    %146 = arith.mulf %145, %142 : vector<64x32xf32>
    %147 = arith.truncf %146 : vector<64x32xf32> to vector<64x32xbf16>
    %c2_111 = arith.constant 2 : index
    %c0_112 = arith.constant 0 : index
    %c0_113 = arith.constant 0 : index
    %148 = vector.load %arg7[%c2_111, %c0_112, %c0_113] : memref<9x32x32xbf16, #tpu.memory_space<vmem>>, vector<1x32x32xbf16>
    %149 = vector.shape_cast %148 : vector<1x32x32xbf16> to vector<32x32xbf16>
    %cst_114 = arith.constant dense<0.000000e+00> : vector<64x32xf32>
    %150 = tpu.matmul %147, %149, %cst_114 {dimension_numbers = #tpu.dot_dimension_numbers<[1], [0], [0], [1], [0, 0, 1, 1], [], []>} : vector<64x32xbf16>, vector<32x32xbf16>, vector<64x32xf32> -> vector<64x32xf32>
    %151 = arith.addf %141, %150 : vector<64x32xf32>
    %c15_115 = arith.constant 15 : index
    %c0_116 = arith.constant 0 : index
    %152 = vector.load %arg14[%c15_115, %c0_116] : memref<96x32xf32, #tpu.memory_space<vmem>>, vector<64x32xf32>
    %c3_117 = arith.constant 3 : index
    %c0_118 = arith.constant 0 : index
    %c0_119 = arith.constant 0 : index
    %153 = vector.load %arg3[%c3_117, %c0_118, %c0_119] : memref<9x64x1xf32, #tpu.memory_space<vmem>>, vector<1x64x1xf32>
    %154 = vector.shape_cast %153 : vector<1x64x1xf32> to vector<64x1xf32>
    %155 = vector.broadcast %154 : vector<64x1xf32> to vector<64x32xf32>
    %156 = arith.mulf %155, %152 : vector<64x32xf32>
    %157 = arith.truncf %156 : vector<64x32xf32> to vector<64x32xbf16>
    %c3_120 = arith.constant 3 : index
    %c0_121 = arith.constant 0 : index
    %c0_122 = arith.constant 0 : index
    %158 = vector.load %arg7[%c3_120, %c0_121, %c0_122] : memref<9x32x32xbf16, #tpu.memory_space<vmem>>, vector<1x32x32xbf16>
    %159 = vector.shape_cast %158 : vector<1x32x32xbf16> to vector<32x32xbf16>
    %cst_123 = arith.constant dense<0.000000e+00> : vector<64x32xf32>
    %160 = tpu.matmul %157, %159, %cst_123 {dimension_numbers = #tpu.dot_dimension_numbers<[1], [0], [0], [1], [0, 0, 1, 1], [], []>} : vector<64x32xbf16>, vector<32x32xbf16>, vector<64x32xf32> -> vector<64x32xf32>
    %161 = arith.addf %151, %160 : vector<64x32xf32>
    %c16_124 = arith.constant 16 : index
    %c0_125 = arith.constant 0 : index
    %162 = vector.load %arg14[%c16_124, %c0_125] : memref<96x32xf32, #tpu.memory_space<vmem>>, vector<64x32xf32>
    %c4_126 = arith.constant 4 : index
    %c0_127 = arith.constant 0 : index
    %c0_128 = arith.constant 0 : index
    %163 = vector.load %arg3[%c4_126, %c0_127, %c0_128] : memref<9x64x1xf32, #tpu.memory_space<vmem>>, vector<1x64x1xf32>
    %164 = vector.shape_cast %163 : vector<1x64x1xf32> to vector<64x1xf32>
    %165 = vector.broadcast %164 : vector<64x1xf32> to vector<64x32xf32>
    %166 = arith.mulf %165, %162 : vector<64x32xf32>
    %167 = arith.truncf %166 : vector<64x32xf32> to vector<64x32xbf16>
    %c4_129 = arith.constant 4 : index
    %c0_130 = arith.constant 0 : index
    %c0_131 = arith.constant 0 : index
    %168 = vector.load %arg7[%c4_129, %c0_130, %c0_131] : memref<9x32x32xbf16, #tpu.memory_space<vmem>>, vector<1x32x32xbf16>
    %169 = vector.shape_cast %168 : vector<1x32x32xbf16> to vector<32x32xbf16>
    %cst_132 = arith.constant dense<0.000000e+00> : vector<64x32xf32>
    %170 = tpu.matmul %167, %169, %cst_132 {dimension_numbers = #tpu.dot_dimension_numbers<[1], [0], [0], [1], [0, 0, 1, 1], [], []>} : vector<64x32xbf16>, vector<32x32xbf16>, vector<64x32xf32> -> vector<64x32xf32>
    %171 = arith.addf %161, %170 : vector<64x32xf32>
    %c17_133 = arith.constant 17 : index
    %c0_134 = arith.constant 0 : index
    %172 = vector.load %arg14[%c17_133, %c0_134] : memref<96x32xf32, #tpu.memory_space<vmem>>, vector<64x32xf32>
    %c5_135 = arith.constant 5 : index
    %c0_136 = arith.constant 0 : index
    %c0_137 = arith.constant 0 : index
    %173 = vector.load %arg3[%c5_135, %c0_136, %c0_137] : memref<9x64x1xf32, #tpu.memory_space<vmem>>, vector<1x64x1xf32>
    %174 = vector.shape_cast %173 : vector<1x64x1xf32> to vector<64x1xf32>
    %175 = vector.broadcast %174 : vector<64x1xf32> to vector<64x32xf32>
    %176 = arith.mulf %175, %172 : vector<64x32xf32>
    %177 = arith.truncf %176 : vector<64x32xf32> to vector<64x32xbf16>
    %c5_138 = arith.constant 5 : index
    %c0_139 = arith.constant 0 : index
    %c0_140 = arith.constant 0 : index
    %178 = vector.load %arg7[%c5_138, %c0_139, %c0_140] : memref<9x32x32xbf16, #tpu.memory_space<vmem>>, vector<1x32x32xbf16>
    %179 = vector.shape_cast %178 : vector<1x32x32xbf16> to vector<32x32xbf16>
    %cst_141 = arith.constant dense<0.000000e+00> : vector<64x32xf32>
    %180 = tpu.matmul %177, %179, %cst_141 {dimension_numbers = #tpu.dot_dimension_numbers<[1], [0], [0], [1], [0, 0, 1, 1], [], []>} : vector<64x32xbf16>, vector<32x32xbf16>, vector<64x32xf32> -> vector<64x32xf32>
    %181 = arith.addf %171, %180 : vector<64x32xf32>
    %c23_142 = arith.constant 23 : index
    %c0_143 = arith.constant 0 : index
    %182 = vector.load %arg14[%c23_142, %c0_143] : memref<96x32xf32, #tpu.memory_space<vmem>>, vector<64x32xf32>
    %c6_144 = arith.constant 6 : index
    %c0_145 = arith.constant 0 : index
    %c0_146 = arith.constant 0 : index
    %183 = vector.load %arg3[%c6_144, %c0_145, %c0_146] : memref<9x64x1xf32, #tpu.memory_space<vmem>>, vector<1x64x1xf32>
    %184 = vector.shape_cast %183 : vector<1x64x1xf32> to vector<64x1xf32>
    %185 = vector.broadcast %184 : vector<64x1xf32> to vector<64x32xf32>
    %186 = arith.mulf %185, %182 : vector<64x32xf32>
    %187 = arith.truncf %186 : vector<64x32xf32> to vector<64x32xbf16>
    %c6_147 = arith.constant 6 : index
    %c0_148 = arith.constant 0 : index
    %c0_149 = arith.constant 0 : index
    %188 = vector.load %arg7[%c6_147, %c0_148, %c0_149] : memref<9x32x32xbf16, #tpu.memory_space<vmem>>, vector<1x32x32xbf16>
    %189 = vector.shape_cast %188 : vector<1x32x32xbf16> to vector<32x32xbf16>
    %cst_150 = arith.constant dense<0.000000e+00> : vector<64x32xf32>
    %190 = tpu.matmul %187, %189, %cst_150 {dimension_numbers = #tpu.dot_dimension_numbers<[1], [0], [0], [1], [0, 0, 1, 1], [], []>} : vector<64x32xbf16>, vector<32x32xbf16>, vector<64x32xf32> -> vector<64x32xf32>
    %191 = arith.addf %181, %190 : vector<64x32xf32>
    %c24_151 = arith.constant 24 : index
    %c0_152 = arith.constant 0 : index
    %192 = vector.load %arg14[%c24_151, %c0_152] : memref<96x32xf32, #tpu.memory_space<vmem>>, vector<64x32xf32>
    %c7_153 = arith.constant 7 : index
    %c0_154 = arith.constant 0 : index
    %c0_155 = arith.constant 0 : index
    %193 = vector.load %arg3[%c7_153, %c0_154, %c0_155] : memref<9x64x1xf32, #tpu.memory_space<vmem>>, vector<1x64x1xf32>
    %194 = vector.shape_cast %193 : vector<1x64x1xf32> to vector<64x1xf32>
    %195 = vector.broadcast %194 : vector<64x1xf32> to vector<64x32xf32>
    %196 = arith.mulf %195, %192 : vector<64x32xf32>
    %197 = arith.truncf %196 : vector<64x32xf32> to vector<64x32xbf16>
    %c7_156 = arith.constant 7 : index
    %c0_157 = arith.constant 0 : index
    %c0_158 = arith.constant 0 : index
    %198 = vector.load %arg7[%c7_156, %c0_157, %c0_158] : memref<9x32x32xbf16, #tpu.memory_space<vmem>>, vector<1x32x32xbf16>
    %199 = vector.shape_cast %198 : vector<1x32x32xbf16> to vector<32x32xbf16>
    %cst_159 = arith.constant dense<0.000000e+00> : vector<64x32xf32>
    %200 = tpu.matmul %197, %199, %cst_159 {dimension_numbers = #tpu.dot_dimension_numbers<[1], [0], [0], [1], [0, 0, 1, 1], [], []>} : vector<64x32xbf16>, vector<32x32xbf16>, vector<64x32xf32> -> vector<64x32xf32>
    %201 = arith.addf %191, %200 : vector<64x32xf32>
    %c25_160 = arith.constant 25 : index
    %c0_161 = arith.constant 0 : index
    %202 = vector.load %arg14[%c25_160, %c0_161] : memref<96x32xf32, #tpu.memory_space<vmem>>, vector<64x32xf32>
    %c8_162 = arith.constant 8 : index
    %c0_163 = arith.constant 0 : index
    %c0_164 = arith.constant 0 : index
    %203 = vector.load %arg3[%c8_162, %c0_163, %c0_164] : memref<9x64x1xf32, #tpu.memory_space<vmem>>, vector<1x64x1xf32>
    %204 = vector.shape_cast %203 : vector<1x64x1xf32> to vector<64x1xf32>
    %205 = vector.broadcast %204 : vector<64x1xf32> to vector<64x32xf32>
    %206 = arith.mulf %205, %202 : vector<64x32xf32>
    %207 = arith.truncf %206 : vector<64x32xf32> to vector<64x32xbf16>
    %c8_165 = arith.constant 8 : index
    %c0_166 = arith.constant 0 : index
    %c0_167 = arith.constant 0 : index
    %208 = vector.load %arg7[%c8_165, %c0_166, %c0_167] : memref<9x32x32xbf16, #tpu.memory_space<vmem>>, vector<1x32x32xbf16>
    %209 = vector.shape_cast %208 : vector<1x32x32xbf16> to vector<32x32xbf16>
    %cst_168 = arith.constant dense<0.000000e+00> : vector<64x32xf32>
    %210 = tpu.matmul %207, %209, %cst_168 {dimension_numbers = #tpu.dot_dimension_numbers<[1], [0], [0], [1], [0, 0, 1, 1], [], []>} : vector<64x32xbf16>, vector<32x32xbf16>, vector<64x32xf32> -> vector<64x32xf32>
    %211 = arith.addf %201, %210 : vector<64x32xf32>
    %c0_169 = arith.constant 0 : index
    %c0_170 = arith.constant 0 : index
    %212 = vector.load %arg8[%c0_169, %c0_170] : memref<1x32xf32, #tpu.memory_space<vmem>>, vector<1x32xf32>
    %213 = vector.broadcast %212 : vector<1x32xf32> to vector<64x32xf32>
    %214 = arith.mulf %211, %213 : vector<64x32xf32>
    %c0_171 = arith.constant 0 : index
    %c0_172 = arith.constant 0 : index
    %215 = vector.load %arg9[%c0_171, %c0_172] : memref<1x32xf32, #tpu.memory_space<vmem>>, vector<1x32xf32>
    %216 = vector.broadcast %215 : vector<1x32xf32> to vector<64x32xf32>
    %217 = arith.addf %214, %216 : vector<64x32xf32>
    %cst_173 = arith.constant 0.000000e+00 : f32
    %218 = vector.broadcast %cst_173 : f32 to vector<64x32xf32>
    %219 = arith.maximumf %217, %218 : vector<64x32xf32>
    %c16_174 = arith.constant 16 : index
    %c0_175 = arith.constant 0 : index
    %220 = vector.load %arg14[%c16_174, %c0_175] : memref<96x32xf32, #tpu.memory_space<vmem>>, vector<64x32xf32>
    tpu.vector_store %arg14[%c16_174, %c0_175], %219 {strides = array<i32>} : memref<96x32xf32, #tpu.memory_space<vmem>>, vector<64x32xf32>,
    %c7_176 = arith.constant 7 : index
    %c0_177 = arith.constant 0 : index
    %221 = vector.load %arg14[%c7_176, %c0_177] : memref<96x32xf32, #tpu.memory_space<vmem>>, vector<64x32xf32>
    %c0_178 = arith.constant 0 : index
    %c0_179 = arith.constant 0 : index
    %c0_180 = arith.constant 0 : index
    %222 = vector.load %arg3[%c0_178, %c0_179, %c0_180] : memref<9x64x1xf32, #tpu.memory_space<vmem>>, vector<1x64x1xf32>
    %223 = vector.shape_cast %222 : vector<1x64x1xf32> to vector<64x1xf32>
    %224 = vector.broadcast %223 : vector<64x1xf32> to vector<64x32xf32>
    %225 = arith.mulf %224, %221 : vector<64x32xf32>
    %226 = arith.truncf %225 : vector<64x32xf32> to vector<64x32xbf16>
    %c0_181 = arith.constant 0 : index
    %c0_182 = arith.constant 0 : index
    %c0_183 = arith.constant 0 : index
    %227 = vector.load %arg10[%c0_181, %c0_182, %c0_183] : memref<9x32x32xbf16, #tpu.memory_space<vmem>>, vector<1x32x32xbf16>
    %228 = vector.shape_cast %227 : vector<1x32x32xbf16> to vector<32x32xbf16>
    %cst_184 = arith.constant dense<0.000000e+00> : vector<64x32xf32>
    %229 = tpu.matmul %226, %228, %cst_184 {dimension_numbers = #tpu.dot_dimension_numbers<[1], [0], [0], [1], [0, 0, 1, 1], [], []>} : vector<64x32xbf16>, vector<32x32xbf16>, vector<64x32xf32> -> vector<64x32xf32>
    %c8_185 = arith.constant 8 : index
    %c0_186 = arith.constant 0 : index
    %230 = vector.load %arg14[%c8_185, %c0_186] : memref<96x32xf32, #tpu.memory_space<vmem>>, vector<64x32xf32>
    %c1_187 = arith.constant 1 : index
    %c0_188 = arith.constant 0 : index
    %c0_189 = arith.constant 0 : index
    %231 = vector.load %arg3[%c1_187, %c0_188, %c0_189] : memref<9x64x1xf32, #tpu.memory_space<vmem>>, vector<1x64x1xf32>
    %232 = vector.shape_cast %231 : vector<1x64x1xf32> to vector<64x1xf32>
    %233 = vector.broadcast %232 : vector<64x1xf32> to vector<64x32xf32>
    %234 = arith.mulf %233, %230 : vector<64x32xf32>
    %235 = arith.truncf %234 : vector<64x32xf32> to vector<64x32xbf16>
    %c1_190 = arith.constant 1 : index
    %c0_191 = arith.constant 0 : index
    %c0_192 = arith.constant 0 : index
    %236 = vector.load %arg10[%c1_190, %c0_191, %c0_192] : memref<9x32x32xbf16, #tpu.memory_space<vmem>>, vector<1x32x32xbf16>
    %237 = vector.shape_cast %236 : vector<1x32x32xbf16> to vector<32x32xbf16>
    %cst_193 = arith.constant dense<0.000000e+00> : vector<64x32xf32>
    %238 = tpu.matmul %235, %237, %cst_193 {dimension_numbers = #tpu.dot_dimension_numbers<[1], [0], [0], [1], [0, 0, 1, 1], [], []>} : vector<64x32xbf16>, vector<32x32xbf16>, vector<64x32xf32> -> vector<64x32xf32>
    %239 = arith.addf %229, %238 : vector<64x32xf32>
    %c9_194 = arith.constant 9 : index
    %c0_195 = arith.constant 0 : index
    %240 = vector.load %arg14[%c9_194, %c0_195] : memref<96x32xf32, #tpu.memory_space<vmem>>, vector<64x32xf32>
    %c2_196 = arith.constant 2 : index
    %c0_197 = arith.constant 0 : index
    %c0_198 = arith.constant 0 : index
    %241 = vector.load %arg3[%c2_196, %c0_197, %c0_198] : memref<9x64x1xf32, #tpu.memory_space<vmem>>, vector<1x64x1xf32>
    %242 = vector.shape_cast %241 : vector<1x64x1xf32> to vector<64x1xf32>
    %243 = vector.broadcast %242 : vector<64x1xf32> to vector<64x32xf32>
    %244 = arith.mulf %243, %240 : vector<64x32xf32>
    %245 = arith.truncf %244 : vector<64x32xf32> to vector<64x32xbf16>
    %c2_199 = arith.constant 2 : index
    %c0_200 = arith.constant 0 : index
    %c0_201 = arith.constant 0 : index
    %246 = vector.load %arg10[%c2_199, %c0_200, %c0_201] : memref<9x32x32xbf16, #tpu.memory_space<vmem>>, vector<1x32x32xbf16>
    %247 = vector.shape_cast %246 : vector<1x32x32xbf16> to vector<32x32xbf16>
    %cst_202 = arith.constant dense<0.000000e+00> : vector<64x32xf32>
    %248 = tpu.matmul %245, %247, %cst_202 {dimension_numbers = #tpu.dot_dimension_numbers<[1], [0], [0], [1], [0, 0, 1, 1], [], []>} : vector<64x32xbf16>, vector<32x32xbf16>, vector<64x32xf32> -> vector<64x32xf32>
    %249 = arith.addf %239, %248 : vector<64x32xf32>
    %c15_203 = arith.constant 15 : index
    %c0_204 = arith.constant 0 : index
    %250 = vector.load %arg14[%c15_203, %c0_204] : memref<96x32xf32, #tpu.memory_space<vmem>>, vector<64x32xf32>
    %c3_205 = arith.constant 3 : index
    %c0_206 = arith.constant 0 : index
    %c0_207 = arith.constant 0 : index
    %251 = vector.load %arg3[%c3_205, %c0_206, %c0_207] : memref<9x64x1xf32, #tpu.memory_space<vmem>>, vector<1x64x1xf32>
    %252 = vector.shape_cast %251 : vector<1x64x1xf32> to vector<64x1xf32>
    %253 = vector.broadcast %252 : vector<64x1xf32> to vector<64x32xf32>
    %254 = arith.mulf %253, %250 : vector<64x32xf32>
    %255 = arith.truncf %254 : vector<64x32xf32> to vector<64x32xbf16>
    %c3_208 = arith.constant 3 : index
    %c0_209 = arith.constant 0 : index
    %c0_210 = arith.constant 0 : index
    %256 = vector.load %arg10[%c3_208, %c0_209, %c0_210] : memref<9x32x32xbf16, #tpu.memory_space<vmem>>, vector<1x32x32xbf16>
    %257 = vector.shape_cast %256 : vector<1x32x32xbf16> to vector<32x32xbf16>
    %cst_211 = arith.constant dense<0.000000e+00> : vector<64x32xf32>
    %258 = tpu.matmul %255, %257, %cst_211 {dimension_numbers = #tpu.dot_dimension_numbers<[1], [0], [0], [1], [0, 0, 1, 1], [], []>} : vector<64x32xbf16>, vector<32x32xbf16>, vector<64x32xf32> -> vector<64x32xf32>
    %259 = arith.addf %249, %258 : vector<64x32xf32>
    %c16_212 = arith.constant 16 : index
    %c0_213 = arith.constant 0 : index
    %260 = vector.load %arg14[%c16_212, %c0_213] : memref<96x32xf32, #tpu.memory_space<vmem>>, vector<64x32xf32>
    %c4_214 = arith.constant 4 : index
    %c0_215 = arith.constant 0 : index
    %c0_216 = arith.constant 0 : index
    %261 = vector.load %arg3[%c4_214, %c0_215, %c0_216] : memref<9x64x1xf32, #tpu.memory_space<vmem>>, vector<1x64x1xf32>
    %262 = vector.shape_cast %261 : vector<1x64x1xf32> to vector<64x1xf32>
    %263 = vector.broadcast %262 : vector<64x1xf32> to vector<64x32xf32>
    %264 = arith.mulf %263, %260 : vector<64x32xf32>
    %265 = arith.truncf %264 : vector<64x32xf32> to vector<64x32xbf16>
    %c4_217 = arith.constant 4 : index
    %c0_218 = arith.constant 0 : index
    %c0_219 = arith.constant 0 : index
    %266 = vector.load %arg10[%c4_217, %c0_218, %c0_219] : memref<9x32x32xbf16, #tpu.memory_space<vmem>>, vector<1x32x32xbf16>
    %267 = vector.shape_cast %266 : vector<1x32x32xbf16> to vector<32x32xbf16>
    %cst_220 = arith.constant dense<0.000000e+00> : vector<64x32xf32>
    %268 = tpu.matmul %265, %267, %cst_220 {dimension_numbers = #tpu.dot_dimension_numbers<[1], [0], [0], [1], [0, 0, 1, 1], [], []>} : vector<64x32xbf16>, vector<32x32xbf16>, vector<64x32xf32> -> vector<64x32xf32>
    %269 = arith.addf %259, %268 : vector<64x32xf32>
    %c17_221 = arith.constant 17 : index
    %c0_222 = arith.constant 0 : index
    %270 = vector.load %arg14[%c17_221, %c0_222] : memref<96x32xf32, #tpu.memory_space<vmem>>, vector<64x32xf32>
    %c5_223 = arith.constant 5 : index
    %c0_224 = arith.constant 0 : index
    %c0_225 = arith.constant 0 : index
    %271 = vector.load %arg3[%c5_223, %c0_224, %c0_225] : memref<9x64x1xf32, #tpu.memory_space<vmem>>, vector<1x64x1xf32>
    %272 = vector.shape_cast %271 : vector<1x64x1xf32> to vector<64x1xf32>
    %273 = vector.broadcast %272 : vector<64x1xf32> to vector<64x32xf32>
    %274 = arith.mulf %273, %270 : vector<64x32xf32>
    %275 = arith.truncf %274 : vector<64x32xf32> to vector<64x32xbf16>
    %c5_226 = arith.constant 5 : index
    %c0_227 = arith.constant 0 : index
    %c0_228 = arith.constant 0 : index
    %276 = vector.load %arg10[%c5_226, %c0_227, %c0_228] : memref<9x32x32xbf16, #tpu.memory_space<vmem>>, vector<1x32x32xbf16>
    %277 = vector.shape_cast %276 : vector<1x32x32xbf16> to vector<32x32xbf16>
    %cst_229 = arith.constant dense<0.000000e+00> : vector<64x32xf32>
    %278 = tpu.matmul %275, %277, %cst_229 {dimension_numbers = #tpu.dot_dimension_numbers<[1], [0], [0], [1], [0, 0, 1, 1], [], []>} : vector<64x32xbf16>, vector<32x32xbf16>, vector<64x32xf32> -> vector<64x32xf32>
    %279 = arith.addf %269, %278 : vector<64x32xf32>
    %c23_230 = arith.constant 23 : index
    %c0_231 = arith.constant 0 : index
    %280 = vector.load %arg14[%c23_230, %c0_231] : memref<96x32xf32, #tpu.memory_space<vmem>>, vector<64x32xf32>
    %c6_232 = arith.constant 6 : index
    %c0_233 = arith.constant 0 : index
    %c0_234 = arith.constant 0 : index
    %281 = vector.load %arg3[%c6_232, %c0_233, %c0_234] : memref<9x64x1xf32, #tpu.memory_space<vmem>>, vector<1x64x1xf32>
    %282 = vector.shape_cast %281 : vector<1x64x1xf32> to vector<64x1xf32>
    %283 = vector.broadcast %282 : vector<64x1xf32> to vector<64x32xf32>
    %284 = arith.mulf %283, %280 : vector<64x32xf32>
    %285 = arith.truncf %284 : vector<64x32xf32> to vector<64x32xbf16>
    %c6_235 = arith.constant 6 : index
    %c0_236 = arith.constant 0 : index
    %c0_237 = arith.constant 0 : index
    %286 = vector.load %arg10[%c6_235, %c0_236, %c0_237] : memref<9x32x32xbf16, #tpu.memory_space<vmem>>, vector<1x32x32xbf16>
    %287 = vector.shape_cast %286 : vector<1x32x32xbf16> to vector<32x32xbf16>
    %cst_238 = arith.constant dense<0.000000e+00> : vector<64x32xf32>
    %288 = tpu.matmul %285, %287, %cst_238 {dimension_numbers = #tpu.dot_dimension_numbers<[1], [0], [0], [1], [0, 0, 1, 1], [], []>} : vector<64x32xbf16>, vector<32x32xbf16>, vector<64x32xf32> -> vector<64x32xf32>
    %289 = arith.addf %279, %288 : vector<64x32xf32>
    %c24_239 = arith.constant 24 : index
    %c0_240 = arith.constant 0 : index
    %290 = vector.load %arg14[%c24_239, %c0_240] : memref<96x32xf32, #tpu.memory_space<vmem>>, vector<64x32xf32>
    %c7_241 = arith.constant 7 : index
    %c0_242 = arith.constant 0 : index
    %c0_243 = arith.constant 0 : index
    %291 = vector.load %arg3[%c7_241, %c0_242, %c0_243] : memref<9x64x1xf32, #tpu.memory_space<vmem>>, vector<1x64x1xf32>
    %292 = vector.shape_cast %291 : vector<1x64x1xf32> to vector<64x1xf32>
    %293 = vector.broadcast %292 : vector<64x1xf32> to vector<64x32xf32>
    %294 = arith.mulf %293, %290 : vector<64x32xf32>
    %295 = arith.truncf %294 : vector<64x32xf32> to vector<64x32xbf16>
    %c7_244 = arith.constant 7 : index
    %c0_245 = arith.constant 0 : index
    %c0_246 = arith.constant 0 : index
    %296 = vector.load %arg10[%c7_244, %c0_245, %c0_246] : memref<9x32x32xbf16, #tpu.memory_space<vmem>>, vector<1x32x32xbf16>
    %297 = vector.shape_cast %296 : vector<1x32x32xbf16> to vector<32x32xbf16>
    %cst_247 = arith.constant dense<0.000000e+00> : vector<64x32xf32>
    %298 = tpu.matmul %295, %297, %cst_247 {dimension_numbers = #tpu.dot_dimension_numbers<[1], [0], [0], [1], [0, 0, 1, 1], [], []>} : vector<64x32xbf16>, vector<32x32xbf16>, vector<64x32xf32> -> vector<64x32xf32>
    %299 = arith.addf %289, %298 : vector<64x32xf32>
    %c25_248 = arith.constant 25 : index
    %c0_249 = arith.constant 0 : index
    %300 = vector.load %arg14[%c25_248, %c0_249] : memref<96x32xf32, #tpu.memory_space<vmem>>, vector<64x32xf32>
    %c8_250 = arith.constant 8 : index
    %c0_251 = arith.constant 0 : index
    %c0_252 = arith.constant 0 : index
    %301 = vector.load %arg3[%c8_250, %c0_251, %c0_252] : memref<9x64x1xf32, #tpu.memory_space<vmem>>, vector<1x64x1xf32>
    %302 = vector.shape_cast %301 : vector<1x64x1xf32> to vector<64x1xf32>
    %303 = vector.broadcast %302 : vector<64x1xf32> to vector<64x32xf32>
    %304 = arith.mulf %303, %300 : vector<64x32xf32>
    %305 = arith.truncf %304 : vector<64x32xf32> to vector<64x32xbf16>
    %c8_253 = arith.constant 8 : index
    %c0_254 = arith.constant 0 : index
    %c0_255 = arith.constant 0 : index
    %306 = vector.load %arg10[%c8_253, %c0_254, %c0_255] : memref<9x32x32xbf16, #tpu.memory_space<vmem>>, vector<1x32x32xbf16>
    %307 = vector.shape_cast %306 : vector<1x32x32xbf16> to vector<32x32xbf16>
    %cst_256 = arith.constant dense<0.000000e+00> : vector<64x32xf32>
    %308 = tpu.matmul %305, %307, %cst_256 {dimension_numbers = #tpu.dot_dimension_numbers<[1], [0], [0], [1], [0, 0, 1, 1], [], []>} : vector<64x32xbf16>, vector<32x32xbf16>, vector<64x32xf32> -> vector<64x32xf32>
    %309 = arith.addf %299, %308 : vector<64x32xf32>
    %c0_257 = arith.constant 0 : index
    %c0_258 = arith.constant 0 : index
    %310 = vector.load %arg11[%c0_257, %c0_258] : memref<1x32xf32, #tpu.memory_space<vmem>>, vector<1x32xf32>
    %311 = vector.broadcast %310 : vector<1x32xf32> to vector<64x32xf32>
    %312 = arith.mulf %309, %311 : vector<64x32xf32>
    %c0_259 = arith.constant 0 : index
    %c0_260 = arith.constant 0 : index
    %313 = vector.load %arg12[%c0_259, %c0_260] : memref<1x32xf32, #tpu.memory_space<vmem>>, vector<1x32xf32>
    %314 = vector.broadcast %313 : vector<1x32xf32> to vector<64x32xf32>
    %315 = arith.addf %312, %314 : vector<64x32xf32>
    %316 = arith.addf %315, %121 : vector<64x32xf32>
    %cst_261 = arith.constant 0.000000e+00 : f32
    %317 = vector.broadcast %cst_261 : f32 to vector<64x32xf32>
    %318 = arith.maximumf %316, %317 : vector<64x32xf32>
    %c0_262 = arith.constant 0 : index
    %c0_263 = arith.constant 0 : index
    %319 = vector.load %arg13[%c0_262, %c0_263] : memref<64x32xf32, #tpu.memory_space<vmem>>, vector<64x32xf32>
    tpu.vector_store %arg13[%c0_262, %c0_263], %318 {strides = array<i32>} : memref<64x32xf32, #tpu.memory_space<vmem>>, vector<64x32xf32>,
    return
  }
  func.func @transform_0(%arg0: i32) -> (i32, i32) {
    %c0_i32 = arith.constant 0 : i32
    %c0_i32_0 = arith.constant 0 : i32
    return %arg0, %c0_i32 : i32, i32
  }
  func.func @transform_1(%arg0: i32) -> (i32, i32) {
    %c0_i32 = arith.constant 0 : i32
    %c0_i32_0 = arith.constant 0 : i32
    %c0_i32_1 = arith.constant 0 : i32
    return %c0_i32, %c0_i32_0 : i32, i32
  }
  func.func @transform_2(%arg0: i32) -> (i32, i32, i32) {
    %c0_i32 = arith.constant 0 : i32
    %c0_i32_0 = arith.constant 0 : i32
    %c0_i32_1 = arith.constant 0 : i32
    %c0_i32_2 = arith.constant 0 : i32
    return %c0_i32, %c0_i32_0, %c0_i32_1 : i32, i32, i32
  }
  func.func @transform_3(%arg0: i32) -> (i32, i32, i32) {
    %c0_i32 = arith.constant 0 : i32
    %c0_i32_0 = arith.constant 0 : i32
    %c0_i32_1 = arith.constant 0 : i32
    %c0_i32_2 = arith.constant 0 : i32
    return %c0_i32, %c0_i32_0, %c0_i32_1 : i32, i32, i32
  }
  func.func @transform_4(%arg0: i32) -> (i32, i32, i32) {
    %c0_i32 = arith.constant 0 : i32
    %c0_i32_0 = arith.constant 0 : i32
    %c0_i32_1 = arith.constant 0 : i32
    %c0_i32_2 = arith.constant 0 : i32
    return %c0_i32, %c0_i32_0, %c0_i32_1 : i32, i32, i32
  }
  func.func @transform_5(%arg0: i32) -> (i32, i32) {
    %c0_i32 = arith.constant 0 : i32
    %c0_i32_0 = arith.constant 0 : i32
    %c0_i32_1 = arith.constant 0 : i32
    return %c0_i32, %c0_i32_0 : i32, i32
  }
  func.func @transform_6(%arg0: i32) -> (i32, i32, i32) {
    %c0_i32 = arith.constant 0 : i32
    %c0_i32_0 = arith.constant 0 : i32
    %c0_i32_1 = arith.constant 0 : i32
    %c0_i32_2 = arith.constant 0 : i32
    return %c0_i32, %c0_i32_0, %c0_i32_1 : i32, i32, i32
  }
  func.func @transform_7(%arg0: i32) -> (i32, i32) {
    %c0_i32 = arith.constant 0 : i32
    %c0_i32_0 = arith.constant 0 : i32
    %c0_i32_1 = arith.constant 0 : i32
    return %c0_i32, %c0_i32_0 : i32, i32
  }
  func.func @transform_8(%arg0: i32) -> (i32, i32) {
    %c0_i32 = arith.constant 0 : i32
    %c0_i32_0 = arith.constant 0 : i32
    %c0_i32_1 = arith.constant 0 : i32
    return %c0_i32, %c0_i32_0 : i32, i32
  }
  func.func @transform_9(%arg0: i32) -> (i32, i32, i32) {
    %c0_i32 = arith.constant 0 : i32
    %c0_i32_0 = arith.constant 0 : i32
    %c0_i32_1 = arith.constant 0 : i32
    %c0_i32_2 = arith.constant 0 : i32
    return %c0_i32, %c0_i32_0, %c0_i32_1 : i32, i32, i32
  }
  func.func @transform_10(%arg0: i32) -> (i32, i32) {
    %c0_i32 = arith.constant 0 : i32
    %c0_i32_0 = arith.constant 0 : i32
    %c0_i32_1 = arith.constant 0 : i32
    return %c0_i32, %c0_i32_0 : i32, i32
  }
  func.func @transform_11(%arg0: i32) -> (i32, i32) {
    %c0_i32 = arith.constant 0 : i32
    %c0_i32_0 = arith.constant 0 : i32
    %c0_i32_1 = arith.constant 0 : i32
    return %c0_i32, %c0_i32_0 : i32, i32
  }
  func.func @transform_12(%arg0: i32) -> (i32, i32) {
    %c0_i32 = arith.constant 0 : i32
    %c0_i32_0 = arith.constant 0 : i32
    return %arg0, %c0_i32 : i32, i32
  }
}

</mosaic_0001>

<bundles_post_ra>
// kernel: _lambda_.3
= control target key start
LH: loop header
LB: loop body
LE: loop exit
PB: predicated region body
PF: predicated region fallthrough
CT: control target
= control target key end

     0   :  { %v34_v28 = vlaneseq  ;;  %v2120_v36 = vmov 1983009808   ;;  %s2602_s0 = inlined_call_operand.vmem [shape: f32[2,2048], index: 0, kind: input, shape index: {}]   ;;  %s2603_s1 = inlined_call_operand.vmem [shape: bf16[2048,128], index: 1, kind: input, shape index: {}]   ;;  %s2604_s2 = inlined_call_operand.vmem [shape: f32[1,128], index: 2, kind: input, shape index: {}]   ;;  %s2605_s3 = inlined_call_operand.vmem [shape: bf16[128,128], index: 3, kind: input, shape index: {}]   ;;  %s2606_s4 = inlined_call_operand.vmem [shape: f32[1,128], index: 4, kind: input, shape index: {}]   ;;  %s2607_s5 = inlined_call_operand.hbm [shape: f32[2,128], index: 5, kind: output, shape index: {}]  }
   0x1   :  { %v1956_v0 = vld [vmem:[%s2603_s1 + $0x40] sm:$0xff]   ;;  %v1960_v4 = vld [vmem:[%s2603_s1 + $0x48] sm:$0xff]   ;;  %v1964_v8 = vld [vmem:[%s2603_s1 + $0x50] sm:$0xff]   ;;  %v32_v37 = vunpack.c.l.s4 %v2120_v36 }
   0x2   :  { %v1957_v1 = vld [vmem:[%s2603_s1 + $0xc0] sm:$0xff]   ;;  %1747 = vmatprep.subr.bf16.mxu0 %v1956_v0  ;;  %v1961_v5 = vld [vmem:[%s2603_s1 + $0xc8] sm:$0xff]   ;;  %v1965_v9 = vld [vmem:[%s2603_s1 + $0xd0] sm:$0xff]   ;;  %v35_v33 = vshrl.u32 %v34_v28, 7 }
   0x3   :  { %v1958_v2 = vld [vmem:[%s2603_s1] sm:$0xff]   ;;  %1769 = vmatprep.subr.bf16.mxu1 %v1957_v1  ;;  %v1962_v6 = vld [vmem:[%s2603_s1 + $0x8] sm:$0xff]   ;;  %v1966_v10 = vld [vmem:[%s2603_s1 + $0x10] sm:$0xff]   ;;  %v33_v39 = vunpack.c.0.s8 %v32_v37 }
   0x4   :  { %v1959_v3 = vld [vmem:[%s2603_s1 + $0x80] sm:$0xff]   ;;  %1748 = vmatpush3.bf16.msra.mxu0 %v1958_v2  ;;  %v1963_v7 = vld [vmem:[%s2603_s1 + $0x88] sm:$0xff]   ;;  %v1967_v11 = vld [vmem:[%s2603_s1 + $0x90] sm:$0xff]  }
   0x5   :  { %1770 = vmatpush3.bf16.msra.mxu1 %v1959_v3  ;;  %1749 = vmatprep.subr.bf16.mxu0 %v1960_v4  ;;  %v1968_v12 = vld [vmem:[%s2603_s1 + $0x58] sm:$0xff]   ;;  %v1972_v16 = vld [vmem:[%s2603_s1 + $0x60] sm:$0xff]   ;;  %v1976_v20 = vld [vmem:[%s2603_s1 + $0x68] sm:$0xff]   ;;  %v2259_v41 = vsub.s32 %v33_v39, %v35_v33 }
   0x6   :  { %1771 = vmatprep.subr.bf16.mxu1 %v1961_v5  ;;  %v1969_v13 = vld [vmem:[%s2603_s1 + $0xd8] sm:$0xff]   ;;  %v1973_v17 = vld [vmem:[%s2603_s1 + $0xe0] sm:$0xff]   ;;  %v1977_v21 = vld [vmem:[%s2603_s1 + $0xe8] sm:$0xff]  }
   0x7   :  { %v1970_v14 = vld [vmem:[%s2603_s1 + $0x18] sm:$0xff]   ;;  %v1974_v18 = vld [vmem:[%s2603_s1 + $0x20] sm:$0xff]   ;;  %v1978_v22 = vld [vmem:[%s2603_s1 + $0x28] sm:$0xff]  }
   0x8   :  { %1750 = vmatpush3.bf16.msra.mxu0 %v1962_v6  ;;  %v1971_v15 = vld [vmem:[%s2603_s1 + $0x98] sm:$0xff]   ;;  %v1975_v19 = vld [vmem:[%s2603_s1 + $0xa0] sm:$0xff]   ;;  %v1979_v23 = vld [vmem:[%s2603_s1 + $0xa8] sm:$0xff]  }
   0x9   :  { %1772 = vmatpush3.bf16.msra.mxu1 %v1963_v7  ;;  %1751 = vmatprep.subr.bf16.mxu0 %v1964_v8  ;;  %v1980_v24 = vld [vmem:[%s2603_s1 + $0x70] sm:$0xff]   ;;  %v1984_v29 = vld [vmem:[%s2603_s1 + $0x78] sm:$0xff]   ;;  %v22_v34 = vld [vmem:[%s2602_s0] sm:$0xff] }
   0xa   :  { %1773 = vmatprep.subr.bf16.mxu1 %v1965_v9  ;;  %v1981_v25 = vld [vmem:[%s2603_s1 + $0xf0] sm:$0xff]   ;;  %v1985_v30 = vld [vmem:[%s2603_s1 + $0xf8] sm:$0xff]   ;;  %v1989_v35 = vld [vmem:[%s2603_s1 + $0x140] sm:$0xff]   ;;  %v30_v40 = vcombine.high %v22_v34, %v22_v34  ;;  %v37_v42 = vrot.slane %v22_v34, %v2259_v41 }
   0xb   :  { %v1982_v26 = vld [vmem:[%s2603_s1 + $0x30] sm:$0xff]   ;;  %v1986_v31 = vld [vmem:[%s2603_s1 + $0x38] sm:$0xff]   ;;  %v1990_v38 = vld [vmem:[%s2603_s1 + $0x1c0] sm:$0xff]  }
   0xc   :  { %1752 = vmatpush3.bf16.msra.mxu0 %v1966_v10  ;;  %v1983_v27 = vld [vmem:[%s2603_s1 + $0xb0] sm:$0xff]   ;;  %v1987_v32 = vld [vmem:[%s2603_s1 + $0xb8] sm:$0xff]   ;;  %v44_v43 = vrot.slane %v30_v40, %v2259_v41  ;;  %v45_v44 = vcombine.high %v37_v42, %v37_v42  ;;  %v1991_v46 = vld [vmem:[%s2603_s1 + $0x100] sm:$0xff]   ;;  %v114_v47 = vpack.c.bf16 %v37_v42, %v37_v42 }
   0xd   :  { %1774 = vmatpush3.bf16.msra.mxu1 %v1967_v11  ;;  %1753 = vmatprep.subr.bf16.mxu0 %v1968_v12  ;;  %v1992_v49 = vld [vmem:[%s2603_s1 + $0x180] sm:$0xff]   ;;  %v1993_v52 = vld [vmem:[%s2603_s1 + $0x148] sm:$0xff]   ;;  %v1997_v56 = vld [vmem:[%s2603_s1 + $0x150] sm:$0xff]  }
   0xe   :  { %1775 = vmatprep.subr.bf16.mxu1 %v1969_v13  ;;  %v46_v45 = vcombine.high %v44_v43, %v44_v43  ;;  %v116_v48 = vpack.c.bf16 %v44_v43, %v44_v43  ;;  %v115_v50 = vpack.c.bf16 %v45_v44, %v45_v44  ;;  %v1994_v53 = vld [vmem:[%s2603_s1 + $0x1c8] sm:$0xff]   ;;  %v1998_v57 = vld [vmem:[%s2603_s1 + $0x1d0] sm:$0xff]   ;;  %v2001_v60 = vld [vmem:[%s2603_s1 + $0x158] sm:$0xff]  }
   0xf   :  { %v1995_v54 = vld [vmem:[%s2603_s1 + $0x108] sm:$0xff]   ;;  %v1999_v58 = vld [vmem:[%s2603_s1 + $0x110] sm:$0xff]   ;;  %v2002_v61 = vld [vmem:[%s2603_s1 + $0x1d8] sm:$0xff]  }
  0x10   :  { %1754 = vmatpush3.bf16.msra.mxu0 %v1970_v14  ;;  %v117_v51 = vpack.c.bf16 %v46_v45, %v46_v45  ;;  %1193 = vmatprep.mubr.bf16.mxu0 %v115_v50  ;;  %v1996_v55 = vld [vmem:[%s2603_s1 + $0x188] sm:$0xff]   ;;  %v2000_v59 = vld [vmem:[%s2603_s1 + $0x190] sm:$0xff]   ;;  %v2003_v62 = vld [vmem:[%s2603_s1 + $0x118] sm:$0xff]  }
  0x11   :  { %1776 = vmatpush3.bf16.msra.mxu1 %v1971_v15  ;;  %1755 = vmatprep.subr.bf16.mxu0 %v1972_v16  ;;  %v2004_v63 = vld [vmem:[%s2603_s1 + $0x198] sm:$0xff]   ;;  %v2005_v0 = vld [vmem:[%s2603_s1 + $0x160] sm:$0xff]   ;;  %v2009_v4 = vld [vmem:[%s2603_s1 + $0x168] sm:$0xff]  }
  0x12   :  { %1777 = vmatprep.subr.bf16.mxu1 %v1973_v17  ;;  %1233 = vmatprep.mubr.bf16.mxu1 %v117_v51  ;;  %v2006_v1 = vld [vmem:[%s2603_s1 + $0x1e0] sm:$0xff]   ;;  %v2010_v5 = vld [vmem:[%s2603_s1 + $0x1e8] sm:$0xff]   ;;  %v2013_v8 = vld [vmem:[%s2603_s1 + $0x170] sm:$0xff]  }
  0x13   :  { %v2007_v2 = vld [vmem:[%s2603_s1 + $0x120] sm:$0xff]   ;;  %v2011_v6 = vld [vmem:[%s2603_s1 + $0x128] sm:$0xff]   ;;  %v2014_v9 = vld [vmem:[%s2603_s1 + $0x1f0] sm:$0xff]  }
  0x14   :  { %1756 = vmatpush3.bf16.msra.mxu0 %v1974_v18  ;;  %v2008_v3 = vld [vmem:[%s2603_s1 + $0x1a0] sm:$0xff]   ;;  %v2012_v7 = vld [vmem:[%s2603_s1 + $0x1a8] sm:$0xff]   ;;  %v2015_v11 = vld [vmem:[%s2603_s1 + $0x130] sm:$0xff]  }
  0x15   :  { %1778 = vmatpush3.bf16.msra.mxu1 %v1975_v19  ;;  %1757 = vmatprep.subr.bf16.mxu0 %v1976_v20  ;;  %v23_v10 = vld [vmem:[%s2602_s0 + $0x8] sm:$0xff]  ;;  %v2016_v14 = vld [vmem:[%s2603_s1 + $0x1b0] sm:$0xff]   ;;  %v2017_v15 = vld [vmem:[%s2603_s1 + $0x178] sm:$0xff]  }
  0x16   :  { %1779 = vmatprep.subr.bf16.mxu1 %v1977_v21  ;;  %v54_v12 = vrot.slane %v23_v10, %v2259_v41  ;;  %v47_v13 = vcombine.high %v23_v10, %v23_v10  ;;  %v2018_v18 = vld [vmem:[%s2603_s1 + $0x1f8] sm:$0xff]   ;;  %v2029_v33 = vld [vmem:[%s2603_s1 + $0x288] sm:$0xff]   ;;  %v2030_v34 = vld [vmem:[%s2603_s1 + $0x250] sm:$0xff]  }
  0x17   :  { %v2019_v19 = vld [vmem:[%s2603_s1 + $0x138] sm:$0xff]   ;;  %v2032_v36 = vld [vmem:[%s2603_s1 + $0x210] sm:$0xff]   ;;  %v2038_v43 = vld [vmem:[%s2603_s1 + $0x260] sm:$0xff]  }
  0x18   :  { %1758 = vmatpush3.bf16.msra.mxu0 %v1978_v22  ;;  %v62_v16 = vcombine.high %v54_v12, %v54_v12  ;;  %v61_v17 = vrot.slane %v47_v13, %v2259_v41  ;;  %v2020_v22 = vld [vmem:[%s2603_s1 + $0x1b8] sm:$0xff]   ;;  %v2033_v37 = vld [vmem:[%s2603_s1 + $0x290] sm:$0xff]   ;;  %v2039_v44 = vld [vmem:[%s2603_s1 + $0x2e0] sm:$0xff]  }
  0x19   :  { %1780 = vmatpush3.bf16.msra.mxu1 %v1979_v23  ;;  %1759 = vmatprep.subr.bf16.mxu0 %v1980_v24  ;;  %v2022_v24 = vld [vmem:[%s2603_s1 + $0x240] sm:$0xff]   ;;  %v2035_v39 = vld [vmem:[%s2603_s1 + $0x2d8] sm:$0xff]   ;;  %v2045_v50 = vld [vmem:[%s2603_s1 + $0x2a8] sm:$0xff]  }
  0x1a   :  { %1781 = vmatprep.subr.bf16.mxu1 %v1981_v25  ;;  %v119_v20 = vpack.c.bf16 %v62_v16, %v62_v16  ;;  %v63_v21 = vcombine.high %v61_v17, %v61_v17  ;;  %v2023_v25 = vld [vmem:[%s2603_s1 + $0x2c0] sm:$0xff]   ;;  %v120_v28 = vpack.c.bf16 %v61_v17, %v61_v17  ;;  %v2036_v40 = vld [vmem:[%s2603_s1 + $0x218] sm:$0xff]   ;;  %v2046_v51 = vld [vmem:[%s2603_s1 + $0x270] sm:$0xff]  }
  0x1b   :  { %v2037_v42 = vld [vmem:[%s2603_s1 + $0x298] sm:$0xff]   ;;  %v2040_v45 = vld [vmem:[%s2603_s1 + $0x220] sm:$0xff]   ;;  %v2060_v10 = vld [vmem:[%s2603_s1 + $0x3c8] sm:$0xff]  }
  0x1c   :  { %1760 = vmatpush3.bf16.msra.mxu0 %v1982_v26  ;;  %v121_v23 = vpack.c.bf16 %v63_v21, %v63_v21  ;;  %v2024_v26 = vld [vmem:[%s2603_s1 + $0x200] sm:$0xff]   ;;  %v2063_v13 = vld [vmem:[%s2603_s1 + $0x350] sm:$0xff]   ;;  %v2067_v17 = vld [vmem:[%s2603_s1 + $0x358] sm:$0xff]  }
  0x1d   :  { %1782 = vmatpush3.bf16.msra.mxu1 %v1983_v27  ;;  %1761 = vmatprep.subr.bf16.mxu0 %v1984_v29  ;;  %v118_v27 = vpack.c.bf16 %v54_v12, %v54_v12  ;;  %v2025_v29 = vld [vmem:[%s2603_s1 + $0x280] sm:$0xff]   ;;  %v2062_v12 = vld [vmem:[%s2603_s1 + $0x388] sm:$0xff]   ;;  %v2066_v16 = vld [vmem:[%s2603_s1 + $0x390] sm:$0xff]  }
  0x1e   :  { %1783 = vmatprep.subr.bf16.mxu1 %v1985_v30  ;;  %v2026_v30 = vld [vmem:[%s2603_s1 + $0x248] sm:$0xff]   ;;  %v2071_v21 = vld [vmem:[%s2603_s1 + $0x360] sm:$0xff]  }
  0x20   :  { %1762 = vmatpush3.bf16.msra.mxu0 %v1986_v31  ;;  %v2027_v31 = vld [vmem:[%s2603_s1 + $0x2c8] sm:$0xff]  }
  0x21   :  { %1784 = vmatpush3.bf16.msra.mxu1 %v1987_v32  ;;  %1791 = vmatprep.subr.bf16.mxu0 %v1989_v35  ;;  %v2028_v32 = vld [vmem:[%s2603_s1 + $0x208] sm:$0xff]   ;;  %v2031_v35 = vld [vmem:[%s2603_s1 + $0x2d0] sm:$0xff]  }
  0x22   :  { %1813 = vmatprep.subr.bf16.mxu1 %v1990_v38  ;;  %v2034_v38 = vld [vmem:[%s2603_s1 + $0x258] sm:$0xff]  }
  0x23   :  { %1194 = vmatmul.mubr.bf16.vlgmr.msra.gmra.mrb[0].mxu0 %v114_v47  ;;  %v2042_v47 = vld [vmem:[%s2603_s1 + $0x268] sm:$0xff]  }
  0x24   :  { %1234 = vmatmul.mubr.bf16.vlgmr.msra.gmra.mrb[0].mxu1 %v116_v48  ;;  %1792 = vmatpush3.bf16.msra.mxu0 %v1991_v46  ;;  %v2041_v46 = vld [vmem:[%s2603_s1 + $0x2a0] sm:$0xff]   ;;  %v2043_v48 = vld [vmem:[%s2603_s1 + $0x2e8] sm:$0xff]  }
  0x25   :  { %1814 = vmatpush3.bf16.msra.mxu1 %v1992_v49  ;;  %1793 = vmatprep.subr.bf16.mxu0 %v1993_v52  ;;  %v2044_v49 = vld [vmem:[%s2603_s1 + $0x228] sm:$0xff]   ;;  %v2047_v52 = vld [vmem:[%s2603_s1 + $0x2f0] sm:$0xff]  }
  0x26   :  { %1815 = vmatprep.subr.bf16.mxu1 %v1994_v53  ;;  %1273 = vmatprep.mubr.bf16.mxu0 %v119_v20  ;;  %v24_v53 = vld [vmem:[%s2602_s0 + $0x10] sm:$0xff]  ;;  %v2070_v20 = vld [vmem:[%s2603_s1 + $0x398] sm:$0xff]  }
  0x27   :  { %1313 = vmatprep.mubr.bf16.mxu1 %v121_v23  ;;  %v2073_v23 = vld [vmem:[%s2603_s1 + $0x320] sm:$0xff]  }
  0x28   :  { %1794 = vmatpush3.bf16.msra.mxu0 %v1995_v54  ;;  %v2048_v54 = vld [vmem:[%s2603_s1 + $0x230] sm:$0xff]  }
  0x29   :  { %1816 = vmatpush3.bf16.msra.mxu1 %v1996_v55  ;;  %1795 = vmatprep.subr.bf16.mxu0 %v1997_v56  ;;  %v71_v55 = vrot.slane %v24_v53, %v2259_v41  ;;  %v64_v56 = vcombine.high %v24_v53, %v24_v53 }
  0x2a   :  { %1817 = vmatprep.subr.bf16.mxu1 %v1998_v57  ;;  %v2049_v57 = vld [vmem:[%s2603_s1 + $0x2b0] sm:$0xff]  }
  0x2c   :  { %1796 = vmatpush3.bf16.msra.mxu0 %v1999_v58  ;;  %v2050_v58 = vld [vmem:[%s2603_s1 + $0x278] sm:$0xff]  }
  0x2d   :  { %1818 = vmatpush3.bf16.msra.mxu1 %v2000_v59  ;;  %1797 = vmatprep.subr.bf16.mxu0 %v2001_v60  ;;  %v79_v59 = vcombine.high %v71_v55, %v71_v55  ;;  %v78_v60 = vrot.slane %v64_v56, %v2259_v41 }
  0x2e   :  { %1819 = vmatprep.subr.bf16.mxu1 %v2002_v61  ;;  %v2051_v61 = vld [vmem:[%s2603_s1 + $0x2f8] sm:$0xff]  }
  0x30   :  { %1798 = vmatpush3.bf16.msra.mxu0 %v2003_v62  ;;  %v2052_v62 = vld [vmem:[%s2603_s1 + $0x238] sm:$0xff]  }
  0x31   :  { %1820 = vmatpush3.bf16.msra.mxu1 %v2004_v63  ;;  %1799 = vmatprep.subr.bf16.mxu0 %v2005_v0  ;;  %v123_v63 = vpack.c.bf16 %v79_v59, %v79_v59  ;;  %v80_v0 = vcombine.high %v78_v60, %v78_v60 }
  0x32   :  { %1821 = vmatprep.subr.bf16.mxu1 %v2006_v1  ;;  %v2053_v1 = vld [vmem:[%s2603_s1 + $0x2b8] sm:$0xff]  }
  0x34   :  { %1800 = vmatpush3.bf16.msra.mxu0 %v2007_v2  ;;  %v125_v2 = vpack.c.bf16 %v80_v0, %v80_v0 }
  0x35   :  { %1822 = vmatpush3.bf16.msra.mxu1 %v2008_v3  ;;  %1801 = vmatprep.subr.bf16.mxu0 %v2009_v4  ;;  %v2055_v3 = vld [vmem:[%s2603_s1 + $0x340] sm:$0xff]  }
  0x36   :  { %1823 = vmatprep.subr.bf16.mxu1 %v2010_v5  ;;  %v2056_v4 = vld [vmem:[%s2603_s1 + $0x3c0] sm:$0xff]  }
  0x37   :  { %v2057_v5 = vld [vmem:[%s2603_s1 + $0x300] sm:$0xff]  }
  0x38   :  { %1802 = vmatpush3.bf16.msra.mxu0 %v2011_v6  ;;  %v122_v6 = vpack.c.bf16 %v71_v55, %v71_v55 }
  0x39   :  { %1824 = vmatpush3.bf16.msra.mxu1 %v2012_v7  ;;  %1803 = vmatprep.subr.bf16.mxu0 %v2013_v8  ;;  %v124_v7 = vpack.c.bf16 %v78_v60, %v78_v60  ;;  %v2058_v8 = vld [vmem:[%s2603_s1 + $0x380] sm:$0xff]  }
  0x3a   :  { %1825 = vmatprep.subr.bf16.mxu1 %v2014_v9  ;;  %v2059_v9 = vld [vmem:[%s2603_s1 + $0x348] sm:$0xff]  }
  0x3c   :  { %1804 = vmatpush3.bf16.msra.mxu0 %v2015_v11  ;;  %v2061_v11 = vld [vmem:[%s2603_s1 + $0x308] sm:$0xff]  }
  0x3d   :  { %1826 = vmatpush3.bf16.msra.mxu1 %v2016_v14  ;;  %1805 = vmatprep.subr.bf16.mxu0 %v2017_v15  ;;  %v2064_v14 = vld [vmem:[%s2603_s1 + $0x3d0] sm:$0xff]  }
  0x3e   :  { %1827 = vmatprep.subr.bf16.mxu1 %v2018_v18  ;;  %v2065_v15 = vld [vmem:[%s2603_s1 + $0x310] sm:$0xff]   ;;  %v2068_v18 = vld [vmem:[%s2603_s1 + $0x3d8] sm:$0xff]  }
  0x40   :  { %1806 = vmatpush3.bf16.msra.mxu0 %v2019_v19  ;;  %v2069_v19 = vld [vmem:[%s2603_s1 + $0x318] sm:$0xff]  }
  0x41   :  { %1828 = vmatpush3.bf16.msra.mxu1 %v2020_v22  ;;  %1835 = vmatprep.subr.bf16.mxu0 %v2022_v24  ;;  %v2072_v22 = vld [vmem:[%s2603_s1 + $0x3e0] sm:$0xff]  }
  0x42   :  { %1857 = vmatprep.subr.bf16.mxu1 %v2023_v25  ;;  %v2074_v24 = vld [vmem:[%s2603_s1 + $0x3a0] sm:$0xff]   ;;  %v2075_v25 = vld [vmem:[%s2603_s1 + $0x368] sm:$0xff]  }
  0x43   :  { %1274 = vmatmul.mubr.bf16.vlgmr.msra.gmra.mrb[4].mxu0 %v118_v27  ;;  %v2077_v27 = vld [vmem:[%s2603_s1 + $0x328] sm:$0xff]  }
  0x44   :  { %1314 = vmatmul.mubr.bf16.vlgmr.msra.gmra.mrb[4].mxu1 %v120_v28  ;;  %1836 = vmatpush3.bf16.msra.mxu0 %v2024_v26  ;;  %v2076_v26 = vld [vmem:[%s2603_s1 + $0x3e8] sm:$0xff]  }
  0x45   :  { %1858 = vmatpush3.bf16.msra.mxu1 %v2025_v29  ;;  %1837 = vmatprep.subr.bf16.mxu0 %v2026_v30  ;;  %v2078_v28 = vld [vmem:[%s2603_s1 + $0x3a8] sm:$0xff]   ;;  %v2079_v29 = vld [vmem:[%s2603_s1 + $0x370] sm:$0xff]  }
  0x46   :  { %1859 = vmatprep.subr.bf16.mxu1 %v2027_v31  ;;  %1353 = vmatprep.mubr.bf16.mxu0 %v123_v63  ;;  %v2080_v30 = vld [vmem:[%s2603_s1 + $0x3f0] sm:$0xff]  }
  0x47   :  { %1393 = vmatprep.mubr.bf16.mxu1 %v125_v2  ;;  %v2081_v31 = vld [vmem:[%s2603_s1 + $0x330] sm:$0xff]  }
  0x48   :  { %1838 = vmatpush3.bf16.msra.mxu0 %v2028_v32  ;;  %v2082_v32 = vld [vmem:[%s2603_s1 + $0x3b0] sm:$0xff]  }
  0x49   :  { %1860 = vmatpush3.bf16.msra.mxu1 %v2029_v33  ;;  %1839 = vmatprep.subr.bf16.mxu0 %v2030_v34  ;;  %v25_v33 = vld [vmem:[%s2602_s0 + $0x18] sm:$0xff] }
  0x4a   :  { %1861 = vmatprep.subr.bf16.mxu1 %v2031_v35  ;;  %v2083_v34 = vld [vmem:[%s2603_s1 + $0x378] sm:$0xff]  }
  0x4b   :  { %v2084_v35 = vld [vmem:[%s2603_s1 + $0x3f8] sm:$0xff]  }
  0x4c   :  { %1840 = vmatpush3.bf16.msra.mxu0 %v2032_v36  ;;  %v88_v36 = vrot.slane %v25_v33, %v2259_v41 }
  0x4d   :  { %1862 = vmatpush3.bf16.msra.mxu1 %v2033_v37  ;;  %1841 = vmatprep.subr.bf16.mxu0 %v2034_v38  ;;  %v81_v37 = vcombine.high %v25_v33, %v25_v33 }
  0x4e   :  { %1863 = vmatprep.subr.bf16.mxu1 %v2035_v39  ;;  %v96_v38 = vcombine.high %v88_v36, %v88_v36 }
  0x4f   :  { %v95_v39 = vrot.slane %v81_v37, %v2259_v41 }
  0x50   :  { %1842 = vmatpush3.bf16.msra.mxu0 %v2036_v40  ;;  %v127_v40 = vpack.c.bf16 %v96_v38, %v96_v38 }
  0x51   :  { %1864 = vmatpush3.bf16.msra.mxu1 %v2037_v42  ;;  %1843 = vmatprep.subr.bf16.mxu0 %v2038_v43  ;;  %v97_v42 = vcombine.high %v95_v39, %v95_v39  ;;  %v2085_v43 = vld [vmem:[%s2603_s1 + $0x338] sm:$0xff]  }
  0x52   :  { %1865 = vmatprep.subr.bf16.mxu1 %v2039_v44  ;;  %v2086_v44 = vld [vmem:[%s2603_s1 + $0x3b8] sm:$0xff]  }
  0x54   :  { %1844 = vmatpush3.bf16.msra.mxu0 %v2040_v45 }
  0x55   :  { %1866 = vmatpush3.bf16.msra.mxu1 %v2041_v46  ;;  %1845 = vmatprep.subr.bf16.mxu0 %v2042_v47 }
  0x56   :  { %1867 = vmatprep.subr.bf16.mxu1 %v2043_v48 }
  0x58   :  { %1846 = vmatpush3.bf16.msra.mxu0 %v2044_v49 }
  0x59   :  { %1868 = vmatpush3.bf16.msra.mxu1 %v2045_v50  ;;  %1847 = vmatprep.subr.bf16.mxu0 %v2046_v51 }
  0x5a   :  { %1869 = vmatprep.subr.bf16.mxu1 %v2047_v52 }
  0x5c   :  { %1848 = vmatpush3.bf16.msra.mxu0 %v2048_v54 }
  0x5d   :  { %1870 = vmatpush3.bf16.msra.mxu1 %v2049_v57  ;;  %1849 = vmatprep.subr.bf16.mxu0 %v2050_v58 }
  0x5e   :  { %1871 = vmatprep.subr.bf16.mxu1 %v2051_v61 }
  0x60   :  { %1850 = vmatpush3.bf16.msra.mxu0 %v2052_v62 }
  0x61   :  { %1872 = vmatpush3.bf16.msra.mxu1 %v2053_v1  ;;  %1879 = vmatprep.subr.bf16.mxu0 %v2055_v3 }
  0x62   :  { %1901 = vmatprep.subr.bf16.mxu1 %v2056_v4 }
  0x63   :  { %1354 = vmatmul.mubr.bf16.vlgmr.msra.gmra.mrb[8].mxu0 %v122_v6 }
  0x64   :  { %1394 = vmatmul.mubr.bf16.vlgmr.msra.gmra.mrb[8].mxu1 %v124_v7  ;;  %1880 = vmatpush3.bf16.msra.mxu0 %v2057_v5 }
  0x65   :  { %1902 = vmatpush3.bf16.msra.mxu1 %v2058_v8  ;;  %1881 = vmatprep.subr.bf16.mxu0 %v2059_v9 }
  0x66   :  { %1903 = vmatprep.subr.bf16.mxu1 %v2060_v10 }
  0x68   :  { %1882 = vmatpush3.bf16.msra.mxu0 %v2061_v11 }
  0x69   :  { %1904 = vmatpush3.bf16.msra.mxu1 %v2062_v12  ;;  %1883 = vmatprep.subr.bf16.mxu0 %v2063_v13 }
  0x6a   :  { %1905 = vmatprep.subr.bf16.mxu1 %v2064_v14 }
  0x6c   :  { %1884 = vmatpush3.bf16.msra.mxu0 %v2065_v15 }
  0x6d   :  { %1906 = vmatpush3.bf16.msra.mxu1 %v2066_v16  ;;  %1885 = vmatprep.subr.bf16.mxu0 %v2067_v17 }
  0x6e   :  { %1907 = vmatprep.subr.bf16.mxu1 %v2068_v18 }
  0x70   :  { %1886 = vmatpush3.bf16.msra.mxu0 %v2069_v19 }
  0x71   :  { %1908 = vmatpush3.bf16.msra.mxu1 %v2070_v20  ;;  %1887 = vmatprep.subr.bf16.mxu0 %v2071_v21 }
  0x72   :  { %1909 = vmatprep.subr.bf16.mxu1 %v2072_v22 }
  0x74   :  { %1888 = vmatpush3.bf16.msra.mxu0 %v2073_v23 }
  0x75   :  { %1910 = vmatpush3.bf16.msra.mxu1 %v2074_v24  ;;  %1889 = vmatprep.subr.bf16.mxu0 %v2075_v25 }
  0x76   :  { %1911 = vmatprep.subr.bf16.mxu1 %v2076_v26 }
  0x78   :  { %1890 = vmatpush3.bf16.msra.mxu0 %v2077_v27 }
  0x79   :  { %1912 = vmatpush3.bf16.msra.mxu1 %v2078_v28  ;;  %1891 = vmatprep.subr.bf16.mxu0 %v2079_v29 }
  0x7a   :  { %1913 = vmatprep.subr.bf16.mxu1 %v2080_v30 }
  0x7c   :  { %1892 = vmatpush3.bf16.msra.mxu0 %v2081_v31 }
  0x7d   :  { %1914 = vmatpush3.bf16.msra.mxu1 %v2082_v32 }
  0x7e   :  { %10 = vsyncpa [#allocation3], 0  ;;  %1893 = vmatprep.subr.bf16.mxu0 %v2083_v34  ;;  %1915 = vmatprep.subr.bf16.mxu1 %v2084_v35  ;;  %v129_v45 = vpack.c.bf16 %v97_v42, %v97_v42  ;;  %v126_v46 = vpack.c.bf16 %v88_v36, %v88_v36  ;;  %v128_v41 = vpack.c.bf16 %v95_v39, %v95_v39  ;;  %v2088_v47 = vld [vmem:[%s2605_s3] sm:$0xff]   ;;  %v2121_v48 = vmov 0.0   ;;  %v2089_v49 = vld [vmem:[%s2605_s3 + $0x8] sm:$0xff]   ;;  %s2123_s23 = smov [#allocation2]  }
  0x7f   :  { %1433 = vmatprep.mubr.bf16.mxu0 %v127_v40  ;;  %v2090_v50 = vld [vmem:[%s2605_s3 + $0x10] sm:$0xff]   ;;  %v2091_v51 = vld [vmem:[%s2605_s3 + $0x18] sm:$0xff]   ;;  %v2092_v52 = vld [vmem:[%s2605_s3 + $0x20] sm:$0xff]   ;;  %vm2122_vm0 = vmmov 0   ;;  %s1601_s24 = sshll.u32 %s2123_s23, 4  ;;  %s1602_s24 = int_to_ptr.vmem [resolvable:$true] %s1601_s24 }
  0x80   :  { %1473 = vmatprep.mubr.bf16.mxu1 %v129_v45  ;;  %1894 = vmatpush3.bf16.msra.mxu0 %v2085_v43  ;;  %v2093_v53 = vld [vmem:[%s2605_s3 + $0x28] sm:$0xff]   ;;  %v2094_v54 = vld [vmem:[%s2605_s3 + $0x30] sm:$0xff]   ;;  %v2095_v55 = vld [vmem:[%s2605_s3 + $0x38] sm:$0xff]   ;;  %s2096_s25 = scalar_lea.vmem %s1602_s24, 32  ;;  %p2101_p1 = scmp.lt.s32.totalorder %s1602_s24, %s1602_s24 }
  0x81   :  { %1916 = vmatpush3.bf16.msra.mxu1 %v2086_v44  ;;  %1932 = vmatprep.subr.bf16.mxu0 %v2121_v48  ;;  %v1609_v58 = vld [vmem:[%s2604_s2] ss:$0 sm:$0xff]  ;;  %p2097_p0 = scmp.ne.s32.totalorder %s1602_s24, %s2096_s25  ;;  %p2102_p2 = scmp.lt.s32.totalorder %s2096_s25, %s2096_s25 }
  0x82   :  { %v1738_v44 = vld [vmem:[%s2606_s4] ss:$0 sm:$0xff] }
  0x83   :  { %1434 = vmatmul.mubr.bf16.vlgmr.msra.gmra.mrb[12].mxu0 %v126_v46  ;;  %p2103_p3 = por %p2102_p2, %p2101_p1 }
  0x84   :  { %1474 = vmatmul.mubr.bf16.vlgmr.msra.gmra.mrb[12].mxu1 %v128_v41  ;;  %1933 = vmatpush3.bf16.msra.mxu0 %v2088_v47 }
  0x85   :  { %1934 = vmatprep.subr.bf16.mxu0 %v2121_v48  ;;  %1948 = vmatprep.mubr.msk.bf16.mxu0 %vm2122_vm0, %v2121_v48  ;;  %p2104_p4 = pnand %p2103_p3, %p2097_p0 }
  0x88   :  { %1935 = vmatpush3.bf16.msra.mxu0 %v2089_v49 }
  0x89   :  { %1936 = vmatprep.subr.bf16.mxu0 %v2121_v48 }
  0x8c   :  { %1937 = vmatpush3.bf16.msra.mxu0 %v2090_v50 }
  0x8d   :  { %1938 = vmatprep.subr.bf16.mxu0 %v2121_v48 }
  0x90   :  { %1939 = vmatpush3.bf16.msra.mxu0 %v2091_v51 }
  0x91   :  { %1940 = vmatprep.subr.bf16.mxu0 %v2121_v48 }
  0x94   :  { %1941 = vmatpush3.bf16.msra.mxu0 %v2092_v52 }
  0x95   :  { %1942 = vmatprep.subr.bf16.mxu0 %v2121_v48 }
  0x98   :  { %1943 = vmatpush3.bf16.msra.mxu0 %v2093_v53 }
  0x99   :  { %1944 = vmatprep.subr.bf16.mxu0 %v2121_v48 }
  0x9c   :  { %1945 = vmatpush3.bf16.msra.mxu0 %v2094_v54 }
  0x9d   :  { %1946 = vmatprep.subr.bf16.mxu0 %v2121_v48 }
  0xa0   :  { %1947 = vmatpush3.bf16.msra.mxu0 %v2095_v55 }
  0xf6   :  { %v1763_v56 = vpop.f32.mrb[0].mxu0 }
  0xf7   :  { %v1785_v57 = vpop.f32.mrb[0].mxu1  ;;  %v1764_v59 = vpop.f32.mrb[1].mxu0 }
  0xf8   :  { %v1786_v60 = vpop.f32.mrb[1].mxu1  ;;  %v1765_v61 = vadd.f32 %v1764_v59, %v1763_v56  ;;  %v1766_v63 = vpop.f32.mrb[2].mxu0 }
  0xf9   :  { %v1787_v62 = vadd.f32 %v1786_v60, %v1785_v57  ;;  %v1788_v0 = vpop.f32.mrb[2].mxu1  ;;  %v1767_v1 = vpop.f32.mrb[3].mxu0 }
  0xfa   :  { %v1789_v2 = vpop.f32.mrb[3].mxu1  ;;  %v1196_v3 = vadd.f32 %v1765_v61, %v1609_v58 }
  0xfc   :  { %v1236_v4 = vadd.f32 %v1787_v62, %v1196_v3 }
 0x116   :  { %v1807_v5 = vpop.f32.mrb[4].mxu0 }
 0x117   :  { %v1829_v6 = vpop.f32.mrb[4].mxu1  ;;  %v1808_v7 = vpop.f32.mrb[5].mxu0 }
 0x118   :  { %v1830_v8 = vpop.f32.mrb[5].mxu1  ;;  %v1809_v9 = vadd.f32 %v1808_v7, %v1807_v5  ;;  %v1810_v11 = vpop.f32.mrb[6].mxu0 }
 0x119   :  { %v1831_v10 = vadd.f32 %v1830_v8, %v1829_v6  ;;  %v1832_v12 = vpop.f32.mrb[6].mxu1  ;;  %v1811_v13 = vpop.f32.mrb[7].mxu0 }
 0x11a   :  { %v1833_v14 = vpop.f32.mrb[7].mxu1  ;;  %v1276_v15 = vadd.f32 %v1809_v9, %v1236_v4 }
 0x11c   :  { %v1316_v16 = vadd.f32 %v1831_v10, %v1276_v15 }
 0x136   :  { %v1851_v17 = vpop.f32.mrb[8].mxu0 }
 0x137   :  { %v1873_v18 = vpop.f32.mrb[8].mxu1  ;;  %v1852_v19 = vpop.f32.mrb[9].mxu0 }
 0x138   :  { %v1874_v20 = vpop.f32.mrb[9].mxu1  ;;  %v1853_v21 = vadd.f32 %v1852_v19, %v1851_v17  ;;  %v1854_v23 = vpop.f32.mrb[10].mxu0 }
 0x139   :  { %v1875_v22 = vadd.f32 %v1874_v20, %v1873_v18  ;;  %v1876_v24 = vpop.f32.mrb[10].mxu1  ;;  %v1855_v25 = vpop.f32.mrb[11].mxu0 }
 0x13a   :  { %v1877_v26 = vpop.f32.mrb[11].mxu1  ;;  %v1356_v27 = vadd.f32 %v1853_v21, %v1316_v16 }
 0x13c   :  { %v1396_v28 = vadd.f32 %v1875_v22, %v1356_v27 }
 0x156   :  { %v1895_v29 = vpop.f32.mrb[12].mxu0 }
 0x157   :  { %v1917_v30 = vpop.f32.mrb[12].mxu1  ;;  %v1896_v31 = vpop.f32.mrb[13].mxu0 }
 0x158   :  { %v1918_v32 = vpop.f32.mrb[13].mxu1  ;;  %v1897_v33 = vadd.f32 %v1896_v31, %v1895_v29  ;;  %v1898_v35 = vpop.f32.mrb[14].mxu0 }
 0x159   :  { %v1919_v34 = vadd.f32 %v1918_v32, %v1917_v30  ;;  %v1920_v36 = vpop.f32.mrb[14].mxu1  ;;  %v1899_v37 = vpop.f32.mrb[15].mxu0 }
 0x15a   :  { %v1921_v38 = vpop.f32.mrb[15].mxu1  ;;  %v1436_v39 = vadd.f32 %v1897_v33, %v1396_v28 }
 0x15c   :  { %v1476_v40 = vadd.f32 %v1919_v34, %v1436_v39 }
 0x15e   :  { %v1481_v42 = vmax.f32 %v1476_v40, 0.0 }
 0x160   :  { %v1482_v43 = vpack.c.bf16 %v1481_v42, %v1481_v42 }
 0x162   :  { %1949 = vmatmul.mubr.bf16.vlgmr.msra.gmra.mrb[16].mxu0 %v1482_v43 }
 0x235   :  { %v1588_v45 = vpop.f32.mrb[16].mxu0 }
 0x236   :  { %v1589_v46 = vadd.f32 %v1738_v44, %v1588_v45  ;;  %v1950_v41 = vpop.f32.mrb[17].mxu0 }
 0x237   :  { %v1591_v47 = vpop.f32.mrb[18].mxu0 }
 0x238   :  { %1594 = vst [vmem:[#allocation2] sm:$0x3] %v1589_v46  ;;  %v1951_v48 = vpop.f32.mrb[19].mxu0 }
 0x239   :  { %2107 = shalt.err (!%p2104_p4)
}
 0x23a   :  { %s2108_s4 = scalar_lea.hbm %s2607_s5, 32 }
 0x23b   :  { %p2109_p5 = scmp.ne.s32.totalorder %s2607_s5, %s2108_s4  ;;  %p2112_p6 = scmp.lt.u32.totalorder %s2108_s4, %s2607_s5 }
 0x23d   :  { %p2114_p7 = pnand %p2112_p6, %p2109_p5 }
 0x23f   :  { %2117 = shalt.err (!%p2114_p7)
}
 0x240   :  { %1604 = dma.vmem_to_hbm [thread:$0]  %s1602_s24, 32, %s2607_s5, [#allocation3]  }
 0x241   :  { %2118 = dma.done.wait [#allocation3], 32  }
 0x242   :  { %2119 = vsyncadd [#allocation3], 4294967264 }
 0x243   :  { %1608 = vsyncpa [#allocation3], 1 }

// kernel: _lambda_.2
= control target key start
LH: loop header
LB: loop body
LE: loop exit
PB: predicated region body
PF: predicated region fallthrough
CT: control target
= control target key end

     0   :  { %s8917_s0 = inlined_call_operand.hbm [shape: f32[128,32], index: 0, kind: input, shape index: {}]   ;;  %s8918_s1 = inlined_call_operand.hbm [shape: f32[2,4], index: 1, kind: input, shape index: {}]   ;;  %s8919_s2 = inlined_call_operand.hbm [shape: f32[9,64,1], index: 2, kind: input, shape index: {}]   ;;  %s8920_s3 = inlined_call_operand.hbm [shape: f32[4,64,32], index: 3, kind: input, shape index: {}]   ;;  %s8921_s4 = inlined_call_operand.hbm [shape: bf16[9,32,32], index: 4, kind: input, shape index: {}]   ;;  %s8922_s5 = inlined_call_operand.hbm [shape: f32[1,32], index: 5, kind: input, shape index: {}]   ;;  %s8923_s6 = inlined_call_operand.hbm [shape: bf16[9,32,32], index: 6, kind: input, shape index: {}]   ;;  %s8924_s7 = inlined_call_operand.hbm [shape: f32[1,32], index: 7, kind: input, shape index: {}]   ;;  %s8925_s8 = inlined_call_operand.hbm [shape: f32[1,32], index: 8, kind: input, shape index: {}]   ;;  %s8926_s9 = inlined_call_operand.hbm [shape: bf16[9,32,32], index: 9, kind: input, shape index: {}]   ;;  %s8927_s10 = inlined_call_operand.hbm [shape: f32[1,32], index: 10, kind: input, shape index: {}]   ;;  %s8928_s11 = inlined_call_operand.hbm [shape: f32[1,32], index: 11, kind: input, shape index: {}]   ;;  %s8929_s12 = inlined_call_operand.vmem [shape: f32[128,32], index: 12, kind: output, shape index: {}]  }
   0x1   :  { %8955 = sst [smem:[#allocation62_spill]] %s8918_s1 }
   0x2   :  { %8956 = sst [smem:[#allocation63_spill]] %s8919_s2 }
   0x3   :  { %8957 = sst [smem:[#allocation64_spill]] %s8920_s3 }
   0x4   :  { %8958 = sst [smem:[#allocation65_spill]] %s8921_s4 }
   0x5   :  { %8959 = sst [smem:[#allocation66_spill]] %s8929_s12 }
   0x6   :  { %17 = vsyncpa [#allocation4], 0 }
   0x7   :  { %19 = vsyncpa [#allocation4 + $0x1], 0 }
   0x8   :  { %20 = vsyncpa [#allocation6], 0 }
   0x9   :  { %21 = vsyncpa [#allocation9], 0 }
   0xa   :  { %22 = vsyncpa [#allocation12], 0 }
   0xb   :  { %23 = vsyncpa [#allocation15], 0 }
   0xc   :  { %24 = vsyncpa [#allocation18], 0 }
   0xd   :  { %25 = vsyncpa [#allocation21], 0  ;;  %s7181_s21 = smov 0   ;;  %s7183_s22 = smov 0  }
   0xe   :  { %s7185_s23 = smov 0   ;;  %s7187_s24 = smov 0  }
   0xf LB: > { %s7095_s25 = smov [#allocation5]   ;;  %s8930_s27 = sadd.s32 4294967295, %s7093_s24   ;;  %s7093_s24 = sphi %s7187_s24, %s9091_s24   ;;  %s7089_s23 = sphi %s7185_s23, %s9090_s23   ;;  %s7085_s22 = sphi %s7183_s22, %s9089_s22   ;;  %s7081_s21 = sphi %s7181_s21, %s9088_s21  }
  0x10   : > { %s332_s26 = sshll.u32 %s7095_s25, 4  ;;  %p5579_p0 = scmp.ge.s32.totalorder %s7093_s24, 1  ;;  %s333_s26 = int_to_ptr.vmem [resolvable:$true] %s332_s26 }
  0x11   : > { %p7205_p1 = scmp.eq.s32.totalorder %s8930_s27, 0  ;;  %p319_p2 = scmp.lt.s32.totalorder %s7093_s24, 3 }
  0x12   : > { %s7096_s30 = smov [#allocation8]   ;;  %s7097_s15 = smov [#allocation11]  }
  0x13   : > { %s8960_s28 = scalar_select %p7205_p1, 1, 0 }
  0x14   : > { %p7210_p3 = pnand %p5579_p0, %p319_p2  ;;  %s355_s13 = sshll.u32 %s7096_s30, 4  ;;  %s7222_s13 = int_to_ptr.vmem [resolvable:$true] %s355_s13 }
  0x15   : > { %s382_s16 = sshll.u32 %s7097_s15, 4  ;;  %s8964_s1 = sld [smem:[#allocation62_spill]]  ;;  %s7224_s16 = int_to_ptr.vmem [resolvable:$true] %s382_s16 }
  0x16   : > { %s8961_s29 = scalar_select %p7210_p3, 1, 0 }
  0x17   : > { %p6520_p4 = pneg %p7210_p3 }
  0x18   : > { %8962 = sst [smem:[#allocation29_spill]] %s8961_s29 }
  0x19   : > { %p7218_p5 = pnand %p6520_p4, %p7205_p1 }
  0x1b   : > { %s6697_s19 = scalar_lea.hbm %s8964_s1, 32  ;;  %p7234_p7 = pneg %p7218_p5 }
  0x1c   : > { %p6698_p6 = scmp.ne.s32.totalorder %s8964_s1, %s6697_s19  ;;  %p6704_p10 = scmp.lt.u32.totalorder %s6697_s19, %s8964_s1 }
  0x1e   : > { %p6700_p8 = pnand %p7234_p7, %p6698_p6 }
  0x20   : > { %p6701_p9 = pneg %p6700_p8 }
  0x22   : > { %p6706_p11 = pnand %p6704_p10, %p6701_p9 }
  0x24   : > { %6709 = shalt.err (!%p6706_p11)
}
  0x25   : > { %s6710_s17 = scalar_lea.vmem %s333_s26, 32  ;;  %p6718_p2 = scmp.lt.s32.totalorder %s333_s26, %s333_s26 }
  0x26   : > { %p6711_p12 = scmp.ne.s32.totalorder %s333_s26, %s6710_s17  ;;  %p6719_p4 = scmp.lt.s32.totalorder %s6710_s17, %s6710_s17 }
  0x28   : > { %p6713_p13 = pnand %p6711_p12, %p7234_p7  ;;  %p6720_p3 = por %p6719_p4, %p6718_p2 }
  0x2a   : > { %p6714_p0 = pneg %p6713_p13 }
  0x2c   : > { %p6721_p1 = pnand %p6720_p3, %p6714_p0 }
  0x2e   : > { %6724 = shalt.err (!%p6721_p1)
}
  0x2f   : > { %6523 = dma.hbm_to_vmem [thread:$0]  (!%p7218_p5), %s8964_s1, 32, %s333_s26, [#allocation6]  }
  0x30   : > { %s8966_s3 = sld [smem:[#allocation64_spill]] }
  0x36   : > { %s6725_s25 = scalar_lea.hbm %s8966_s3, 4096 }
  0x37   : > { %p6726_p6 = scmp.ne.s32.totalorder %s8966_s3, %s6725_s25  ;;  %p6732_p1 = scmp.lt.u32.totalorder %s6725_s25, %s8966_s3 }
  0x39   : > { %p6728_p8 = pnand %p6726_p6, %p7234_p7 }
  0x3b   : > { %p6729_p9 = pneg %p6728_p8 }
  0x3d   : > { %p6734_p3 = pnand %p6732_p1, %p6729_p9 }
  0x3f   : > { %6737 = shalt.err (!%p6734_p3)
}
  0x40   : > { %s6738_s26 = scalar_lea.vmem %s7222_s13, 4096  ;;  %p6746_p13 = scmp.lt.s32.totalorder %s7222_s13, %s7222_s13 }
  0x41   : > { %p6739_p10 = scmp.ne.s32.totalorder %s7222_s13, %s6738_s26  ;;  %p6747_p0 = scmp.lt.s32.totalorder %s6738_s26, %s6738_s26 }
  0x43   : > { %p6741_p11 = pnand %p6739_p10, %p7234_p7  ;;  %p6748_p2 = por %p6747_p0, %p6746_p13 }
  0x45   : > { %p6742_p12 = pneg %p6741_p11 }
  0x47   : > { %p6749_p4 = pnand %p6748_p2, %p6742_p12 }
  0x49   : > { %6752 = shalt.err (!%p6749_p4)
}
  0x4a   : > { %s8935_s12 = smov 128   ;;  %s8937_s29 = smov 8  }
  0x4b   : > { %6529 = dma.hbm_to_vmem [thread:$0]  (!%p7218_p5), %s8966_s3, 4096, %s7222_s13, [#allocation9], %s8935_s12, %s8935_s12, %s8937_s29  }
  0x4c   : > { %s6753_s25 = scalar_lea.hbm %s8922_s5, 16 }
  0x4d   : > { %p6754_p6 = scmp.ne.s32.totalorder %s8922_s5, %s6753_s25  ;;  %p6760_p1 = scmp.lt.u32.totalorder %s6753_s25, %s8922_s5 }
  0x4f   : > { %p6756_p8 = pnand %p6754_p6, %p7234_p7 }
  0x51   : > { %p6757_p9 = pneg %p6756_p8 }
  0x53   : > { %p6762_p3 = pnand %p6760_p1, %p6757_p9 }
  0x55   : > { %6765 = shalt.err (!%p6762_p3)
}
  0x56   : > { %s6766_s13 = scalar_lea.vmem %s7224_s16, 16  ;;  %s6773_s18 = scalar_lea.vmem %s7224_s16, 32 }
  0x57   : > { %p6767_p10 = scmp.ne.s32.totalorder %s7224_s16, %s6766_s13  ;;  %p6774_p13 = scmp.lt.s32.totalorder %s7224_s16, %s7224_s16 }
  0x58   : > { %p6775_p0 = scmp.lt.s32.totalorder %s6773_s18, %s6766_s13 }
  0x59   : > { %p6769_p11 = pnand %p6767_p10, %p7234_p7 }
  0x5a   : > { %p6776_p2 = por %p6775_p0, %p6774_p13 }
  0x5b   : > { %p6770_p12 = pneg %p6769_p11 }
  0x5d   : > { %p6777_p4 = pnand %p6776_p2, %p6770_p12 }
  0x5f   : > { %6780 = shalt.err (!%p6777_p4)
}
  0x60   : > { %6535 = dma.hbm_to_vmem [thread:$0]  (!%p7218_p5), %s8922_s5, 16, %s7224_s16, [#allocation12]  }
  0x61   : > { %s7100_s27 = smov [#allocation14]   ;;  %s6781_s17 = scalar_lea.hbm %s8924_s7, 16 }
  0x62   : > { %s406_s19 = sshll.u32 %s7100_s27, 4  ;;  %p6782_p6 = scmp.ne.s32.totalorder %s8924_s7, %s6781_s17  ;;  %s407_s19 = int_to_ptr.vmem [resolvable:$true] %s406_s19 }
  0x63   : > { %p6788_p1 = scmp.lt.u32.totalorder %s6781_s17, %s8924_s7 }
  0x64   : > { %p6784_p8 = pnand %p6782_p6, %p7234_p7 }
  0x66   : > { %p6785_p9 = pneg %p6784_p8 }
  0x68   : > { %p6790_p3 = pnand %p6788_p1, %p6785_p9 }
  0x6a   : > { %6793 = shalt.err (!%p6790_p3)
}
  0x6b   : > { %s6794_s16 = scalar_lea.vmem %s407_s19, 16  ;;  %s6801_s1 = scalar_lea.vmem %s407_s19, 32 }
  0x6c   : > { %p6795_p10 = scmp.ne.s32.totalorder %s407_s19, %s6794_s16  ;;  %p6802_p13 = scmp.lt.s32.totalorder %s407_s19, %s407_s19 }
  0x6d   : > { %p6803_p0 = scmp.lt.s32.totalorder %s6801_s1, %s6794_s16 }
  0x6e   : > { %p6797_p11 = pnand %p6795_p10, %p7234_p7 }
  0x6f   : > { %p6804_p2 = por %p6803_p0, %p6802_p13 }
  0x70   : > { %p6798_p12 = pneg %p6797_p11 }
  0x72   : > { %p6805_p4 = pnand %p6804_p2, %p6798_p12 }
  0x74   : > { %6808 = shalt.err (!%p6805_p4)
}
  0x75   : > { %6541 = dma.hbm_to_vmem [thread:$0]  (!%p7218_p5), %s8924_s7, 16, %s407_s19, [#allocation15]  }
  0x76   : > { %s7101_s12 = smov [#allocation17]   ;;  %s7102_s15 = smov [#allocation7]  }
  0x77   : > { %s427_s25 = sshll.u32 %s7101_s12, 4  ;;  %s342_s17 = sshll.u32 %s7102_s15, 4  ;;  %s428_s25 = int_to_ptr.vmem [resolvable:$true] %s427_s25  ;;  %s7318_s17 = int_to_ptr.vmem [resolvable:$true] %s342_s17 }
  0x78   : > { %s6809_s18 = scalar_lea.hbm %s8926_s9, 2304 }
  0x79   : > { %p6810_p6 = scmp.ne.s32.totalorder %s8926_s9, %s6809_s18  ;;  %p6816_p1 = scmp.lt.u32.totalorder %s6809_s18, %s8926_s9 }
  0x7b   : > { %p6812_p8 = pnand %p6810_p6, %p7234_p7 }
  0x7d   : > { %p6813_p9 = pneg %p6812_p8 }
  0x7f   : > { %p6818_p3 = pnand %p6816_p1, %p6813_p9 }
  0x81   : > { %6821 = shalt.err (!%p6818_p3)
}
  0x82   : > { %s6822_s27 = scalar_lea.vmem %s428_s25, 2304  ;;  %p6830_p13 = scmp.lt.s32.totalorder %s428_s25, %s428_s25 }
  0x83   : > { %p6823_p10 = scmp.ne.s32.totalorder %s428_s25, %s6822_s27  ;;  %p6831_p0 = scmp.lt.s32.totalorder %s6822_s27, %s6822_s27 }
  0x85   : > { %p6825_p11 = pnand %p6823_p10, %p7234_p7  ;;  %p6832_p2 = por %p6831_p0, %p6830_p13 }
  0x87   : > { %p6826_p12 = pneg %p6825_p11 }
  0x89   : > { %p6833_p4 = pnand %p6832_p2, %p6826_p12 }
  0x8b   : > { %6836 = shalt.err (!%p6833_p4)
}
  0x8c   : > { %s8939_s12 = smov 64   ;;  %s8941_s15 = smov 4  }
  0x8d   : > { %6547 = dma.hbm_to_vmem [thread:$0]  (!%p7218_p5), %s8926_s9, 2304, %s428_s25, [#allocation18], %s8939_s12, %s8939_s12, %s8941_s15  }
  0x8e   : > { %s8967_s2 = sld [smem:[#allocation63_spill]] }
  0x94   : > { %s6837_s1 = scalar_lea.hbm %s8967_s2, 9216 }
  0x95   : > { %p6838_p6 = scmp.ne.s32.totalorder %s8967_s2, %s6837_s1  ;;  %p6844_p1 = scmp.lt.u32.totalorder %s6837_s1, %s8967_s2 }
  0x97   : > { %p6840_p8 = pnand %p6838_p6, %p7234_p7 }
  0x99   : > { %p6841_p9 = pneg %p6840_p8 }
  0x9b   : > { %p6846_p3 = pnand %p6844_p1, %p6841_p9 }
  0x9d   : > { %6849 = shalt.err (!%p6846_p3)
}
  0x9e   : > { %s6850_s25 = scalar_lea.vmem %s7318_s17, 9216  ;;  %p6858_p13 = scmp.lt.s32.totalorder %s7318_s17, %s7318_s17 }
  0x9f   : > { %p6851_p10 = scmp.ne.s32.totalorder %s7318_s17, %s6850_s25  ;;  %p6859_p0 = scmp.lt.s32.totalorder %s6850_s25, %s6850_s25 }
  0xa1   : > { %p6853_p11 = pnand %p6851_p10, %p7234_p7  ;;  %p6860_p2 = por %p6859_p0, %p6858_p13 }
  0xa3   : > { %p6854_p12 = pneg %p6853_p11 }
  0xa5   : > { %p6861_p4 = pnand %p6860_p2, %p6854_p12 }
  0xa7   : > { %6864 = shalt.err (!%p6861_p4)
}
  0xa8   : > { %s8968_s29 = smov 8   ;;  %s8969_s26 = smov 128  }
  0xa9   : > { %6526 = dma.hbm_to_vmem [thread:$0]  (!%p7218_p5), %s8967_s2, 9216, %s7318_s17, [#allocation6], %s8969_s26, %s8969_s26, %s8968_s29  }
  0xaa   : > { %s7105_s16 = smov [#allocation10]   ;;  %s7106_s20 = smov [#allocation13]  }
  0xab   : > { %s368_s1 = sshll.u32 %s7105_s16, 4  ;;  %s392_s19 = sshll.u32 %s7106_s20, 4  ;;  %s369_s1 = int_to_ptr.vmem [resolvable:$true] %s368_s1  ;;  %s7367_s19 = int_to_ptr.vmem [resolvable:$true] %s392_s19 }
  0xac   : > { %s8970_s4 = sld [smem:[#allocation65_spill]] }
  0xb2   : > { %s6865_s12 = scalar_lea.hbm %s8970_s4, 2304 }
  0xb3   : > { %p6866_p6 = scmp.ne.s32.totalorder %s8970_s4, %s6865_s12  ;;  %p6872_p1 = scmp.lt.u32.totalorder %s6865_s12, %s8970_s4 }
  0xb5   : > { %p6868_p8 = pnand %p6866_p6, %p7234_p7 }
  0xb7   : > { %p6869_p9 = pneg %p6868_p8 }
  0xb9   : > { %p6874_p3 = pnand %p6872_p1, %p6869_p9 }
  0xbb   : > { %6877 = shalt.err (!%p6874_p3)
}
  0xbc   : > { %s6878_s18 = scalar_lea.vmem %s369_s1, 2304  ;;  %p6886_p13 = scmp.lt.s32.totalorder %s369_s1, %s369_s1 }
  0xbd   : > { %p6879_p10 = scmp.ne.s32.totalorder %s369_s1, %s6878_s18  ;;  %p6887_p0 = scmp.lt.s32.totalorder %s6878_s18, %s6878_s18 }
  0xbf   : > { %p6881_p11 = pnand %p6879_p10, %p7234_p7  ;;  %p6888_p2 = por %p6887_p0, %p6886_p13 }
  0xc1   : > { %p6882_p12 = pneg %p6881_p11 }
  0xc3   : > { %p6889_p4 = pnand %p6888_p2, %p6882_p12 }
  0xc5   : > { %6892 = shalt.err (!%p6889_p4)
}
  0xc6   : > { %s8971_s3 = smov 4   ;;  %s8972_s15 = smov 64  }
  0xc7   : > { %6532 = dma.hbm_to_vmem [thread:$0]  (!%p7218_p5), %s8970_s4, 2304, %s369_s1, [#allocation9], %s8972_s15, %s8972_s15, %s8971_s3  }
  0xc8   : > { %s6893_s25 = scalar_lea.hbm %s8923_s6, 2304 }
  0xc9   : > { %p6894_p6 = scmp.ne.s32.totalorder %s8923_s6, %s6893_s25  ;;  %p6900_p1 = scmp.lt.u32.totalorder %s6893_s25, %s8923_s6 }
  0xcb   : > { %p6896_p8 = pnand %p6894_p6, %p7234_p7 }
  0xcd   : > { %p6897_p9 = pneg %p6896_p8 }
  0xcf   : > { %p6902_p3 = pnand %p6900_p1, %p6897_p9 }
  0xd1   : > { %6905 = shalt.err (!%p6902_p3)
}
  0xd2   : > { %s6906_s1 = scalar_lea.vmem %s7367_s19, 2304  ;;  %p6914_p13 = scmp.lt.s32.totalorder %s7367_s19, %s7367_s19 }
  0xd3   : > { %p6907_p10 = scmp.ne.s32.totalorder %s7367_s19, %s6906_s1  ;;  %p6915_p0 = scmp.lt.s32.totalorder %s6906_s1, %s6906_s1 }
  0xd5   : > { %p6909_p11 = pnand %p6907_p10, %p7234_p7  ;;  %p6916_p2 = por %p6915_p0, %p6914_p13 }
  0xd7   : > { %p6910_p12 = pneg %p6909_p11 }
  0xd9   : > { %p6917_p4 = pnand %p6916_p2, %p6910_p12 }
  0xdb   : > { %6920 = shalt.err (!%p6917_p4)
}
  0xdc   : > { %6538 = dma.hbm_to_vmem [thread:$0]  (!%p7218_p5), %s8923_s6, 2304, %s7367_s19, [#allocation12], %s8972_s15, %s8972_s15, %s8971_s3  }
  0xdd   : > { %s7107_s12 = smov [#allocation16]   ;;  %s7108_s27 = smov [#allocation19]  }
  0xde   : > { %s417_s20 = sshll.u32 %s7107_s12, 4  ;;  %s441_s25 = sshll.u32 %s7108_s27, 4  ;;  %s418_s20 = int_to_ptr.vmem [resolvable:$true] %s417_s20  ;;  %s7416_s25 = int_to_ptr.vmem [resolvable:$true] %s441_s25 }
  0xdf   : > { %s6921_s18 = scalar_lea.hbm %s8925_s8, 16 }
  0xe0   : > { %p6922_p6 = scmp.ne.s32.totalorder %s8925_s8, %s6921_s18  ;;  %p6928_p1 = scmp.lt.u32.totalorder %s6921_s18, %s8925_s8 }
  0xe2   : > { %p6924_p8 = pnand %p6922_p6, %p7234_p7 }
  0xe4   : > { %p6925_p9 = pneg %p6924_p8 }
  0xe6   : > { %p6930_p3 = pnand %p6928_p1, %p6925_p9 }
  0xe8   : > { %6933 = shalt.err (!%p6930_p3)
}
  0xe9   : > { %s6934_s3 = scalar_lea.vmem %s418_s20, 16  ;;  %s6941_s15 = scalar_lea.vmem %s418_s20, 32 }
  0xea   : > { %p6935_p10 = scmp.ne.s32.totalorder %s418_s20, %s6934_s3  ;;  %p6942_p13 = scmp.lt.s32.totalorder %s418_s20, %s418_s20 }
  0xeb   : > { %p6943_p0 = scmp.lt.s32.totalorder %s6941_s15, %s6934_s3 }
  0xec   : > { %p6937_p11 = pnand %p6935_p10, %p7234_p7 }
  0xed   : > { %p6944_p2 = por %p6943_p0, %p6942_p13 }
  0xee   : > { %p6938_p12 = pneg %p6937_p11 }
  0xf0   : > { %p6945_p4 = pnand %p6944_p2, %p6938_p12 }
  0xf2   : > { %6948 = shalt.err (!%p6945_p4)
}
  0xf3   : > { %6544 = dma.hbm_to_vmem [thread:$0]  (!%p7218_p5), %s8925_s8, 16, %s418_s20, [#allocation15]  }
  0xf4   : > { %s6949_s13 = scalar_lea.hbm %s8927_s10, 16 }
  0xf5   : > { %p6950_p6 = scmp.ne.s32.totalorder %s8927_s10, %s6949_s13  ;;  %p6956_p1 = scmp.lt.u32.totalorder %s6949_s13, %s8927_s10 }
  0xf7   : > { %p6952_p8 = pnand %p6950_p6, %p7234_p7 }
  0xf9   : > { %p6953_p9 = pneg %p6952_p8 }
  0xfb   : > { %p6958_p3 = pnand %p6956_p1, %p6953_p9 }
  0xfd   : > { %6961 = shalt.err (!%p6958_p3)
}
  0xfe   : > { %s6962_s20 = scalar_lea.vmem %s7416_s25, 16  ;;  %s6969_s19 = scalar_lea.vmem %s7416_s25, 32 }
  0xff   : > { %p6963_p10 = scmp.ne.s32.totalorder %s7416_s25, %s6962_s20  ;;  %p6970_p13 = scmp.lt.s32.totalorder %s7416_s25, %s7416_s25 }
 0x100   : > { %p6971_p0 = scmp.lt.s32.totalorder %s6969_s19, %s6962_s20 }
 0x101   : > { %p6965_p11 = pnand %p6963_p10, %p7234_p7 }
 0x102   : > { %p6972_p2 = por %p6971_p0, %p6970_p13 }
 0x103   : > { %p6966_p12 = pneg %p6965_p11 }
 0x105   : > { %p6973_p4 = pnand %p6972_p2, %p6966_p12 }
 0x107   : > { %6976 = shalt.err (!%p6973_p4)
}
 0x108   : > { %6550 = dma.hbm_to_vmem [thread:$0]  (!%p7218_p5), %s8927_s10, 16, %s7416_s25, [#allocation18]  }
 0x109   : > { %s7109_s4 = smov [#allocation20]   ;;  %s6977_s13 = scalar_lea.hbm %s8928_s11, 16 }
 0x10a   : > { %s452_s16 = sshll.u32 %s7109_s4, 4  ;;  %p6978_p6 = scmp.ne.s32.totalorder %s8928_s11, %s6977_s13  ;;  %s453_s16 = int_to_ptr.vmem [resolvable:$true] %s452_s16 }
 0x10b   : > { %p6984_p1 = scmp.lt.u32.totalorder %s6977_s13, %s8928_s11 }
 0x10c   : > { %p6980_p8 = pnand %p6978_p6, %p7234_p7 }
 0x10e   : > { %p6981_p9 = pneg %p6980_p8 }
 0x110   : > { %p6986_p3 = pnand %p6984_p1, %p6981_p9 }
 0x112   : > { %6989 = shalt.err (!%p6986_p3)
}
 0x113   : > { %s6990_s25 = scalar_lea.vmem %s453_s16, 16  ;;  %s6997_s20 = scalar_lea.vmem %s453_s16, 32 }
 0x114   : > { %p6991_p10 = scmp.ne.s32.totalorder %s453_s16, %s6990_s25  ;;  %p6998_p13 = scmp.lt.s32.totalorder %s453_s16, %s453_s16 }
 0x115   : > { %p6999_p0 = scmp.lt.s32.totalorder %s6997_s20, %s6990_s25 }
 0x116   : > { %p6993_p11 = pnand %p6991_p10, %p7234_p7 }
 0x117   : > { %p7000_p2 = por %p6999_p0, %p6998_p13 }
 0x118   : > { %p6994_p12 = pneg %p6993_p11 }
 0x11a   : > { %p7001_p4 = pnand %p7000_p2, %p6994_p12 }
 0x11c   : > { %7004 = shalt.err (!%p7001_p4)
}
 0x11d   : > { %6553 = dma.hbm_to_vmem [thread:$0]  (!%p7218_p5), %s8928_s11, 16, %s453_s16, [#allocation21]  }
 0x11e   : > { %s7479_s30 = sadd.s32 1, %s7093_s24   ;;  %s38_s15 = sadd.s32 1, %s7089_s23 }
 0x11f   : > { %s35_s14 = ssub.s32 %s7093_s24, %s7479_s30  ;;  %p45_p6 = scmp.ne.s32.totalorder %s7089_s23, %s7085_s22 }
 0x120   : > { %p36_p7 = scmp.eq.s32.totalorder %s35_s14, 0  ;;  %p46_p8 = scmp.eq.s32.totalorder %s7093_s24, 0 }
 0x121   : > { %p51_p9 = scmp.ne.s32.totalorder %s7085_s22, %s7081_s21  ;;  %p8973_p3 = scmp.ne.s32.totalorder %s8960_s28, 0 }
 0x122   : > { %s7490_s4 = scalar_select %p36_p7, %s7089_s23, %s38_s15  }
 0x123   : > { %p47_p1 = por %p46_p8, %p45_p6  ;;  %p7494_p10 = por %p8973_p3, %p51_p9 }
 0x124   : > { %p6569_p11 = scmp.lt.s32.totalorder %s7093_s24, 2  ;;  %s463_s27 = sand.u32 1, %s7089_s23  }
 0x125   : > { %s5592_s16 = sshll.u32 %s463_s27, 6  ;;  %s5780_s13 = sshll.u32 %s7093_s24, 10 }
 0x126   : > { %s7504_s1 = scalar_lea.hbm %s8917_s0, %s5780_s13  ;;  %s467_s21 = scalar_lea.vmem [#allocation3], %s5592_s16 }
 0x127   : > { %s474_s2 = sshll.u32 %s467_s21, 4  ;;  %p7508_p5 = pnand %p6569_p11, %p47_p1  ;;  %s7506_s2 = int_to_ptr.vmem [resolvable:$true] %s474_s2 }
 0x128   : > { %s7512_s20 = scalar_lea.sflag [#allocation4], %s463_s27  ;;  %s7005_s19 = scalar_lea.hbm %s7504_s1, 1024 }
 0x129   : > { %p7006_p12 = scmp.ne.s32.totalorder %s7504_s1, %s7005_s19  ;;  %p7007_p13 = pneg %p7508_p5 }
 0x12a   : > { %s7010_s15 = scalar_lea.hbm %s8917_s0, 2048  ;;  %p7011_p4 = scmp.lt.u32.totalorder %s7504_s1, %s8917_s0 }
 0x12b   : > { %p7008_p0 = pnand %p7007_p13, %p7006_p12  ;;  %p7012_p7 = scmp.lt.u32.totalorder %s7010_s15, %s7005_s19 }
 0x12c   : > { %p7014_p8 = scmp.lt.u32.totalorder %s7005_s19, %s7504_s1 }
 0x12d   : > { %p7009_p2 = pneg %p7008_p0  ;;  %p7013_p6 = por %p7012_p7, %p7011_p4 }
 0x12f   : > { %p7015_p9 = por %p7014_p8, %p7013_p6 }
 0x131   : > { %p7016_p1 = pnand %p7015_p9, %p7009_p2 }
 0x133   : > { %7019 = shalt.err (!%p7016_p1)
}
 0x134   : > { %s7020_s27 = scalar_lea.vmem %s7506_s2, 1024  ;;  %s7110_s17 = smov [#allocation3]  }
 0x135   : > { %p7021_p3 = scmp.ne.s32.totalorder %s7506_s2, %s7020_s27  ;;  %s7025_s18 = sshll.u32 %s7110_s17, 4  ;;  %s7026_s18 = int_to_ptr.vmem [resolvable:$false] %s7025_s18 }
 0x136   : > { %s7027_s21 = scalar_lea.vmem %s7026_s18, 2048  ;;  %p7028_p0 = scmp.lt.s32.totalorder %s7506_s2, %s7026_s18 }
 0x137   : > { %p7023_p11 = pnand %p7021_p3, %p7007_p13  ;;  %p7029_p4 = scmp.lt.s32.totalorder %s7027_s21, %s7020_s27 }
 0x139   : > { %p7024_p12 = pneg %p7023_p11  ;;  %p7030_p7 = por %p7029_p4, %p7028_p0 }
 0x13b   : > { %p7031_p6 = pnand %p7030_p7, %p7024_p12 }
 0x13d   : > { %7034 = shalt.err (!%p7031_p6)
}
 0x13e   : > { %6557 = dma.hbm_to_vmem [thread:$0]  (!%p7508_p5), %s7504_s1, 1024, %s7506_s2, %s7512_s20, %s8969_s26, %s8969_s26, %s8968_s29  }
 0x13f   : > { %s8976_s19 = sld [smem:[#allocation29_spill]] }
 0x145   : > { %p8977_p13 = scmp.ne.s32.totalorder %s8976_s19, 0 }
 0x147   : > { %486 = sbr.rel (%p8977_p13) target bundleno = 1572 (0x624), region = 68 }
 0x14e   : > { %s488_s3 = sand.u32 1, %s7085_s22  }
 0x14f   : > { %s5596_s14 = sshll.u32 %s488_s3, 6  ;;  %s489_s15 = scalar_lea.sflag [#allocation4], %s488_s3 }
 0x150   : > { %s7546_s16 = scalar_lea.vmem [#allocation3], %s5596_s14 }
 0x151   : > { %7052 = dma.done.wait (%p7494_p10), %s489_s15, 1024  }
 0x152   : > { %7054 = vsyncadd (%p7494_p10), %s489_s15, 4294966272  ;;  %p8978_p2 = scmp.ne.s32.totalorder %s8960_s28, 0 }
 0x154   : > { %7056 = dma.done.wait (%p8978_p2), [#allocation6], 9248  }
 0x155   : > { %7058 = vsyncadd (%p8978_p2), [#allocation6], 4294958048 }
 0x156   : > { %7060 = dma.done.wait (%p8978_p2), [#allocation9], 6400  }
 0x157   : > { %7062 = vsyncadd (%p8978_p2), [#allocation9], 4294960896 }
 0x158   : > { %7064 = dma.done.wait (%p8978_p2), [#allocation12], 2320  }
 0x159   : > { %7066 = vsyncadd (%p8978_p2), [#allocation12], 4294964976 }
 0x15a   : > { %7068 = dma.done.wait (%p8978_p2), [#allocation15], 32  }
 0x15b   : > { %7070 = vsyncadd (%p8978_p2), [#allocation15], 4294967264 }
 0x15c   : > { %7072 = dma.done.wait (%p8978_p2), [#allocation18], 2320  }
 0x15d   : > { %7074 = vsyncadd (%p8978_p2), [#allocation18], 4294964976 }
 0x15e   : > { %7076 = dma.done.wait (%p8978_p2), [#allocation21], 16  }
 0x15f   : > { %7078 = vsyncadd (%p8978_p2), [#allocation21], 4294967280  ;;  %vm585_vm0 = vcmask 261120   ;;  %v7111_v0 = vmov 0   ;;  %v7112_v1 = vmov 0.0   ;;  %v1289_v2 = vld [vmem:[#allocation7 + $0x100] sm:$0xff] }
 0x160   : > { %6634 = vset.pattern.permute.xlu1 %v7111_v0  ;;  %6633 = vset.pattern.permute.xlu0 %v7111_v0  ;;  %588 = vst.msk [vmem:[#allocation2 + $0x10] sm:$0xff] %vm585_vm0, %v7112_v1  ;;  %586 = vst.msk [vmem:[#allocation2] sm:$0xff] %vm585_vm0, %v7112_v1  ;;  %v7588_v3 = vld [vmem:[#allocation7 + $0x40] sm:$0xff]  ;;  %v1290_v4 = vld [vmem:[#allocation7 + $0x108] sm:$0xff]  ;;  %s5781_s28 = scalar_lea.vmem [#allocation5], %s7093_s24  ;;  %s7113_s29 = smov 126  }
 0x161   : > { %587 = vst.msk [vmem:[#allocation2 + $0x8] sm:$0xff] %vm585_vm0, %v7112_v1  ;;  %589 = vst.msk [vmem:[#allocation2 + $0x18] sm:$0xff] %vm585_vm0, %v7112_v1  ;;  %1299 = vperm.xlu1 %6634, %v1289_v2   ;;  %705 = vperm.xlu0 %6633, %v7588_v3   ;;  %v7591_v5 = vld [vmem:[#allocation7 + $0x48] sm:$0xff]  ;;  %v7594_v6 = vld [vmem:[#allocation7 + $0x58] sm:$0xff]  ;;  %s7114_s26 = smov 127   ;;  %s7115_s12 = smov 125  }
 0x162   : > { %590 = vst.msk [vmem:[#allocation2 + $0x20] sm:$0xff] %vm585_vm0, %v7112_v1  ;;  %591 = vst.msk [vmem:[#allocation2 + $0x28] sm:$0xff] %vm585_vm0, %v7112_v1  ;;  %v7596_v7 = vld [vmem:[#allocation7 + $0x50] sm:$0xff]  ;;  %v1292_v8 = vld [vmem:[#allocation7 + $0x118] sm:$0xff]  ;;  %s9078_s13 = sadd.s32 4294967295, %s7093_s24   ;;  %s9080_s21 = sld [smem:[#allocation66_spill]] }
 0x163   : > { %592 = vst.msk [vmem:[#allocation2 + $0x30] sm:$0xff] %vm585_vm0, %v7112_v1  ;;  %593 = vst.msk [vmem:[#allocation2 + $0x38] sm:$0xff] %vm585_vm0, %v7112_v1  ;;  %v7600_v9 = vld [vmem:[#allocation7 + $0x110] sm:$0xff]  ;;  %v7603_v10 = vld [vmem:[#allocation7 + $0x68] sm:$0xff]  ;;  %s5608_s27 = sshll.u32 %s9078_s13, 3 }
 0x164   : > { %594 = vst.msk [vmem:[#allocation2 + $0x40] sm:$0xff] %vm585_vm0, %v7112_v1  ;;  %595 = vst.msk [vmem:[#allocation2 + $0x48] sm:$0xff] %vm585_vm0, %v7112_v1  ;;  %v7605_v11 = vld [vmem:[#allocation7 + $0x60] sm:$0xff]  ;;  %v7609_v12 = vld [vmem:[#allocation7 + $0x78] sm:$0xff]  ;;  %p579_p10 = scmp.lt.s32.totalorder %s5608_s27, 15 }
 0x165   : > { %596 = vst.msk [vmem:[#allocation2 + $0x50] sm:$0xff] %vm585_vm0, %v7112_v1  ;;  %597 = vst.msk [vmem:[#allocation2 + $0x58] sm:$0xff] %vm585_vm0, %v7112_v1  ;;  %1304 = vperm.xlu1 %6634, %v1290_v4   ;;  %710 = vperm.xlu0 %6633, %v7591_v5   ;;  %v7611_v13 = vld [vmem:[#allocation7 + $0x70] sm:$0xff]  ;;  %v598_v14 = vld [vmem:[%s7546_s16] sm:$0xff] }
 0x166   : > { %v1461_v15 = vld [vmem:[#allocation7 + $0x148] sm:$0xff]  ;;  %v1460_v16 = vld [vmem:[#allocation7 + $0x140] sm:$0xff]  ;;  %606 = vst.msk [vmem:[#allocation2 + $0x10] sm:$0xff] %vm585_vm0, %v598_v14  ;;  %v6635_v18 = vld [vmem:[#allocation10 + $0x10] sm:$0xff]   ;;  %s9093_s27 = smov (!%p579_p10, %s5608_s27), 15 }
 0x167   : > { %v599_v17 = vld [vmem:[%s7546_s16 + $0x8] sm:$0xff]  ;;  %v1463_v19 = vld [vmem:[#allocation7 + $0x158] sm:$0xff]  ;;  %v1462_v20 = vld [vmem:[#allocation7 + $0x150] sm:$0xff]  ;;  %5946 = vmatprep.subr.bf16.mxu1 %v6635_v18  ;;  %s5609_s17 = sshll.u32 %s9093_s27, 3 }
 0x168   : > { %607 = vst.msk [vmem:[#allocation2 + $0x18] sm:$0xff] %vm585_vm0, %v599_v17  ;;  %v600_v21 = vld [vmem:[%s7546_s16 + $0x10] sm:$0xff]  ;;  %v6636_v22 = vld [vmem:[#allocation10 + $0x18] sm:$0xff]   ;;  %v7621_v23 = vld [vmem:[#allocation10 + $0x40] sm:$0xff]   ;;  %5947 = vmatpush3.bf16.msra.mxu1 %v6635_v18  ;;  %s8879_s19 = scalar_lea.vmem %s9080_s21, %s5609_s17 }
 0x169   : > { %720 = vperm.xlu1 %6634, %v7594_v6   ;;  %715 = vperm.xlu0 %6633, %v7596_v7   ;;  %608 = vst.msk [vmem:[#allocation2 + $0x20] sm:$0xff] %vm585_vm0, %v600_v21  ;;  %v601_v24 = vld [vmem:[%s7546_s16 + $0x18] sm:$0xff]  ;;  %v6638_v25 = vld [vmem:[#allocation10 + $0x48] sm:$0xff]   ;;  %v7628_v27 = vld [vmem:[#allocation7] sm:$0xff] }
 0x16a   : > { %5948 = vmatprep.subr.bf16.mxu1 %v6636_v22  ;;  %5994 = vmatprep.subr.bf16.mxu0 %v7621_v23  ;;  %609 = vst.msk [vmem:[#allocation2 + $0x28] sm:$0xff] %vm585_vm0, %v601_v24  ;;  %v7626_v26 = vld [vmem:[#allocation7 + $0x8] sm:$0xff]  ;;  %v602_v28 = vld [vmem:[%s7546_s16 + $0x20] sm:$0xff]  ;;  %v7633_v29 = vld [vmem:[%s5781_s28 - $0x1] sm:$0x1] }
 0x16b   : > { %5995 = vmatpush3.bf16.msra.mxu0 %v7621_v23  ;;  %610 = vst.msk [vmem:[#allocation2 + $0x30] sm:$0xff] %vm585_vm0, %v602_v28  ;;  %v604_v30 = vld [vmem:[%s7546_s16 + $0x30] sm:$0xff]  ;;  %v603_v31 = vld [vmem:[%s7546_s16 + $0x28] sm:$0xff]  ;;  %v7645_v33 = vld [vmem:[#allocation7 + $0x18] sm:$0xff] }
 0x16c   : > { %5949 = vmatpush3.bf16.msra.mxu1 %v6636_v22  ;;  %5996 = vmatprep.subr.bf16.mxu0 %v6638_v25  ;;  %6466 = vpush %v7633_v29  ;;  %v7643_v32 = vld [vmem:[#allocation10 + $0x50] sm:$0xff]   ;;  %v7650_v35 = vld [vmem:[#allocation10] sm:$0xff]   ;;  %v1465_v36 = vld [vmem:[#allocation7 + $0x168] sm:$0xff] }
 0x16d   : > { %1314 = vperm.xlu1 %6634, %v1292_v8   ;;  %1309 = vperm.xlu0 %6633, %v7600_v9   ;;  %612 = vst.msk [vmem:[#allocation2 + $0x40] sm:$0xff] %vm585_vm0, %v604_v30  ;;  %611 = vst.msk [vmem:[#allocation2 + $0x38] sm:$0xff] %vm585_vm0, %v603_v31  ;;  %v7647_v34 = vld [vmem:[#allocation7 + $0x10] sm:$0xff]  ;;  %v1464_v37 = vld [vmem:[#allocation7 + $0x160] sm:$0xff] }
 0x16e   : > { %5958 = vmatprep.subr.bf16.mxu1 %v7650_v35  ;;  %v1467_v38 = vld [vmem:[#allocation7 + $0x178] sm:$0xff]  ;;  %v1466_v40 = vld [vmem:[#allocation7 + $0x170] sm:$0xff]  ;;  %v7657_v41 = vld [vmem:[#allocation7 + $0x28] sm:$0xff] }
 0x16f   : > { %5997 = vmatpush3.bf16.msra.mxu0 %v6638_v25  ;;  %v605_v39 = vld [vmem:[%s7546_s16 + $0x38] sm:$0xff]  ;;  %v7659_v42 = vld [vmem:[#allocation7 + $0x20] sm:$0xff]  ;;  %v1632_v45 = vld [vmem:[#allocation7 + $0x188] sm:$0xff] }
 0x170   : > { %6006 = vmatprep.subr.bf16.mxu0 %v7643_v32  ;;  %613 = vst.msk [vmem:[#allocation2 + $0x48] sm:$0xff] %vm585_vm0, %v605_v39  ;;  %v7661_v43 = vld [vmem:[#allocation7 + $0x38] sm:$0xff]  ;;  %v7665_v44 = vld [vmem:[#allocation7 + $0x30] sm:$0xff]  ;;  %v1631_v46 = vld [vmem:[#allocation7 + $0x180] sm:$0xff] }
 0x171   : > { %730 = vperm.xlu1 %6634, %v7603_v10   ;;  %725 = vperm.xlu0 %6633, %v7605_v11   ;;  %v1634_v47 = vld [vmem:[#allocation7 + $0x198] sm:$0xff]  ;;  %v1633_v48 = vld [vmem:[#allocation7 + $0x190] sm:$0xff]  ;;  %v7669_v49 = vld [vmem:[#allocation7 + $0x88] sm:$0xff] }
 0x172   : > { %v7671_v50 = vld [vmem:[#allocation7 + $0x80] sm:$0xff]  ;;  %v7673_v51 = vld [vmem:[#allocation7 + $0x98] sm:$0xff]  ;;  %v7677_v52 = vld [vmem:[#allocation7 + $0x90] sm:$0xff] }
 0x173   : > { %v1636_v53 = vld [vmem:[#allocation7 + $0x1a8] sm:$0xff]  ;;  %v1635_v54 = vld [vmem:[#allocation7 + $0x1a0] sm:$0xff]  ;;  %v1638_v55 = vld [vmem:[#allocation7 + $0x1b8] sm:$0xff] }
 0x174   : > { %v1637_v56 = vld [vmem:[#allocation7 + $0x1b0] sm:$0xff]  ;;  %v7681_v57 = vld [vmem:[#allocation7 + $0xa8] sm:$0xff]  ;;  %v7683_v58 = vld [vmem:[#allocation7 + $0xa0] sm:$0xff] }
 0x175   : > { %740 = vperm.xlu1 %6634, %v7609_v12   ;;  %735 = vperm.xlu0 %6633, %v7611_v13   ;;  %v7687_v59 = vld [vmem:[#allocation7 + $0xb8] sm:$0xff]  ;;  %v7689_v60 = vld [vmem:[#allocation7 + $0xb0] sm:$0xff]  ;;  %v1803_v61 = vld [vmem:[#allocation7 + $0x1c8] sm:$0xff] }
 0x176   : > { %v1802_v62 = vld [vmem:[#allocation7 + $0x1c0] sm:$0xff]  ;;  %v1805_v63 = vld [vmem:[#allocation7 + $0x1d8] sm:$0xff]  ;;  %v1804_v0 = vld [vmem:[#allocation7 + $0x1d0] sm:$0xff] }
 0x177   : > { %v7693_v1 = vld [vmem:[#allocation7 + $0xc8] sm:$0xff]  ;;  %v7695_v2 = vld [vmem:[#allocation7 + $0xc0] sm:$0xff]  ;;  %v7699_v4 = vld [vmem:[#allocation7 + $0xd8] sm:$0xff] }
 0x178   : > { %v7701_v8 = vld [vmem:[#allocation7 + $0xd0] sm:$0xff]  ;;  %v1807_v14 = vld [vmem:[#allocation7 + $0x1e8] sm:$0xff]  ;;  %v1973_v24 = vld [vmem:[#allocation7 + $0x200] sm:$0xff] }
 0x179   : > { %1475 = vperm.xlu1 %6634, %v1461_v15   ;;  %1470 = vperm.xlu0 %6633, %v1460_v16   ;;  %v1806_v15 = vld [vmem:[#allocation7 + $0x1e0] sm:$0xff]  ;;  %v1809_v16 = vld [vmem:[#allocation7 + $0x1f8] sm:$0xff]  ;;  %v1808_v17 = vld [vmem:[#allocation7 + $0x1f0] sm:$0xff] }
 0x17a   : > { %v7705_v18 = vld [vmem:[#allocation7 + $0xe8] sm:$0xff]  ;;  %v7713_v21 = vld [vmem:[#allocation7 + $0xf0] sm:$0xff]  ;;  %v1976_v25 = vld [vmem:[#allocation7 + $0x218] sm:$0xff] }
 0x17b   : > { %v1974_v22 = vld [vmem:[#allocation7 + $0x208] sm:$0xff]  ;;  %v1975_v28 = vld [vmem:[#allocation7 + $0x210] sm:$0xff]  ;;  %v7719_v31 = vld [vmem:[#allocation7 + $0x120] sm:$0xff] }
 0x17c   : > { %v7717_v30 = vld [vmem:[#allocation7 + $0x128] sm:$0xff] }
 0x17d   : > { %1485 = vperm.xlu1 %6634, %v1463_v19   ;;  %1480 = vperm.xlu0 %6633, %v1462_v20   ;;  %v7707_v19 = vld [vmem:[#allocation7 + $0xe0] sm:$0xff]  ;;  %v7711_v20 = vld [vmem:[#allocation7 + $0xf8] sm:$0xff] }
 0x17e   : > { %v686_v39 = vld [vmem:[#allocation2 + $0x8] sm:$0xff] }
 0x181   : > { %637 = vperm.xlu1 %6634, %v7626_v26   ;;  %632 = vperm.xlu0 %6633, %v7628_v27  }
 0x185   : > { %647 = vperm.xlu1 %6634, %v7645_v33   ;;  %642 = vperm.xlu0 %6633, %v7647_v34  }
 0x189   : > { %1495 = vperm.xlu1 %6634, %v1465_v36   ;;  %1490 = vperm.xlu0 %6633, %v1464_v37  }
 0x18d   : > { %1505 = vperm.xlu1 %6634, %v1467_v38   ;;  %1500 = vperm.xlu0 %6633, %v1466_v40   ;;  %v1280_v38 = vld [vmem:[#allocation2 + $0x10] sm:$0xff]  ;;  %v7723_v40 = vld [vmem:[#allocation2 + $0x18] sm:$0xff] }
 0x191   : > { %657 = vperm.xlu1 %6634, %v7657_v41   ;;  %652 = vperm.xlu0 %6633, %v7659_v42  }
 0x195   : > { %667 = vperm.xlu1 %6634, %v7661_v43   ;;  %662 = vperm.xlu0 %6633, %v7665_v44  }
 0x199   : > { %1646 = vperm.xlu1 %6634, %v1632_v45   ;;  %1641 = vperm.xlu0 %6633, %v1631_v46   ;;  %v1978_v45 = vld [vmem:[#allocation7 + $0x228] sm:$0xff]  ;;  %v1977_v46 = vld [vmem:[#allocation7 + $0x220] sm:$0xff] }
 0x19d   : > { %1656 = vperm.xlu1 %6634, %v1634_v47   ;;  %1651 = vperm.xlu0 %6633, %v1633_v48   ;;  %s6467_s1 = spop %6466 }
 0x1a1   : > { %962 = vperm.xlu1 %6634, %v7669_v49   ;;  %957 = vperm.xlu0 %6633, %v7671_v50  }
 0x1a5   : > { %972 = vperm.xlu1 %6634, %v7673_v51   ;;  %967 = vperm.xlu0 %6633, %v7677_v52  }
 0x1a9   : > { %1666 = vperm.xlu1 %6634, %v1636_v53   ;;  %1661 = vperm.xlu0 %6633, %v1635_v54  }
 0x1ad   : > { %1676 = vperm.xlu1 %6634, %v1638_v55   ;;  %1671 = vperm.xlu0 %6633, %v1637_v56  }
 0x1b1   : > { %982 = vperm.xlu1 %6634, %v7681_v57   ;;  %977 = vperm.xlu0 %6633, %v7683_v58  }
 0x1b5   : > { %992 = vperm.xlu1 %6634, %v7687_v59   ;;  %987 = vperm.xlu0 %6633, %v7689_v60  }
 0x1b9   : > { %1817 = vperm.xlu1 %6634, %v1803_v61   ;;  %1812 = vperm.xlu0 %6633, %v1802_v62   ;;  %v7726_v61 = vld [vmem:[#allocation2 + $0x20] sm:$0xff] }
 0x1ba   : > { %v7728_v62 = vld [vmem:[#allocation7 + $0x138] sm:$0xff] }
 0x1bd   : > { %1827 = vperm.xlu1 %6634, %v1805_v63   ;;  %1822 = vperm.xlu0 %6633, %v1804_v0   ;;  %v7730_v63 = vld [vmem:[#allocation7 + $0x130] sm:$0xff] }
 0x1c1   : > { %1133 = vperm.xlu1 %6634, %v7693_v1   ;;  %1128 = vperm.xlu0 %6633, %v7695_v2  }
 0x1c5   : > { %1143 = vperm.xlu1 %6634, %v7699_v4   ;;  %1138 = vperm.xlu0 %6633, %v7701_v8  }
 0x1c9   : > { %1837 = vperm.xlu1 %6634, %v1807_v14   ;;  %1832 = vperm.xlu0 %6633, %v1806_v15  }
 0x1cd   : > { %1847 = vperm.xlu1 %6634, %v1809_v16   ;;  %1842 = vperm.xlu0 %6633, %v1808_v17  }
 0x1d1   : > { %1153 = vperm.xlu1 %6634, %v7705_v18   ;;  %1148 = vperm.xlu0 %6633, %v7707_v19  }
 0x1d5   : > { %1163 = vperm.xlu1 %6634, %v7711_v20   ;;  %1158 = vperm.xlu0 %6633, %v7713_v21  }
 0x1d9   : > { %1988 = vperm.xlu1 %6634, %v1974_v22   ;;  %1983 = vperm.xlu0 %6633, %v1973_v24   ;;  %v7738_v24 = vld [vmem:[#allocation2 + $0x28] sm:$0xff] }
 0x1dd   : > { %1998 = vperm.xlu1 %6634, %v1976_v25   ;;  %1993 = vperm.xlu0 %6633, %v1975_v28   ;;  %v1980_v25 = vld [vmem:[#allocation7 + $0x238] sm:$0xff]  ;;  %v7740_v28 = vld [vmem:[#allocation7 + $0x230] sm:$0xff] }
 0x1e0   : > { %v1300_v36 = vpop.permute.xlu1 %1299  ;;  %v706_v37 = vpop.permute.xlu0 %705 }
 0x1e1   : > { %1324 = vperm.xlu1 %6634, %v7717_v30   ;;  %1319 = vperm.xlu0 %6633, %v7719_v31   ;;  %v1337_v47 = vmul.f32 %v1300_v36, %v1280_v38  ;;  %v743_v54 = vmul.f32 %v706_v37, %v686_v39  ;;  %v6642_v39 = vld [vmem:[#allocation10 + $0x8] sm:$0xff]  }
 0x1e4   : > { %v1305_v48 = vpop.permute.xlu1 %1304  ;;  %v711_v53 = vpop.permute.xlu0 %710 }
 0x1e5   : > { %v1338_v55 = vmul.f32 %v1305_v48, %v7723_v40  ;;  %v744_v56 = vmul.f32 %v1280_v38, %v711_v53  ;;  %2008 = vperm.xlu1 %6634, %v1978_v45   ;;  %2003 = vperm.xlu0 %6633, %v1977_v46  }
 0x1e7   : > { %v751_v0 = vpack.c.bf16 %v744_v56, %v743_v54  ;;  %v1345_v14 = vpack.c.bf16 %v1338_v55, %v1337_v47  ;;  %v7746_v47 = vld [vmem:[#allocation2 + $0x30] sm:$0xff]  ;;  %v6640_v55 = vld [vmem:[#allocation10 + $0x58] sm:$0xff]   ;;  %v7749_v56 = vld [vmem:[#allocation10 + $0x20] sm:$0xff]  }
 0x1e8   : > { %v721_v15 = vpop.permute.xlu1 %720  ;;  %v716_v16 = vpop.permute.xlu0 %715 }
 0x1e9   : > { %v746_v17 = vmul.f32 %v721_v15, %v7726_v61  ;;  %v745_v22 = vmul.f32 %v7723_v40, %v716_v16  ;;  %1334 = vperm.xlu1 %6634, %v7728_v62   ;;  %1329 = vperm.xlu0 %6633, %v7730_v63   ;;  %v7756_v15 = vld [vmem:[#allocation2 + $0x40] sm:$0xff] }
 0x1ea   : > { %5950 = vmatprep.mubr.msk.bf16.mxu1 %vm585_vm0, %v751_v0  ;;  %5998 = vmatprep.mubr.msk.bf16.mxu0 %vm585_vm0, %v1345_v14 }
 0x1eb   : > { %v752_v36 = vpack.c.bf16 %v746_v17, %v745_v22 }
 0x1ec   : > { %v1315_v37 = vpop.permute.xlu1 %1314  ;;  %v1310_v38 = vpop.permute.xlu0 %1309 }
 0x1ed   : > { %v1340_v45 = vmul.f32 %v1315_v37, %v7738_v24  ;;  %v1339_v46 = vmul.f32 %v1310_v38, %v7726_v61  ;;  %2018 = vperm.xlu1 %6634, %v1980_v25   ;;  %2013 = vperm.xlu0 %6633, %v7740_v28   ;;  %v6643_v25 = vld [vmem:[#allocation10 + $0x60] sm:$0xff]   ;;  %v7767_v38 = vld [vmem:[#allocation2 + $0x19] sm:$0xff] }
 0x1ee   : > { %5951 = vmatmul.mubr.msk.bf16.vlgmr.msra.gmra.mrb[0].mxu1 %vm585_vm0, %v752_v36 }
 0x1ef   : > { %v1346_v48 = vpack.c.bf16 %v1340_v45, %v1339_v46  ;;  %5959 = vmatpush3.bf16.msra.mxu1 %v7650_v35  ;;  %v7758_v35 = vld [vmem:[#allocation2 + $0x38] sm:$0xff] }
 0x1f0   : > { %v731_v53 = vpop.permute.xlu1 %730  ;;  %v726_v54 = vpop.permute.xlu0 %725  ;;  %5960 = vmatprep.subr.bf16.mxu1 %v6642_v39 }
 0x1f1   : > { %v748_v0 = vmul.f32 %v731_v53, %v7746_v47  ;;  %v747_v14 = vmul.f32 %v7738_v24, %v726_v54  ;;  %2196 = vrot.lane.b32.xlu1 %v7633_v29, %s7113_s29  ;;  %2166 = vrot.lane.b32.xlu0 %v7633_v29, %s7114_s26 }
 0x1f2   : > { %5999 = vmatmul.mubr.msk.bf16.vlgmr.msra.gmra.mrb[0].mxu0 %vm585_vm0, %v1346_v48 }
 0x1f3   : > { %v753_v16 = vpack.c.bf16 %v748_v0, %v747_v14  ;;  %6007 = vmatpush3.bf16.msra.mxu0 %v7643_v32  ;;  %5961 = vmatpush3.bf16.msra.mxu1 %v6642_v39  ;;  %v7769_v32 = vld [vmem:[#allocation2 + $0x11] sm:$0xff] }
 0x1f4   : > { %v741_v17 = vpop.permute.xlu1 %740  ;;  %v736_v22 = vpop.permute.xlu0 %735  ;;  %6008 = vmatprep.subr.bf16.mxu0 %v6640_v55  ;;  %5970 = vmatprep.subr.bf16.mxu1 %v7749_v56 }
 0x1f5   : > { %v750_v36 = vmul.f32 %v741_v17, %v7756_v15  ;;  %v749_v37 = vmul.f32 %v736_v22, %v7758_v35  ;;  %2368 = vperm.xlu1 %6634, %v7588_v3   ;;  %2226 = vrot.lane.b32.xlu0 %v7633_v29, %s7115_s12  ;;  %v7776_v3 = vld [vmem:[#allocation2 + $0x29] sm:$0xff]  ;;  %v7778_v29 = vld [vmem:[#allocation2 + $0x21] sm:$0xff] }
 0x1f6   : > { %5954 = vmatprep.mubr.msk.bf16.mxu1 %vm585_vm0, %v753_v16 }
 0x1f7   : > { %v754_v39 = vpack.c.bf16 %v750_v36, %v749_v37  ;;  %6009 = vmatpush3.bf16.msra.mxu0 %v6640_v55  ;;  %v6644_v37 = vld [vmem:[#allocation10 + $0x68] sm:$0xff]  }
 0x1f8   : > { %v1476_v45 = vpop.permute.xlu1 %1475  ;;  %v1471_v46 = vpop.permute.xlu0 %1470  ;;  %6018 = vmatprep.subr.bf16.mxu0 %v6643_v25 }
 0x1f9   : > { %v1509_v48 = vmul.f32 %v1476_v45, %v7767_v38  ;;  %v1508_v53 = vmul.f32 %v1471_v46, %v7769_v32  ;;  %2378 = vperm.xlu1 %6634, %v7596_v7   ;;  %2373 = vperm.xlu0 %6633, %v7591_v5   ;;  %v7785_v5 = vld [vmem:[#allocation2 + $0xf] sm:$0xff]  ;;  %v614_v7 = vld [vmem:[#allocation2 + $0x7] sm:$0xff] }
 0x1fa   : > { %5955 = vmatmul.mubr.msk.bf16.gmra.mrb[4].mxu1 %vm585_vm0, %v754_v39 }
 0x1fb   : > { %v1516_v54 = vpack.c.bf16 %v1509_v48, %v1508_v53 }
 0x1fc   : > { %v1486_v0 = vpop.permute.xlu1 %1485  ;;  %v1481_v55 = vpop.permute.xlu0 %1480 }
 0x1fd   : > { %v1511_v14 = vmul.f32 %v1486_v0, %v7776_v3  ;;  %v1510_v16 = vmul.f32 %v1481_v55, %v7778_v29  ;;  %2388 = vperm.xlu1 %6634, %v7605_v11   ;;  %2383 = vperm.xlu0 %6633, %v7594_v6   ;;  %v7791_v11 = vld [vmem:[#allocation2 + $0x1f] sm:$0xff]  ;;  %v7793_v6 = vld [vmem:[#allocation2 + $0x17] sm:$0xff] }
 0x1fe   : > { %6010 = vmatprep.mubr.msk.bf16.mxu0 %vm585_vm0, %v1516_v54  ;;  %v7795_v54 = vld [vmem:[#allocation10 + $0x70] sm:$0xff]  }
 0x1ff   : > { %v1517_v17 = vpack.c.bf16 %v1511_v14, %v1510_v16 }
 0x200   : > { %v638_v22 = vpop.permute.xlu1 %637  ;;  %v633_v36 = vpop.permute.xlu0 %632 }
 0x201   : > { %v671_v39 = vmul.f32 %v638_v22, %v7785_v5  ;;  %v670_v45 = vmul.f32 %v633_v36, %v614_v7  ;;  %2398 = vperm.xlu1 %6634, %v7611_v13   ;;  %2393 = vperm.xlu0 %6633, %v7603_v10   ;;  %v7802_v10 = vld [vmem:[#allocation2 + $0x39] sm:$0xff]  ;;  %v7804_v13 = vld [vmem:[#allocation2 + $0x31] sm:$0xff] }
 0x202   : > { %6011 = vmatmul.mubr.msk.bf16.vlgmr.msra.gmra.mrb[0].mxu0 %vm585_vm0, %v1517_v17  ;;  %v6646_v7 = vld [vmem:[#allocation10 + $0x28] sm:$0xff]  }
 0x203   : > { %v678_v46 = vpack.c.bf16 %v671_v39, %v670_v45  ;;  %6019 = vmatpush3.bf16.msra.mxu0 %v6643_v25  ;;  %v7817_v45 = vld [vmem:[#allocation10 + $0x30] sm:$0xff]  }
 0x204   : > { %v648_v48 = vpop.permute.xlu1 %647  ;;  %v643_v53 = vpop.permute.xlu0 %642  ;;  %6020 = vmatprep.subr.bf16.mxu0 %v6644_v37 }
 0x205   : > { %v673_v0 = vmul.f32 %v648_v48, %v7791_v11  ;;  %v672_v55 = vmul.f32 %v643_v53, %v7793_v6  ;;  %2296 = vperm.xlu1 %6634, %v7628_v27   ;;  %2403 = vperm.xlu0 %6633, %v7609_v12   ;;  %v7812_v12 = vld [vmem:[#allocation2 + $0x49] sm:$0xff]  ;;  %v7814_v27 = vld [vmem:[#allocation2 + $0x41] sm:$0xff] }
 0x206   : > { %5962 = vmatprep.mubr.msk.bf16.mxu1 %vm585_vm0, %v678_v46  ;;  %v7826_v48 = vld [vmem:[#allocation2 + $0x27] sm:$0xff] }
 0x207   : > { %v679_v25 = vpack.c.bf16 %v673_v0, %v672_v55  ;;  %6021 = vmatpush3.bf16.msra.mxu0 %v6644_v37 }
 0x208   : > { %v1496_v14 = vpop.permute.xlu1 %1495  ;;  %v1491_v16 = vpop.permute.xlu0 %1490  ;;  %6030 = vmatprep.subr.bf16.mxu0 %v7795_v54 }
 0x209   : > { %v1513_v17 = vmul.f32 %v1496_v14, %v7802_v10  ;;  %v1512_v22 = vmul.f32 %v1491_v16, %v7804_v13  ;;  %2306 = vperm.xlu1 %6634, %v7647_v34   ;;  %2301 = vperm.xlu0 %6633, %v7626_v26   ;;  %v7824_v26 = vld [vmem:[#allocation2 + $0x2f] sm:$0xff] }
 0x20a   : > { %5963 = vmatmul.mubr.msk.bf16.vlgmr.msra.gmra.mrb[0].mxu1 %vm585_vm0, %v679_v25 }
 0x20b   : > { %v1518_v36 = vpack.c.bf16 %v1513_v17, %v1512_v22  ;;  %5971 = vmatpush3.bf16.msra.mxu1 %v7749_v56 }
 0x20c   : > { %v1506_v37 = vpop.permute.xlu1 %1505  ;;  %v1501_v39 = vpop.permute.xlu0 %1500  ;;  %5972 = vmatprep.subr.bf16.mxu1 %v6646_v7 }
 0x20d   : > { %v1515_v46 = vmul.f32 %v1506_v37, %v7812_v12  ;;  %v1514_v34 = vmul.f32 %v1501_v39, %v7814_v27  ;;  %2316 = vperm.xlu1 %6634, %v7659_v42   ;;  %2311 = vperm.xlu0 %6633, %v7645_v33   ;;  %v7834_v33 = vld [vmem:[#allocation2 + $0x3f] sm:$0xff]  ;;  %v7836_v42 = vld [vmem:[#allocation2 + $0x37] sm:$0xff] }
 0x20e   : > { %6014 = vmatprep.mubr.msk.bf16.mxu0 %vm585_vm0, %v1518_v36 }
 0x20f   : > { %v1519_v56 = vpack.c.bf16 %v1515_v46, %v1514_v34  ;;  %5973 = vmatpush3.bf16.msra.mxu1 %v6646_v7 }
 0x210   : > { %v658_v53 = vpop.permute.xlu1 %657  ;;  %v653_v0 = vpop.permute.xlu0 %652  ;;  %5982 = vmatprep.subr.bf16.mxu1 %v7817_v45 }
 0x211   : > { %v675_v55 = vmul.f32 %v658_v53, %v7824_v26  ;;  %v674_v25 = vmul.f32 %v653_v0, %v7826_v48  ;;  %2326 = vperm.xlu1 %6634, %v7665_v44   ;;  %2321 = vperm.xlu0 %6633, %v7657_v41   ;;  %v938_v53 = vld [vmem:[#allocation2 + $0x9] sm:$0xff] }
 0x212   : > { %6015 = vmatmul.mubr.msk.bf16.gmra.mrb[4].mxu0 %vm585_vm0, %v1519_v56 }
 0x213   : > { %v680_v14 = vpack.c.bf16 %v675_v55, %v674_v25 }
 0x214   : > { %v668_v16 = vpop.permute.xlu1 %667  ;;  %v663_v7 = vpop.permute.xlu0 %662 }
 0x215   : > { %v677_v17 = vmul.f32 %v668_v16, %v7834_v33  ;;  %v676_v22 = vmul.f32 %v663_v7, %v7836_v42  ;;  %2619 = vperm.xlu1 %6634, %v7671_v50   ;;  %2331 = vperm.xlu0 %6633, %v7661_v43   ;;  %v7858_v7 = vld [vmem:[#allocation10 + $0x80] sm:$0xff]  }
 0x216   : > { %5966 = vmatprep.mubr.msk.bf16.mxu1 %vm585_vm0, %v680_v14 }
 0x217   : > { %v681_v41 = vpack.c.bf16 %v677_v17, %v676_v22 }
 0x218   : > { %v1647_v44 = vpop.permute.xlu1 %1646  ;;  %v1642_v36 = vpop.permute.xlu0 %1641 }
 0x219   : > { %v1680_v37 = vmul.f32 %v1647_v44, %v7791_v11  ;;  %v1679_v39 = vmul.f32 %v1642_v36, %v7793_v6  ;;  %2629 = vperm.xlu1 %6634, %v7677_v52   ;;  %2624 = vperm.xlu0 %6633, %v7669_v49   ;;  %v6648_v49 = vld [vmem:[#allocation10 + $0x78] sm:$0xff]  }
 0x21a   : > { %5967 = vmatmul.mubr.msk.bf16.gmra.mrb[4].mxu1 %vm585_vm0, %v681_v41 }
 0x21b   : > { %v1687_v46 = vpack.c.bf16 %v1680_v37, %v1679_v39 }
 0x21c   : > { %v1657_v34 = vpop.permute.xlu1 %1656  ;;  %v1652_v50 = vpop.permute.xlu0 %1651 }
 0x21d   : > { %v1682_v43 = vmul.f32 %v1657_v34, %v7824_v26  ;;  %v1681_v56 = vmul.f32 %v1652_v50, %v7826_v48  ;;  %2639 = vperm.xlu1 %6634, %v7683_v58   ;;  %2634 = vperm.xlu0 %6633, %v7673_v51  }
 0x21e   : > { %6022 = vmatprep.mubr.msk.bf16.mxu0 %vm585_vm0, %v1687_v46 }
 0x21f   : > { %v1688_v0 = vpack.c.bf16 %v1682_v43, %v1681_v56 }
 0x220   : > { %v963_v52 = vpop.permute.xlu1 %962  ;;  %v958_v55 = vpop.permute.xlu0 %957 }
 0x221   : > { %v996_v25 = vmul.f32 %v7769_v32, %v963_v52  ;;  %v995_v14 = vmul.f32 %v958_v55, %v938_v53  ;;  %2649 = vperm.xlu1 %6634, %v7689_v60   ;;  %2644 = vperm.xlu0 %6633, %v7681_v57   ;;  %v6689_v52 = vld [vmem:[#allocation7 + $0x100] sm:$0xff] }
 0x222   : > { %6023 = vmatmul.mubr.msk.bf16.vlgmr.msra.gmra.mrb[0].mxu0 %vm585_vm0, %v1688_v0 }
 0x223   : > { %v1003_v16 = vpack.c.bf16 %v996_v25, %v995_v14  ;;  %6031 = vmatpush3.bf16.msra.mxu0 %v7795_v54  ;;  %v6650_v54 = vld [vmem:[#allocation10 + $0x38] sm:$0xff]   ;;  %v6690_v25 = vld [vmem:[#allocation7 + $0x108] sm:$0xff] }
 0x224   : > { %v973_v51 = vpop.permute.xlu1 %972  ;;  %v968_v58 = vpop.permute.xlu0 %967  ;;  %6032 = vmatprep.subr.bf16.mxu0 %v6648_v49 }
 0x225   : > { %v998_v17 = vmul.f32 %v7778_v29, %v973_v51  ;;  %v997_v22 = vmul.f32 %v7767_v38, %v968_v58  ;;  %2789 = vperm.xlu1 %6634, %v7695_v2   ;;  %2654 = vperm.xlu0 %6633, %v7687_v59   ;;  %v1629_v59 = vld [vmem:[#allocation2 + $0x4f] sm:$0xff]  ;;  %v7871_v2 = vld [vmem:[#allocation2 + $0x47] sm:$0xff] }
 0x226   : > { %5974 = vmatprep.mubr.msk.bf16.mxu1 %vm585_vm0, %v1003_v16 }
 0x227   : > { %v1004_v57 = vpack.c.bf16 %v998_v17, %v997_v22  ;;  %6033 = vmatpush3.bf16.msra.mxu0 %v6648_v49  ;;  %v6691_v17 = vld [vmem:[#allocation7 + $0x118] sm:$0xff]  ;;  %v6652_v22 = vld [vmem:[#allocation10 + $0x88] sm:$0xff]  }
 0x228   : > { %v1667_v60 = vpop.permute.xlu1 %1666  ;;  %v1662_v32 = vpop.permute.xlu0 %1661  ;;  %6042 = vmatprep.subr.bf16.mxu0 %v7858_v7 }
 0x229   : > { %v1684_v41 = vmul.f32 %v1667_v60, %v7834_v33  ;;  %v1683_v44 = vmul.f32 %v1662_v32, %v7836_v42  ;;  %2799 = vperm.xlu1 %6634, %v7701_v8   ;;  %2794 = vperm.xlu0 %6633, %v7693_v1  }
 0x22a   : > { %5975 = vmatmul.mubr.msk.bf16.vlgmr.msra.gmra.mrb[0].mxu1 %vm585_vm0, %v1004_v57 }
 0x22b   : > { %v1689_v36 = vpack.c.bf16 %v1684_v41, %v1683_v44  ;;  %5983 = vmatpush3.bf16.msra.mxu1 %v7817_v45 }
 0x22c   : > { %v1677_v37 = vpop.permute.xlu1 %1676  ;;  %v1672_v39 = vpop.permute.xlu0 %1671  ;;  %5984 = vmatprep.subr.bf16.mxu1 %v6650_v54 }
 0x22d   : > { %v1686_v46 = vmul.f32 %v1677_v37, %v1629_v59  ;;  %v1685_v34 = vmul.f32 %v1672_v39, %v7871_v2  ;;  %2809 = vperm.xlu1 %6634, %v7707_v19   ;;  %2804 = vperm.xlu0 %6633, %v7699_v4   ;;  %v7922_v37 = vld [vmem:[#allocation7 + $0x158] sm:$0xff] }
 0x22e   : > { %6026 = vmatprep.mubr.msk.bf16.mxu0 %vm585_vm0, %v1689_v36  ;;  %v7920_v36 = vld [vmem:[#allocation7 + $0x160] sm:$0xff] }
 0x22f   : > { %v1690_v1 = vpack.c.bf16 %v1686_v46, %v1685_v34  ;;  %5985 = vmatpush3.bf16.msra.mxu1 %v6650_v54  ;;  %v6692_v46 = vld [vmem:[#allocation10 + $0x40] sm:$0xff]  }
 0x230   : > { %v983_v8 = vpop.permute.xlu1 %982  ;;  %v978_v50 = vpop.permute.xlu0 %977  ;;  %6270 = vmatprep.subr.bf16.mxu1 %v7621_v23 }
 0x231   : > { %v1000_v45 = vmul.f32 %v7804_v13, %v983_v8  ;;  %v999_v43 = vmul.f32 %v7776_v3, %v978_v50  ;;  %2819 = vperm.xlu1 %6634, %v7713_v21   ;;  %2814 = vperm.xlu0 %6633, %v7705_v18   ;;  %v6693_v8 = vld [vmem:[#allocation10 + $0x48] sm:$0xff]  }
 0x232   : > { %6027 = vmatmul.mubr.msk.bf16.gmra.mrb[4].mxu0 %vm585_vm0, %v1690_v1 }
 0x233   : > { %v1005_v19 = vpack.c.bf16 %v1000_v45, %v999_v43  ;;  %v7928_v43 = vld [vmem:[#allocation7 + $0x170] sm:$0xff] }
 0x234   : > { %v993_v4 = vpop.permute.xlu1 %992  ;;  %v988_v56 = vpop.permute.xlu0 %987 }
 0x235   : > { %v1002_v53 = vmul.f32 %v7814_v27, %v993_v4  ;;  %v1001_v0 = vmul.f32 %v7802_v10, %v988_v56  ;;  %2959 = vperm.xlu1 %6634, %v6689_v52   ;;  %2824 = vperm.xlu0 %6633, %v7711_v20  }
 0x236   : > { %5978 = vmatprep.mubr.msk.bf16.mxu1 %vm585_vm0, %v1005_v19  ;;  %v7930_v19 = vld [vmem:[#allocation7 + $0x168] sm:$0xff] }
 0x237   : > { %v1006_v23 = vpack.c.bf16 %v1002_v53, %v1001_v0 }
 0x238   : > { %v1818_v55 = vpop.permute.xlu1 %1817  ;;  %v1813_v21 = vpop.permute.xlu0 %1812 }
 0x239   : > { %v1851_v18 = vmul.f32 %v1818_v55, %v7726_v61  ;;  %v1850_v49 = vmul.f32 %v1813_v21, %v7723_v40  ;;  %2969 = vperm.xlu1 %6634, %v7600_v9   ;;  %2964 = vperm.xlu0 %6633, %v6690_v25   ;;  %v7939_v55 = vld [vmem:[#allocation7 + $0x178] sm:$0xff] }
 0x23a   : > { %5979 = vmatmul.mubr.msk.bf16.gmra.mrb[4].mxu1 %vm585_vm0, %v1006_v23  ;;  %v7937_v23 = vld [vmem:[#allocation7 + $0x180] sm:$0xff] }
 0x23b   : > { %v1858_v14 = vpack.c.bf16 %v1851_v18, %v1850_v49 }
 0x23c   : > { %v1828_v16 = vpop.permute.xlu1 %1827  ;;  %v1823_v51 = vpop.permute.xlu0 %1822 }
 0x23d   : > { %v1853_v20 = vmul.f32 %v1828_v16, %v7746_v47  ;;  %v1852_v58 = vmul.f32 %v1823_v51, %v7738_v24  ;;  %2979 = vperm.xlu1 %6634, %v7719_v31   ;;  %2974 = vperm.xlu0 %6633, %v6691_v17   ;;  %v7901_v24 = vld [vmem:[#allocation7 + $0x140] sm:$0xff] }
 0x23e   : > { %6034 = vmatprep.mubr.msk.bf16.mxu0 %vm585_vm0, %v1858_v14 }
 0x23f   : > { %v1859_v40 = vpack.c.bf16 %v1853_v20, %v1852_v58 }
 0x240   : > { %v1134_v61 = vpop.permute.xlu1 %1133  ;;  %v1129_v9 = vpop.permute.xlu0 %1128 }
 0x241   : > { %v1167_v57 = vmul.f32 %v1134_v61, %v7793_v6  ;;  %v1166_v60 = vmul.f32 %v1129_v9, %v7785_v5  ;;  %2989 = vperm.xlu1 %6634, %v7730_v63   ;;  %2984 = vperm.xlu0 %6633, %v7717_v30   ;;  %v7909_v30 = vld [vmem:[#allocation7 + $0x150] sm:$0xff]  ;;  %v7911_v63 = vld [vmem:[#allocation7 + $0x148] sm:$0xff] }
 0x242   : > { %6035 = vmatmul.mubr.msk.bf16.vlgmr.msra.gmra.mrb[0].mxu0 %vm585_vm0, %v1859_v40 }
 0x243   : > { %v1174_v31 = vpack.c.bf16 %v1167_v57, %v1166_v60  ;;  %6043 = vmatpush3.bf16.msra.mxu0 %v7858_v7 }
 0x244   : > { %v1144_v32 = vpop.permute.xlu1 %1143  ;;  %v1139_v54 = vpop.permute.xlu0 %1138  ;;  %6044 = vmatprep.subr.bf16.mxu0 %v6652_v22 }
 0x245   : > { %v1169_v41 = vmul.f32 %v1144_v32, %v7826_v48  ;;  %v1168_v6 = vmul.f32 %v1139_v54, %v7791_v11  ;;  %3129 = vperm.xlu1 %6634, %v7901_v24   ;;  %2994 = vperm.xlu0 %6633, %v7728_v62   ;;  %v1800_v11 = vld [vmem:[#allocation2 + $0x50] sm:$0xff]  ;;  %v7918_v62 = vld [vmem:[#allocation2 + $0x48] sm:$0xff] }
 0x246   : > { %5986 = vmatprep.mubr.msk.bf16.mxu1 %vm585_vm0, %v1174_v31 }
 0x247   : > { %v1175_v5 = vpack.c.bf16 %v1169_v41, %v1168_v6  ;;  %6045 = vmatpush3.bf16.msra.mxu0 %v6652_v22 }
 0x248   : > { %v1838_v7 = vpop.permute.xlu1 %1837  ;;  %v1833_v44 = vpop.permute.xlu0 %1832 }
 0x249   : > { %v1855_v59 = vmul.f32 %v1838_v7, %v7756_v15  ;;  %v1854_v48 = vmul.f32 %v1833_v44, %v7758_v35  ;;  %3139 = vperm.xlu1 %6634, %v7909_v30   ;;  %3134 = vperm.xlu0 %6633, %v7911_v63  }
 0x24a   : > { %5987 = vmatmul.mubr.msk.bf16.vlgmr.msra.gmra.mrb[0].mxu1 %vm585_vm0, %v1175_v5 }
 0x24b   : > { %v1860_v39 = vpack.c.bf16 %v1855_v59, %v1854_v48  ;;  %6272 = vmatpush3.bf16.msra.mxu1 %v6692_v46 }
 0x24c   : > { %v1848_v34 = vpop.permute.xlu1 %1847  ;;  %v1843_v1 = vpop.permute.xlu0 %1842  ;;  %6271 = vmatprep.subr.bf16.mxu1 %v6693_v8 }
 0x24d   : > { %v1857_v50 = vmul.f32 %v1848_v34, %v1800_v11  ;;  %v1856_v45 = vmul.f32 %v1843_v1, %v7918_v62  ;;  %3149 = vperm.xlu1 %6634, %v7920_v36   ;;  %3144 = vperm.xlu0 %6633, %v7922_v37   ;;  %v7993_v1 = vld [vmem:[#allocation7 + $0x1d8] sm:$0xff] }
 0x24e   : > { %6038 = vmatprep.mubr.msk.bf16.mxu0 %vm585_vm0, %v1860_v39 }
 0x24f   : > { %v1861_v4 = vpack.c.bf16 %v1857_v50, %v1856_v45  ;;  %6273 = vmatpush3.bf16.msra.mxu1 %v6693_v8 }
 0x250   : > { %v1154_v56 = vpop.permute.xlu1 %1153  ;;  %v1149_v53 = vpop.permute.xlu0 %1148 }
 0x251   : > { %v1171_v0 = vmul.f32 %v1154_v56, %v7836_v42  ;;  %v1170_v52 = vmul.f32 %v1149_v53, %v7824_v26  ;;  %3159 = vperm.xlu1 %6634, %v7928_v43   ;;  %3154 = vperm.xlu0 %6633, %v7930_v19   ;;  %v7946_v26 = vld [vmem:[#allocation7 + $0x190] sm:$0xff]  ;;  %v7948_v42 = vld [vmem:[#allocation7 + $0x188] sm:$0xff] }
 0x252   : > { %6039 = vmatmul.mubr.msk.bf16.gmra.mrb[4].mxu0 %vm585_vm0, %v1861_v4 }
 0x253   : > { %v1176_v21 = vpack.c.bf16 %v1171_v0, %v1170_v52 }
 0x254   : > { %v1164_v18 = vpop.permute.xlu1 %1163  ;;  %v1159_v49 = vpop.permute.xlu0 %1158 }
 0x255   : > { %v1173_v25 = vmul.f32 %v7871_v2, %v1164_v18  ;;  %v1172_v14 = vmul.f32 %v1159_v49, %v7834_v33  ;;  %3299 = vperm.xlu1 %6634, %v7937_v23   ;;  %3164 = vperm.xlu0 %6633, %v7939_v55   ;;  %v7955_v33 = vld [vmem:[#allocation7 + $0x1a0] sm:$0xff]  ;;  %v7957_v2 = vld [vmem:[#allocation7 + $0x198] sm:$0xff]  ;;  %v8012_v49 = vld [vmem:[#allocation7 + $0x210] sm:$0xff] }
 0x256   : > { %5990 = vmatprep.mubr.msk.bf16.mxu1 %vm585_vm0, %v1176_v21  ;;  %v8008_v21 = vld [vmem:[#allocation7 + $0x1f8] sm:$0xff] }
 0x257   : > { %v1177_v16 = vpack.c.bf16 %v1173_v25, %v1172_v14  ;;  %v8014_v25 = vld [vmem:[#allocation7 + $0x208] sm:$0xff]  ;;  %v8018_v14 = vld [vmem:[#allocation7 + $0x220] sm:$0xff] }
 0x258   : > { %v1989_v51 = vpop.permute.xlu1 %1988  ;;  %v1984_v20 = vpop.permute.xlu0 %1983 }
 0x259   : > { %v2022_v58 = vmul.f32 %v1989_v51, %v7778_v29  ;;  %v2021_v17 = vmul.f32 %v1984_v20, %v7767_v38  ;;  %3309 = vperm.xlu1 %6634, %v7946_v26   ;;  %3304 = vperm.xlu0 %6633, %v7948_v42   ;;  %v7964_v38 = vld [vmem:[#allocation7 + $0x1b0] sm:$0xff]  ;;  %v7966_v29 = vld [vmem:[#allocation7 + $0x1a8] sm:$0xff]  ;;  %v3917_v20 = vld [vmem:[#allocation7 + $0x40] sm:$0xff] }
 0x25a   : > { %5991 = vmatmul.mubr.msk.bf16.gmra.mrb[4].mxu1 %vm585_vm0, %v1177_v16  ;;  %v8020_v16 = vld [vmem:[#allocation7 + $0x218] sm:$0xff]  ;;  %v8024_v51 = vld [vmem:[#allocation7 + $0x228] sm:$0xff] }
 0x25b   : > { %v2029_v40 = vpack.c.bf16 %v2022_v58, %v2021_v17  ;;  %v8028_v58 = vld [vmem:[#allocation7 + $0x238] sm:$0xff]  ;;  %v3919_v17 = vld [vmem:[#allocation7 + $0x50] sm:$0xff] }
 0x25c   : > { %v1999_v61 = vpop.permute.xlu1 %1998  ;;  %v1994_v9 = vpop.permute.xlu0 %1993 }
 0x25d   : > { %v2024_v22 = vmul.f32 %v1999_v61, %v7804_v13  ;;  %v2023_v57 = vmul.f32 %v1994_v9, %v7776_v3  ;;  %3319 = vperm.xlu1 %6634, %v7955_v33   ;;  %3314 = vperm.xlu0 %6633, %v7957_v2   ;;  %v7973_v3 = vld [vmem:[#allocation7 + $0x1c0] sm:$0xff]  ;;  %v7975_v13 = vld [vmem:[#allocation7 + $0x1b8] sm:$0xff] }
 0x25e   : > { %6046 = vmatprep.mubr.msk.bf16.mxu0 %vm585_vm0, %v2029_v40  ;;  %v3918_v40 = vld [vmem:[#allocation7 + $0x48] sm:$0xff]  ;;  %v3921_v61 = vld [vmem:[#allocation7 + $0x60] sm:$0xff]  ;;  %v3920_v9 = vld [vmem:[#allocation7 + $0x58] sm:$0xff] }
 0x25f   : > { %v2030_v60 = vpack.c.bf16 %v2024_v22, %v2023_v57  ;;  %v3923_v57 = vld [vmem:[#allocation7 + $0x70] sm:$0xff] }
 0x260   : > { %v1325_v31 = vpop.permute.xlu1 %1324  ;;  %v1320_v32 = vpop.permute.xlu0 %1319 }
 0x261   : > { %v1342_v54 = vmul.f32 %v1325_v31, %v7758_v35  ;;  %v1341_v41 = vmul.f32 %v1320_v32, %v7746_v47  ;;  %3329 = vperm.xlu1 %6634, %v7964_v38   ;;  %3324 = vperm.xlu0 %6633, %v7966_v29   ;;  %v7982_v47 = vld [vmem:[#allocation7 + $0x1d0] sm:$0xff]  ;;  %v7984_v35 = vld [vmem:[#allocation7 + $0x1c8] sm:$0xff]  ;;  %v3845_v31 = vld [vmem:[#allocation7] sm:$0xff] }
 0x262   : > { %6047 = vmatmul.mubr.msk.bf16.vlgmr.msra.gmra.mrb[0].mxu0 %vm585_vm0, %v2030_v60  ;;  %v3924_v32 = vld [vmem:[#allocation7 + $0x78] sm:$0xff] }
 0x263   : > { %v1347_v6 = vpack.c.bf16 %v1342_v54, %v1341_v41  ;;  %v3847_v41 = vld [vmem:[#allocation7 + $0x10] sm:$0xff] }
 0x264   : > { %v2009_v5 = vpop.permute.xlu1 %2008  ;;  %v2004_v7 = vpop.permute.xlu0 %2003 }
 0x265   : > { %v2026_v44 = vmul.f32 %v2009_v5, %v7814_v27  ;;  %v2025_v59 = vmul.f32 %v2004_v7, %v7802_v10  ;;  %3469 = vperm.xlu1 %6634, %v7973_v3   ;;  %3334 = vperm.xlu0 %6633, %v7975_v13   ;;  %v1971_v10 = vld [vmem:[#allocation2 + $0x51] sm:$0xff]  ;;  %v7991_v27 = vld [vmem:[#allocation7 + $0x1e0] sm:$0xff] }
 0x266   : > { %6002 = vmatprep.mubr.msk.bf16.mxu1 %vm585_vm0, %v1347_v6  ;;  %v3846_v6 = vld [vmem:[#allocation7 + $0x8] sm:$0xff] }
 0x267   : > { %v2031_v48 = vpack.c.bf16 %v2026_v44, %v2025_v59  ;;  %v3849_v44 = vld [vmem:[#allocation7 + $0x20] sm:$0xff]  ;;  %v3848_v59 = vld [vmem:[#allocation7 + $0x18] sm:$0xff] }
 0x268   : > { %v1335_v11 = vpop.permute.xlu1 %1334  ;;  %v1330_v39 = vpop.permute.xlu0 %1329 }
 0x269   : > { %v1344_v46 = vmul.f32 %v7918_v62, %v1335_v11  ;;  %v1343_v34 = vmul.f32 %v1330_v39, %v7756_v15  ;;  %3479 = vperm.xlu1 %6634, %v7982_v47   ;;  %3474 = vperm.xlu0 %6633, %v7984_v35   ;;  %v7999_v15 = vld [vmem:[#allocation7 + $0x1f0] sm:$0xff]  ;;  %v8001_v62 = vld [vmem:[#allocation7 + $0x1e8] sm:$0xff] }
 0x26a   : > { %6050 = vmatprep.mubr.msk.bf16.mxu0 %vm585_vm0, %v2031_v48  ;;  %v3851_v11 = vld [vmem:[#allocation7 + $0x30] sm:$0xff]  ;;  %v3850_v39 = vld [vmem:[#allocation7 + $0x28] sm:$0xff] }
 0x26b   : > { %v1348_v8 = vpack.c.bf16 %v1344_v46, %v1343_v34  ;;  %v4168_v34 = vld [vmem:[#allocation7 + $0x80] sm:$0xff] }
 0x26c   : > { %v2019_v50 = vpop.permute.xlu1 %2018  ;;  %v2014_v45 = vpop.permute.xlu0 %2013 }
 0x26d   : > { %v2028_v4 = vmul.f32 %v2019_v50, %v1971_v10  ;;  %v2027_v56 = vmul.f32 %v2014_v45, %v7812_v12  ;;  %3489 = vperm.xlu1 %6634, %v7991_v27   ;;  %3484 = vperm.xlu0 %6633, %v7993_v1   ;;  %v8006_v12 = vld [vmem:[#allocation7 + $0x200] sm:$0xff]  ;;  %v3852_v10 = vld [vmem:[#allocation7 + $0x38] sm:$0xff]  ;;  %v4170_v45 = vld [vmem:[#allocation7 + $0x90] sm:$0xff] }
 0x26e   : > { %6003 = vmatmul.mubr.msk.bf16.vlgmr.msra.gmra.mrb[4].mxu1 %vm585_vm0, %v1348_v8 }
 0x26f   : > { %v2032_v53 = vpack.c.bf16 %v2028_v4, %v2027_v56  ;;  %v4169_v4 = vld [vmem:[#allocation7 + $0x88] sm:$0xff] }
 0x270   : > { %v2167_v0 = vpop.permute.xlu0 %2166  ;;  %v2197_v52 = vpop.permute.xlu1 %2196 }
 0x271   : > { %3499 = vperm.xlu1 %6634, %v7999_v15   ;;  %3494 = vperm.xlu0 %6633, %v8001_v62   ;;  %6468 = vpush %v2167_v0  ;;  %v4171_v0 = vld [vmem:[#allocation7 + $0x98] sm:$0xff] }
 0x272   : > { %6051 = vmatmul.mubr.msk.bf16.gmra.mrb[4].mxu0 %vm585_vm0, %v2032_v53  ;;  %6470 = vpush %v2197_v52  ;;  %v4172_v53 = vld [vmem:[#allocation7 + $0xa0] sm:$0xff] }
 0x274   : > { %v2227_v18 = vpop.permute.xlu0 %2226  ;;  %v8031_v22 = vpop.permute.xlu1 %2368 }
 0x275   : > { %3639 = vperm.xlu1 %6634, %v8006_v12   ;;  %3504 = vperm.xlu0 %6633, %v8008_v21   ;;  %6472 = vpush %v2227_v18  ;;  %v4174_v18 = vld [vmem:[#allocation7 + $0xb0] sm:$0xff] }
 0x278   : > { %v8033_v60 = vpop.permute.xlu0 %2373  ;;  %v8035_v54 = vpop.permute.xlu1 %2378 }
 0x279   : > { %3649 = vperm.xlu1 %6634, %v8012_v49   ;;  %3644 = vperm.xlu0 %6633, %v8014_v25  }
 0x27c   : > { %v8037_v5 = vpop.permute.xlu0 %2383  ;;  %v8039_v7 = vpop.permute.xlu1 %2388 }
 0x27d   : > { %3659 = vperm.xlu1 %6634, %v8018_v14   ;;  %3654 = vperm.xlu0 %6633, %v8020_v16  }
 0x280   : > { %v8041_v48 = vpop.permute.xlu0 %2393  ;;  %v8043_v46 = vpop.permute.xlu1 %2398 }
 0x281   : > { %3669 = vperm.xlu1 %6634, %v7740_v28   ;;  %3664 = vperm.xlu0 %6633, %v8024_v51   ;;  %v3922_v28 = vld [vmem:[#allocation7 + $0x68] sm:$0xff] }
 0x284   : > { %v8045_v8 = vpop.permute.xlu0 %2403  ;;  %v8047_v50 = vpop.permute.xlu1 %2296 }
 0x285   : > { %3927 = vperm.xlu1 %6634, %v3917_v20   ;;  %3674 = vperm.xlu0 %6633, %v8028_v58   ;;  %v4173_v20 = vld [vmem:[#allocation7 + $0xa8] sm:$0xff] }
 0x288   : > { %v8049_v56 = vpop.permute.xlu0 %2301  ;;  %v8051_v52 = vpop.permute.xlu1 %2306 }
 0x289   : > { %3937 = vperm.xlu1 %6634, %v3919_v17   ;;  %3932 = vperm.xlu0 %6633, %v3918_v40  }
 0x28c   : > { %v8053_v17 = vpop.permute.xlu0 %2311  ;;  %v8055_v40 = vpop.permute.xlu1 %2316 }
 0x28d   : > { %3947 = vperm.xlu1 %6634, %v3921_v61   ;;  %3942 = vperm.xlu0 %6633, %v3920_v9   ;;  %v4338_v61 = vld [vmem:[#allocation7 + $0xc0] sm:$0xff]  ;;  %v4175_v9 = vld [vmem:[#allocation7 + $0xb8] sm:$0xff] }
 0x291   : > { %3957 = vperm.xlu1 %6634, %v3923_v57   ;;  %3952 = vperm.xlu0 %6633, %v3922_v28   ;;  %v8057_v57 = vpop.permute.xlu0 %2321  ;;  %v4340_v28 = vld [vmem:[#allocation7 + $0xd0] sm:$0xff] }
 0x295   : > { %3855 = vperm.xlu1 %6634, %v3845_v31   ;;  %3962 = vperm.xlu0 %6633, %v3924_v32   ;;  %v4339_v31 = vld [vmem:[#allocation7 + $0xc8] sm:$0xff]  ;;  %v8059_v32 = vpop.permute.xlu1 %2326 }
 0x299   : > { %3865 = vperm.xlu1 %6634, %v3847_v41   ;;  %3860 = vperm.xlu0 %6633, %v3846_v6   ;;  %v4342_v41 = vld [vmem:[#allocation7 + $0xe0] sm:$0xff]  ;;  %v4341_v6 = vld [vmem:[#allocation7 + $0xd8] sm:$0xff] }
 0x29d   : > { %3875 = vperm.xlu1 %6634, %v3849_v44   ;;  %3870 = vperm.xlu0 %6633, %v3848_v59   ;;  %v8061_v44 = vpop.permute.xlu0 %2331  ;;  %v8063_v59 = vpop.permute.xlu1 %2619 }
 0x2a1   : > { %3885 = vperm.xlu1 %6634, %v3851_v11   ;;  %3880 = vperm.xlu0 %6633, %v3850_v39   ;;  %v4344_v11 = vld [vmem:[#allocation7 + $0xf0] sm:$0xff]  ;;  %v4343_v39 = vld [vmem:[#allocation7 + $0xe8] sm:$0xff] }
 0x2a2   : > { %s6469_s2 = spop %6468 }
 0x2a3   : > { %s6471_s25 = spop %6470 }
 0x2a5   : > { %4178 = vperm.xlu1 %6634, %v4168_v34   ;;  %3890 = vperm.xlu0 %6633, %v3852_v10   ;;  %v8065_v34 = vpop.permute.xlu0 %2624  ;;  %v6653_v10 = vld [vmem:[#allocation13 + $0x10] sm:$0xff]  }
 0x2a6   : > { %6054 = vmatprep.subr.bf16.mxu1 %v6653_v10  ;;  %s6473_s20 = spop %6472 }
 0x2a7   : > { %6055 = vmatpush3.bf16.msra.mxu1 %v6653_v10  ;;  %v8077_v10 = vld [vmem:[#allocation13] sm:$0xff]  }
 0x2a9   : > { %4188 = vperm.xlu1 %6634, %v4170_v45   ;;  %4183 = vperm.xlu0 %6633, %v4169_v4   ;;  %v4508_v45 = vld [vmem:[#allocation7 + $0x100] sm:$0xff]  ;;  %v4345_v4 = vld [vmem:[#allocation7 + $0xf8] sm:$0xff] }
 0x2ad   : > { %4198 = vperm.xlu1 %6634, %v4172_v53   ;;  %4193 = vperm.xlu0 %6633, %v4171_v0   ;;  %v8067_v53 = vpop.permute.xlu1 %2629  ;;  %v6654_v0 = vld [vmem:[#allocation13 + $0x18] sm:$0xff]  }
 0x2ae   : > { %6056 = vmatprep.subr.bf16.mxu1 %v6654_v0 }
 0x2af   : > { %6057 = vmatpush3.bf16.msra.mxu1 %v6654_v0 }
 0x2b0   : > { %6066 = vmatprep.subr.bf16.mxu1 %v8077_v10 }
 0x2b1   : > { %4208 = vperm.xlu1 %6634, %v4174_v18   ;;  %4203 = vperm.xlu0 %6633, %v4173_v20   ;;  %v4510_v18 = vld [vmem:[#allocation7 + $0x110] sm:$0xff]  ;;  %v4509_v20 = vld [vmem:[#allocation7 + $0x108] sm:$0xff] }
 0x2b5   : > { %4348 = vperm.xlu1 %6634, %v4338_v61   ;;  %4213 = vperm.xlu0 %6633, %v4175_v9   ;;  %v8069_v61 = vpop.permute.xlu0 %2634  ;;  %v8071_v9 = vpop.permute.xlu1 %2639 }
 0x2b9   : > { %4358 = vperm.xlu1 %6634, %v4340_v28   ;;  %4353 = vperm.xlu0 %6633, %v4339_v31   ;;  %v4512_v28 = vld [vmem:[#allocation7 + $0x120] sm:$0xff]  ;;  %v4511_v31 = vld [vmem:[#allocation7 + $0x118] sm:$0xff] }
 0x2bd   : > { %4368 = vperm.xlu1 %6634, %v4342_v41   ;;  %4363 = vperm.xlu0 %6633, %v4341_v6   ;;  %v8073_v41 = vpop.permute.xlu0 %2644  ;;  %v4514_v6 = vld [vmem:[#allocation7 + $0x130] sm:$0xff] }
 0x2c1   : > { %4378 = vperm.xlu1 %6634, %v4344_v11   ;;  %4373 = vperm.xlu0 %6633, %v4343_v39   ;;  %v4513_v11 = vld [vmem:[#allocation7 + $0x128] sm:$0xff]  ;;  %v8075_v39 = vpop.permute.xlu1 %2649 }
 0x2c5   : > { %4518 = vperm.xlu1 %6634, %v4508_v45   ;;  %4383 = vperm.xlu0 %6633, %v4345_v4   ;;  %v4515_v45 = vld [vmem:[#allocation7 + $0x138] sm:$0xff]  ;;  %v8079_v4 = vpop.permute.xlu0 %2654  ;;  %v8082_v0 = vpop.permute.xlu1 %2789 }
 0x2c9   : > { %4528 = vperm.xlu1 %6634, %v4510_v18   ;;  %4523 = vperm.xlu0 %6633, %v4509_v20   ;;  %v8085_v18 = vpop.permute.xlu0 %2794  ;;  %v8089_v20 = vpop.permute.xlu1 %2799 }
 0x2cd   : > { %4538 = vperm.xlu1 %6634, %v4512_v28   ;;  %4533 = vperm.xlu0 %6633, %v4511_v31   ;;  %v8093_v28 = vpop.permute.xlu0 %2804  ;;  %v8095_v31 = vpop.permute.xlu1 %2809 }
 0x2ce   : > { %8979 = vst [vmem:[#allocation30_spill] sm:$0xff] %v8095_v31 }
 0x2d1   : > { %4548 = vperm.xlu1 %6634, %v4514_v6   ;;  %4543 = vperm.xlu0 %6633, %v4513_v11   ;;  %v2138_v11 = vld [vmem:[#allocation8 + $0x8] sm:$0xff] }
 0x2d5   : > { %4688 = vperm.xlu1 %6634, %v7901_v24   ;;  %4553 = vperm.xlu0 %6633, %v4515_v45   ;;  %v8099_v24 = vpop.permute.xlu0 %2814  ;;  %v2159_v45 = vld [vmem:[#allocation8 + $0x48] sm:$0xff] }
 0x2d6   : > { %8980 = vst [vmem:[#allocation31_spill] sm:$0xff] %v8099_v24 }
 0x2d9   : > { %4698 = vperm.xlu1 %6634, %v7909_v30   ;;  %4693 = vperm.xlu0 %6633, %v7911_v63   ;;  %v8103_v30 = vpop.permute.xlu1 %2819  ;;  %v8107_v63 = vpop.permute.xlu0 %2824 }
 0x2da   : > { %8981 = vst [vmem:[#allocation32_spill] sm:$0xff] %v8103_v30  ;;  %8982 = vst [vmem:[#allocation33_spill] sm:$0xff] %v8107_v63 }
 0x2dd   : > { %4708 = vperm.xlu1 %6634, %v7920_v36   ;;  %4703 = vperm.xlu0 %6633, %v7922_v37   ;;  %v8109_v36 = vpop.permute.xlu1 %2959  ;;  %v8113_v37 = vpop.permute.xlu0 %2964 }
 0x2de   : > { %8983 = vst [vmem:[#allocation34_spill] sm:$0xff] %v8109_v36  ;;  %8984 = vst [vmem:[#allocation35_spill] sm:$0xff] %v8113_v37  ;;  %v2218_v36 = vld [vmem:[#allocation8 + $0xc0] sm:$0xff] }
 0x2e1   : > { %4718 = vperm.xlu1 %6634, %v7928_v43   ;;  %4713 = vperm.xlu0 %6633, %v7930_v19   ;;  %v8117_v43 = vpop.permute.xlu1 %2969  ;;  %v8121_v19 = vpop.permute.xlu0 %2974 }
 0x2e2   : > { %8985 = vst [vmem:[#allocation36_spill] sm:$0xff] %v8117_v43  ;;  %8986 = vst [vmem:[#allocation37_spill] sm:$0xff] %v8121_v19  ;;  %v2189_v43 = vld [vmem:[#allocation8 + $0x88] sm:$0xff] }
 0x2e5   : > { %4858 = vperm.xlu1 %6634, %v7937_v23   ;;  %4723 = vperm.xlu0 %6633, %v7939_v55   ;;  %v8123_v23 = vpop.permute.xlu1 %2979  ;;  %v8127_v55 = vpop.permute.xlu0 %2984 }
 0x2e6   : > { %8987 = vst [vmem:[#allocation38_spill] sm:$0xff] %v8123_v23  ;;  %8988 = vst [vmem:[#allocation39_spill] sm:$0xff] %v8127_v55  ;;  %v8176_v55 = vstv %s6473_s20 }
 0x2e9   : > { %4868 = vperm.xlu1 %6634, %v7946_v26   ;;  %4863 = vperm.xlu0 %6633, %v7948_v42   ;;  %v8131_v26 = vpop.permute.xlu1 %2989  ;;  %v8135_v42 = vpop.permute.xlu0 %2994 }
 0x2ea   : > { %8989 = vst [vmem:[#allocation40_spill] sm:$0xff] %v8131_v26  ;;  %8990 = vst [vmem:[#allocation41_spill] sm:$0xff] %v8135_v42 }
 0x2ed   : > { %4878 = vperm.xlu1 %6634, %v7955_v33   ;;  %4873 = vperm.xlu0 %6633, %v7957_v2   ;;  %v8137_v33 = vpop.permute.xlu1 %3129  ;;  %v8141_v2 = vpop.permute.xlu0 %3134 }
 0x2ee   : > { %8991 = vst [vmem:[#allocation42_spill] sm:$0xff] %v8137_v33  ;;  %8992 = vst [vmem:[#allocation43_spill] sm:$0xff] %v8141_v2  ;;  %v2191_v33 = vld [vmem:[#allocation8 + $0x98] sm:$0xff] }
 0x2f1   : > { %4888 = vperm.xlu1 %6634, %v7964_v38   ;;  %4883 = vperm.xlu0 %6633, %v7966_v29   ;;  %v8145_v38 = vpop.permute.xlu1 %3139  ;;  %v5194_v29 = vld [vmem:[#allocation7 + $0x230] sm:$0xff] }
 0x2f2   : > { %8993 = vst [vmem:[#allocation44_spill] sm:$0xff] %v8145_v38  ;;  %v2190_v38 = vld [vmem:[#allocation8 + $0x90] sm:$0xff] }
 0x2f5   : > { %5028 = vperm.xlu1 %6634, %v7973_v3   ;;  %4893 = vperm.xlu0 %6633, %v7975_v13   ;;  %v8149_v3 = vpop.permute.xlu0 %3144  ;;  %v8151_v13 = vpop.permute.xlu1 %3149 }
 0x2f6   : > { %8994 = vst [vmem:[#allocation45_spill] sm:$0xff] %v8149_v3  ;;  %8995 = vst [vmem:[#allocation46_spill] sm:$0xff] %v8151_v13  ;;  %v2188_v3 = vld [vmem:[#allocation8 + $0x80] sm:$0xff] }
 0x2f9   : > { %5038 = vperm.xlu1 %6634, %v7982_v47   ;;  %5033 = vperm.xlu0 %6633, %v7984_v35   ;;  %v8154_v47 = vpop.permute.xlu0 %3154 }
 0x2fa   : > { %8996 = vst [vmem:[#allocation47_spill] sm:$0xff] %v8154_v47 }
 0x2fd   : > { %5048 = vperm.xlu1 %6634, %v7991_v27   ;;  %5043 = vperm.xlu0 %6633, %v7993_v1  }
 0x301   : > { %5058 = vperm.xlu1 %6634, %v7999_v15   ;;  %5053 = vperm.xlu0 %6633, %v8001_v62   ;;  %v8161_v62 = vstv %s6467_s1 }
 0x305   : > { %5198 = vperm.xlu1 %6634, %v8006_v12   ;;  %5063 = vperm.xlu0 %6633, %v8008_v21   ;;  %v8163_v12 = vstv %s6469_s2  ;;  %v2139_v21 = vld [vmem:[#allocation8 + $0x10] sm:$0xff] }
 0x309   : > { %5208 = vperm.xlu1 %6634, %v8012_v49   ;;  %5203 = vperm.xlu0 %6633, %v8014_v25   ;;  %v2160_v49 = vld [vmem:[#allocation8 + $0x50] sm:$0xff]  ;;  %v2137_v25 = vld [vmem:[#allocation8] sm:$0xff] }
 0x30a   : > { %v2173_v6 = vmul.f32 %v8163_v12, %v2160_v49  ;;  %v2149_v47 = vmul.f32 %v8161_v62, %v2137_v25  ;;  %v2172_v49 = vmul.f32 %v8163_v12, %v2159_v45  ;;  %v2220_v25 = vld [vmem:[#allocation8 + $0xd0] sm:$0xff]  ;;  %v2231_v45 = vmul.f32 %v8176_v55, %v2218_v36  ;;  %v2141_v36 = vld [vmem:[#allocation8 + $0x20] sm:$0xff] }
 0x30d   : > { %5218 = vperm.xlu1 %6634, %v8018_v14   ;;  %5213 = vperm.xlu0 %6633, %v8020_v16   ;;  %v2158_v14 = vld [vmem:[#allocation8 + $0x40] sm:$0xff]  ;;  %v2140_v16 = vld [vmem:[#allocation8 + $0x18] sm:$0xff] }
 0x30e   : > { %v2171_v13 = vmul.f32 %v8163_v12, %v2158_v14  ;;  %v2152_v26 = vmul.f32 %v8161_v62, %v2140_v16 }
 0x310   : > { %v2179_v19 = vadd.f32 %v2171_v13, %v2149_v47 }
 0x311   : > { %5228 = vperm.xlu1 %6634, %v5194_v29   ;;  %5223 = vperm.xlu0 %6633, %v8024_v51   ;;  %v2161_v51 = vld [vmem:[#allocation8 + $0x58] sm:$0xff]  ;;  %v8167_v29 = vstv %s6471_s25 }
 0x312   : > { %v2174_v2 = vmul.f32 %v8163_v12, %v2161_v51  ;;  %v2203_v23 = vmul.f32 %v8167_v29, %v2190_v38  ;;  %v2201_v14 = vmul.f32 %v8167_v29, %v2188_v3  ;;  %v2204_v16 = vmul.f32 %v8167_v29, %v2191_v33  ;;  %v2221_v51 = vld [vmem:[#allocation8 + $0xd8] sm:$0xff] }
 0x313   : > { %v2234_v13 = vmul.f32 %v8176_v55, %v2221_v51 }
 0x314   : > { %v2182_v37 = vadd.f32 %v2174_v2, %v2152_v26  ;;  %v2209_v38 = vadd.f32 %v2201_v14, %v2179_v19 }
 0x315   : > { %5233 = vperm.xlu0 %6633, %v8028_v58   ;;  %v2151_v58 = vmul.f32 %v8161_v62, %v2139_v21  ;;  %v2150_v21 = vmul.f32 %v8161_v62, %v2138_v11  ;;  %v2202_v11 = vmul.f32 %v8167_v29, %v2189_v43  ;;  %v2143_v43 = vld [vmem:[#allocation8 + $0x30] sm:$0xff] }
 0x316   : > { %v2212_v31 = vadd.f32 %v2204_v16, %v2182_v37  ;;  %v2239_v33 = vadd.f32 %v2231_v45, %v2209_v38  ;;  %v2162_v37 = vld [vmem:[#allocation8 + $0x60] sm:$0xff]  ;;  %v2153_v45 = vmul.f32 %v8161_v62, %v2141_v36 }
 0x317   : > { %v2181_v42 = vadd.f32 %v2173_v6, %v2151_v58  ;;  %v2180_v63 = vadd.f32 %v2172_v49, %v2150_v21  ;;  %v2233_v58 = vmul.f32 %v8176_v55, %v2220_v25  ;;  %v2219_v6 = vld [vmem:[#allocation8 + $0xc8] sm:$0xff] }
 0x318   : > { %v2232_v3 = vmul.f32 %v8176_v55, %v2219_v6  ;;  %v2242_v49 = vadd.f32 %v2234_v13, %v2212_v31  ;;  %v2165_v6 = vld [vmem:[#allocation8 + $0x78] sm:$0xff]  ;;  %v2142_v13 = vld [vmem:[#allocation8 + $0x28] sm:$0xff] }
 0x319   : > { %v2211_v30 = vadd.f32 %v2203_v23, %v2181_v42  ;;  %v2210_v47 = vadd.f32 %v2202_v11, %v2180_v63  ;;  %v2164_v23 = vld [vmem:[#allocation8 + $0x70] sm:$0xff] }
 0x31a   : > { %v8185_v42 = vld [vmem:[#allocation11] ss:$0 sm:$0xff]  ;;  %v2177_v31 = vmul.f32 %v8163_v12, %v2164_v23  ;;  %v2154_v23 = vmul.f32 %v8161_v62, %v2142_v13 }
 0x31b   : > { %v2241_v26 = vadd.f32 %v2233_v58, %v2211_v30  ;;  %v2240_v14 = vadd.f32 %v2232_v3, %v2210_v47  ;;  %v2144_v58 = vld [vmem:[#allocation8 + $0x38] sm:$0xff]  ;;  %v2194_v3 = vld [vmem:[#allocation8 + $0xb0] sm:$0xff] }
 0x31d   : > { %v5988_v35 = vpop.f32.mrb[0].mxu1 }
 0x31e   : > { %v1241_v27 = vpop.f32.mrb[1].mxu1 }
 0x31f   : > { %v8157_v1 = vpop.f32.mrb[2].mxu1 }
 0x320   : > { %v8159_v15 = vpop.f32.mrb[3].mxu1 }
 0x335   : > { %v6048_v2 = vpop.f32.mrb[0].mxu0 }
 0x336   : > { %v6274_v24 = vadd.f32 %v6048_v2, %v5988_v35  ;;  %v2096_v21 = vpop.f32.mrb[1].mxu0  ;;  %v2155_v35 = vmul.f32 %v8161_v62, %v2143_v43  ;;  %v2195_v43 = vld [vmem:[#allocation8 + $0xb8] sm:$0xff] }
 0x337   : > { %v6275_v25 = vadd.f32 %v2096_v21, %v1241_v27  ;;  %v6049_v19 = vpop.f32.mrb[2].mxu0  ;;  %v2178_v21 = vmul.f32 %v8163_v12, %v2165_v6 }
 0x338   : > { %v2249_v16 = vadd.f32 %v6274_v24, %v2241_v26  ;;  %v6276_v63 = vadd.f32 %v6049_v19, %v8157_v1  ;;  %v2099_v51 = vpop.f32.mrb[3].mxu0  ;;  %v2175_v24 = vmul.f32 %v8163_v12, %v2162_v37  ;;  %v2163_v1 = vld [vmem:[#allocation8 + $0x68] sm:$0xff]  ;;  %v2192_v26 = vld [vmem:[#allocation8 + $0xa0] sm:$0xff]  ;;  %v2185_v19 = vadd.f32 %v2177_v31, %v2155_v35 }
 0x339   : > { %v2247_v11 = vadd.f32 %v6275_v25, %v2239_v33  ;;  %v6277_v30 = vadd.f32 %v2099_v51, %v8159_v15  ;;  %v2156_v33 = vmul.f32 %v8161_v62, %v2144_v58  ;;  %v2176_v25 = vmul.f32 %v8163_v12, %v2163_v1  ;;  %v2222_v51 = vld [vmem:[#allocation8 + $0xe0] sm:$0xff]  ;;  %v2225_v12 = vld [vmem:[#allocation8 + $0xf8] sm:$0xff]  ;;  %v2223_v1 = vld [vmem:[#allocation8 + $0xe8] sm:$0xff] }
 0x33a   : > { %v8192_v38 = vadd.f32 %v8185_v42, %v2249_v16  ;;  %v2250_v27 = vadd.f32 %v6276_v63, %v2242_v49  ;;  %v2183_v36 = vadd.f32 %v2175_v24, %v2153_v45  ;;  %v2205_v37 = vmul.f32 %v8167_v29, %v2192_v26  ;;  %v2193_v16 = vld [vmem:[#allocation8 + $0xa8] sm:$0xff]  ;;  %v2224_v63 = vld [vmem:[#allocation8 + $0xf0] sm:$0xff] }
 0x33b   : > { %v8197_v47 = vadd.f32 %v8185_v42, %v2247_v11  ;;  %v2248_v15 = vadd.f32 %v6277_v30, %v2240_v14  ;;  %v2207_v14 = vmul.f32 %v8167_v29, %v2194_v3  ;;  %v2186_v11 = vadd.f32 %v2178_v21, %v2156_v33  ;;  %v8221_v35 = vld [vmem:[#allocation2 + $0x8] sm:$0xff] }
 0x33c   : > { %8997 = vst [vmem:[#allocation48_spill] sm:$0xff] %v8192_v38  ;;  %2272 = vst.msk [vmem:[#allocation2 + $0x20] sm:$0xff] %vm585_vm0, %v8192_v38  ;;  %v8202_v2 = vadd.f32 %v8185_v42, %v2250_v27  ;;  %v2208_v62 = vmul.f32 %v8167_v29, %v2195_v43  ;;  %v2184_v58 = vadd.f32 %v2176_v25, %v2154_v23 }
 0x33d   : > { %8998 = vst [vmem:[#allocation49_spill] sm:$0xff] %v8197_v47  ;;  %2270 = vst.msk [vmem:[#allocation2 + $0x10] sm:$0xff] %vm585_vm0, %v8197_v47  ;;  %v8209_v49 = vadd.f32 %v8185_v42, %v2248_v15  ;;  %v2206_v6 = vmul.f32 %v8167_v29, %v2193_v16  ;;  %v2215_v27 = vadd.f32 %v2207_v14, %v2185_v19 }
 0x33e   : > { %8999 = vst [vmem:[#allocation50_spill] sm:$0xff] %v8202_v2  ;;  %2273 = vst.msk [vmem:[#allocation2 + $0x28] sm:$0xff] %vm585_vm0, %v8202_v2  ;;  %v2237_v45 = vmul.f32 %v8176_v55, %v2224_v63  ;;  %v2213_v24 = vadd.f32 %v2205_v37, %v2183_v36  ;;  %v2235_v13 = vmul.f32 %v8176_v55, %v2222_v51 }
 0x33f   : > { %9000 = vst [vmem:[#allocation51_spill] sm:$0xff] %v8209_v49  ;;  %2271 = vst.msk [vmem:[#allocation2 + $0x18] sm:$0xff] %vm585_vm0, %v8209_v49  ;;  %v2216_v26 = vadd.f32 %v2208_v62, %v2186_v11  ;;  %v2238_v33 = vmul.f32 %v8176_v55, %v2225_v12  ;;  %v2406_v29 = vmul.f32 %v8031_v22, %v8221_v35 }
 0x340   : > { %v2214_v25 = vadd.f32 %v2206_v6, %v2184_v58  ;;  %v2236_v19 = vmul.f32 %v8176_v55, %v2223_v1  ;;  %v2245_v37 = vadd.f32 %v2237_v45, %v2215_v27  ;;  %v2243_v63 = vadd.f32 %v2235_v13, %v2213_v24  ;;  %v6656_v24 = vld [vmem:[#allocation13 + $0x8] sm:$0xff]  }
 0x341   : > { %v6004_v30 = vpop.f32.mrb[4].mxu1  ;;  %v2246_v6 = vadd.f32 %v2238_v33, %v2216_v26 }
 0x342   : > { %v1428_v31 = vpop.f32.mrb[5].mxu1  ;;  %v2244_v27 = vadd.f32 %v2236_v19, %v2214_v25 }
 0x343   : > { %v6005_v15 = vpop.f32.mrb[6].mxu1  ;;  %v8228_v43 = vld [vmem:[#allocation2 + $0x20] sm:$0xff] }
 0x344   : > { %v1431_v3 = vpop.f32.mrb[7].mxu1  ;;  %v8226_v21 = vld [vmem:[#allocation2 + $0x10] sm:$0xff]  ;;  %v2409_v22 = vmul.f32 %v8037_v5, %v8228_v43 }
 0x345   : > { %v6052_v23 = vpop.f32.mrb[4].mxu0  ;;  %v2407_v14 = vmul.f32 %v8033_v60, %v8226_v21  ;;  %v8266_v26 = vld [vmem:[#allocation2 + $0xf] sm:$0xff] }
 0x346   : > { %v6278_v36 = vadd.f32 %v6052_v23, %v6004_v30  ;;  %v2112_v16 = vpop.f32.mrb[5].mxu0  ;;  %v8235_v51 = vld [vmem:[#allocation2 + $0x18] sm:$0xff]  ;;  %v2335_v19 = vmul.f32 %v8049_v56, %v8266_v26 }
 0x347   : > { %v6279_v11 = vadd.f32 %v2112_v16, %v1428_v31  ;;  %v6053_v62 = vpop.f32.mrb[6].mxu0  ;;  %v2414_v12 = vpack.c.bf16 %v2407_v14, %v2406_v29  ;;  %v2408_v49 = vmul.f32 %v8035_v54, %v8235_v51  ;;  %v6694_v16 = vld [vmem:[#allocation2 + $0x7] sm:$0xff] }
 0x348   : > { %v2253_v58 = vadd.f32 %v6278_v36, %v2245_v37  ;;  %v6280_v55 = vadd.f32 %v6053_v62, %v6005_v15  ;;  %v2115_v1 = vpop.f32.mrb[7].mxu0  ;;  %v6657_v15 = vld [vmem:[#allocation13 + $0x20] sm:$0xff]   ;;  %v8288_v62 = vld [vmem:[#allocation2 + $0x1f] sm:$0xff] }
 0x349   : > { %v2251_v60 = vadd.f32 %v6279_v11, %v2243_v63  ;;  %v6281_v30 = vadd.f32 %v2115_v1, %v1431_v3  ;;  %6058 = vmatprep.mubr.msk.bf16.mxu1 %vm585_vm0, %v2414_v12  ;;  %v2415_v45 = vpack.c.bf16 %v2409_v22, %v2408_v49  ;;  %v8264_v3 = vld [vmem:[#allocation2 + $0x28] sm:$0xff]  ;;  %v2334_v63 = vmul.f32 %v6694_v16, %v8047_v50 }
 0x34a   : > { %v8243_v31 = vadd.f32 %v8185_v42, %v2253_v58  ;;  %v2254_v13 = vadd.f32 %v6280_v55, %v2246_v6  ;;  %v8298_v50 = vld [vmem:[#allocation2 + $0x27] sm:$0xff]  ;;  %v6658_v55 = vld [vmem:[#allocation13 + $0x28] sm:$0xff]  }
 0x34b   : > { %v8246_v54 = vadd.f32 %v8185_v42, %v2251_v60  ;;  %v2252_v29 = vadd.f32 %v6281_v30, %v2244_v27  ;;  %6059 = vmatmul.mubr.msk.bf16.vlgmr.msra.gmra.mrb[8].mxu1 %vm585_vm0, %v2415_v45  ;;  %v2342_v11 = vpack.c.bf16 %v2335_v19, %v2334_v63  ;;  %v2338_v22 = vmul.f32 %v8055_v40, %v8298_v50  ;;  %v6659_v30 = vld [vmem:[#allocation13 + $0x30] sm:$0xff]  }
 0x34c   : > { %9001 = vst [vmem:[#allocation52_spill] sm:$0xff] %v8243_v31  ;;  %2276 = vst.msk [vmem:[#allocation2 + $0x40] sm:$0xff] %vm585_vm0, %v8243_v31  ;;  %v8252_v5 = vadd.f32 %v8185_v42, %v2254_v13  ;;  %6067 = vmatpush3.bf16.msra.mxu1 %v8077_v10  ;;  %v2827_v63 = vmul.f32 %v8082_v0, %v8266_v26  ;;  %v6662_v26 = vld [vmem:[#allocation13 + $0x48] sm:$0xff]   ;;  %v5721_v31 = vld [vmem:[#allocation16] ss:$0 sm:$0xff] }
 0x34d   : > { %9002 = vst [vmem:[#allocation53_spill] sm:$0xff] %v8246_v54  ;;  %2274 = vst.msk [vmem:[#allocation2 + $0x30] sm:$0xff] %vm585_vm0, %v8246_v54  ;;  %v8258_v49 = vadd.f32 %v8185_v42, %v2252_v29  ;;  %6068 = vmatprep.subr.bf16.mxu1 %v6656_v24  ;;  %v2410_v42 = vmul.f32 %v8039_v7, %v8264_v3  ;;  %v8319_v29 = vld [vmem:[#allocation2 + $0x19] sm:$0xff] }
 0x34e   : > { %9003 = vst [vmem:[#allocation54_spill] sm:$0xff] %v8252_v5  ;;  %2277 = vst.msk [vmem:[#allocation2 + $0x48] sm:$0xff] %vm585_vm0, %v8252_v5  ;;  %v5720_v5 = vld [vmem:[#allocation14] ss:$0 sm:$0xff] }
 0x34f   : > { %9004 = vst [vmem:[#allocation55_spill] sm:$0xff] %v8258_v49  ;;  %2275 = vst.msk [vmem:[#allocation2 + $0x38] sm:$0xff] %vm585_vm0, %v8258_v49 }
 0x350   : > { %6069 = vmatpush3.bf16.msra.mxu1 %v6656_v24 }
 0x351   : > { %6078 = vmatprep.subr.bf16.mxu1 %v6657_v15 }
 0x353   : > { %v8270_v33 = vld [vmem:[#allocation2 + $0x40] sm:$0xff] }
 0x354   : > { %v8268_v10 = vld [vmem:[#allocation2 + $0x30] sm:$0xff]  ;;  %v2413_v37 = vmul.f32 %v8045_v8, %v8270_v33  ;;  %v2337_v8 = vmul.f32 %v8053_v17, %v8288_v62 }
 0x355   : > { %v2411_v23 = vmul.f32 %v8041_v48, %v8268_v10  ;;  %v8286_v48 = vld [vmem:[#allocation2 + $0x17] sm:$0xff]  ;;  %v8291_v56 = vld [vmem:[#allocation2 + $0x2f] sm:$0xff]  ;;  %v8339_v16 = vld [vmem:[#allocation2 + $0x41] sm:$0xff] }
 0x356   : > { %v8276_v25 = vld [vmem:[#allocation2 + $0x38] sm:$0xff]  ;;  %v2339_v12 = vmul.f32 %v8057_v57, %v8291_v56  ;;  %v2601_v57 = vld [vmem:[#allocation2 + $0x9] sm:$0xff] }
 0x357   : > { %v2416_v14 = vpack.c.bf16 %v2411_v23, %v2410_v42  ;;  %v2412_v36 = vmul.f32 %v8043_v46, %v8276_v25  ;;  %v2336_v46 = vmul.f32 %v8051_v52, %v8286_v48  ;;  %v8304_v1 = vld [vmem:[#allocation2 + $0x37] sm:$0xff]  ;;  %v8306_v60 = vld [vmem:[#allocation2 + $0x3f] sm:$0xff]  ;;  %v2657_v45 = vmul.f32 %v8063_v59, %v2601_v57  ;;  %v8331_v59 = vld [vmem:[#allocation2 + $0x29] sm:$0xff] }
 0x358   : > { %v2344_v6 = vpack.c.bf16 %v2339_v12, %v2338_v22  ;;  %v8309_v52 = vld [vmem:[#allocation2 + $0x11] sm:$0xff]  ;;  %v2340_v17 = vmul.f32 %v8059_v32, %v8304_v1  ;;  %v2341_v40 = vmul.f32 %v8061_v44, %v8306_v60  ;;  %v2659_v44 = vmul.f32 %v8067_v53, %v8319_v29 }
 0x359   : > { %6062 = vmatprep.mubr.msk.bf16.mxu1 %vm585_vm0, %v2416_v14  ;;  %v2417_v7 = vpack.c.bf16 %v2413_v37, %v2412_v36  ;;  %v2343_v58 = vpack.c.bf16 %v2337_v8, %v2336_v46  ;;  %v2658_v27 = vmul.f32 %v8065_v34, %v8309_v52  ;;  %v8324_v32 = vld [vmem:[#allocation2 + $0x31] sm:$0xff]  ;;  %v2661_v23 = vmul.f32 %v8071_v9, %v8331_v59  ;;  %v8337_v37 = vld [vmem:[#allocation2 + $0x39] sm:$0xff]  ;;  %v9005_v46 = vld [vmem:[#allocation31_spill] sm:$0xff] }
 0x35a   : > { %v2345_v24 = vpack.c.bf16 %v2341_v40, %v2340_v17  ;;  %v2662_v42 = vmul.f32 %v8073_v41, %v8324_v32  ;;  %v6660_v14 = vld [vmem:[#allocation13 + $0x38] sm:$0xff]   ;;  %v2663_v53 = vmul.f32 %v8075_v39, %v8337_v37  ;;  %v6661_v9 = vld [vmem:[#allocation13 + $0x40] sm:$0xff]   ;;  %v2828_v41 = vmul.f32 %v8085_v18, %v8286_v48  ;;  %v9006_v8 = vld [vmem:[#allocation30_spill] sm:$0xff] }
 0x35b   : > { %6063 = vmatmul.mubr.msk.bf16.gmra.mrb[12].mxu1 %vm585_vm0, %v2417_v7  ;;  %v2665_v13 = vpack.c.bf16 %v2658_v27, %v2657_v45  ;;  %v2829_v39 = vmul.f32 %v8089_v20, %v8288_v62  ;;  %v2832_v18 = vmul.f32 %v9005_v46, %v8304_v1  ;;  %v2831_v12 = vmul.f32 %v9006_v8, %v8291_v56  ;;  %v9007_v20 = vld [vmem:[#allocation32_spill] sm:$0xff]  ;;  %v6663_v17 = vld [vmem:[#allocation13 + $0x50] sm:$0xff]   ;;  %v6665_v46 = vld [vmem:[#allocation13 + $0x60] sm:$0xff]  }
 0x35c   : > { %6070 = vmatprep.mubr.msk.bf16.mxu1 %vm585_vm0, %v2342_v11  ;;  %v2667_v36 = vpack.c.bf16 %v2662_v42, %v2661_v23  ;;  %v2835_v11 = vpack.c.bf16 %v2828_v41, %v2827_v63  ;;  %v9009_v40 = vld [vmem:[#allocation35_spill] sm:$0xff]  ;;  %v6664_v63 = vld [vmem:[#allocation13 + $0x58] sm:$0xff]  }
 0x35d   : > { %v2837_v22 = vpack.c.bf16 %v2832_v18, %v2831_v12  ;;  %v2998_v57 = vmul.f32 %v9009_v40, %v8235_v51  ;;  %v9012_v23 = vld [vmem:[#allocation39_spill] sm:$0xff]  ;;  %v9016_v18 = vld [vmem:[#allocation42_spill] sm:$0xff] }
 0x35e   : > { %v3167_v8 = vmul.f32 %v9016_v18, %v8309_v52  ;;  %v9017_v12 = vld [vmem:[#allocation43_spill] sm:$0xff]  ;;  %v9019_v52 = vld [vmem:[#allocation45_spill] sm:$0xff] }
 0x363   : > { %6071 = vmatmul.mubr.msk.bf16.vlgmr.msra.gmra.mrb[8].mxu1 %vm585_vm0, %v2343_v58  ;;  %v8361_v58 = vld [vmem:[#allocation2 + $0x47] sm:$0xff] }
 0x364   : > { %6079 = vmatpush3.bf16.msra.mxu1 %v6657_v15  ;;  %6074 = vmatprep.mubr.msk.bf16.mxu1 %vm585_vm0, %v2344_v6  ;;  %v8321_v15 = vld [vmem:[#allocation2 + $0x21] sm:$0xff] }
 0x365   : > { %6080 = vmatprep.subr.bf16.mxu1 %v6658_v55  ;;  %v2660_v34 = vmul.f32 %v8069_v61, %v8321_v15  ;;  %v2664_v61 = vmul.f32 %v8079_v4, %v8339_v16  ;;  %v2830_v4 = vmul.f32 %v8093_v28, %v8298_v50  ;;  %v2833_v28 = vmul.f32 %v9007_v20, %v8306_v60  ;;  %v9018_v20 = vld [vmem:[#allocation40_spill] sm:$0xff] }
 0x367   : > { %v2666_v19 = vpack.c.bf16 %v2660_v34, %v2659_v44  ;;  %v2668_v7 = vpack.c.bf16 %v2664_v61, %v2663_v53  ;;  %v2836_v0 = vpack.c.bf16 %v2830_v4, %v2829_v39  ;;  %v3165_v44 = vpop.permute.xlu0 %3164  ;;  %v9011_v34 = vld [vmem:[#allocation37_spill] sm:$0xff] }
 0x368   : > { %6081 = vmatpush3.bf16.msra.mxu1 %v6658_v55  ;;  %v9008_v55 = vld [vmem:[#allocation33_spill] sm:$0xff]  ;;  %v3000_v42 = vmul.f32 %v9011_v34, %v8264_v3  ;;  %v9022_v34 = vld [vmem:[#allocation44_spill] sm:$0xff] }
 0x369   : > { %6090 = vmatprep.subr.bf16.mxu1 %v6659_v30  ;;  %v2834_v6 = vmul.f32 %v9008_v55, %v8361_v58  ;;  %v9015_v39 = vld [vmem:[#allocation41_spill] sm:$0xff] }
 0x36b   : > { %6075 = vmatmul.mubr.msk.bf16.gmra.mrb[12].mxu1 %vm585_vm0, %v2345_v24  ;;  %v2838_v45 = vpack.c.bf16 %v2834_v6, %v2833_v28  ;;  %v3003_v28 = vmul.f32 %v9018_v20, %v8270_v33 }
 0x36c   : > { %6082 = vmatprep.mubr.msk.bf16.mxu1 %vm585_vm0, %v2665_v13  ;;  %v3160_v13 = vpop.permute.xlu1 %3159 }
 0x370   : > { %v3300_v61 = vpop.permute.xlu1 %3299 }
 0x373   : > { %6083 = vmatmul.mubr.msk.bf16.vlgmr.msra.gmra.mrb[8].mxu1 %vm585_vm0, %v2666_v19  ;;  %v3002_v19 = vmul.f32 %v9012_v23, %v8276_v25 }
 0x374   : > { %6091 = vmatpush3.bf16.msra.mxu1 %v6659_v30  ;;  %6086 = vmatprep.mubr.msk.bf16.mxu1 %vm585_vm0, %v2667_v36  ;;  %v9010_v30 = vld [vmem:[#allocation34_spill] sm:$0xff] }
 0x375   : > { %6092 = vmatprep.subr.bf16.mxu1 %v6660_v14  ;;  %v2997_v27 = vmul.f32 %v9010_v30, %v8226_v21  ;;  %v9014_v21 = vld [vmem:[#allocation38_spill] sm:$0xff] }
 0x376   : > { %v3001_v53 = vmul.f32 %v9014_v21, %v8268_v10  ;;  %v9020_v30 = vld [vmem:[#allocation46_spill] sm:$0xff] }
 0x377   : > { %v3005_v24 = vpack.c.bf16 %v2998_v57, %v2997_v27  ;;  %v3170_v57 = vmul.f32 %v9019_v52, %v8331_v59  ;;  %v3171_v27 = vmul.f32 %v9020_v30, %v8324_v32 }
 0x378   : > { %6093 = vmatpush3.bf16.msra.mxu1 %v6660_v14  ;;  %v9013_v14 = vld [vmem:[#allocation36_spill] sm:$0xff] }
 0x379   : > { %6102 = vmatprep.subr.bf16.mxu1 %v6661_v9  ;;  %v2999_v36 = vmul.f32 %v9013_v14, %v8228_v43 }
 0x37b   : > { %6087 = vmatmul.mubr.msk.bf16.gmra.mrb[12].mxu1 %vm585_vm0, %v2668_v7  ;;  %v3006_v41 = vpack.c.bf16 %v3000_v42, %v2999_v36  ;;  %v3007_v7 = vpack.c.bf16 %v3002_v19, %v3001_v53  ;;  %v3169_v42 = vmul.f32 %v9022_v34, %v8321_v15  ;;  %v6666_v19 = vld [vmem:[#allocation13 + $0x68] sm:$0xff]   ;;  %v8405_v36 = vld [vmem:[#allocation2 + $0x49] sm:$0xff] }
 0x37c   : > { %6094 = vmatprep.mubr.msk.bf16.mxu1 %vm585_vm0, %v2835_v11  ;;  %v8383_v11 = vld [vmem:[#allocation2 + $0x48] sm:$0xff]  ;;  %v6670_v34 = vld [vmem:[#allocation13 + $0x88] sm:$0xff]  }
 0x37d   : > { %v3004_v4 = vmul.f32 %v9015_v39, %v8383_v11  ;;  %v3176_v23 = vpack.c.bf16 %v3170_v57, %v3169_v42  ;;  %v3337_v39 = vmul.f32 %v3300_v61, %v8286_v48 }
 0x37f   : > { %v3008_v55 = vpack.c.bf16 %v3004_v4, %v3003_v28 }
 0x383   : > { %6095 = vmatmul.mubr.msk.bf16.vlgmr.msra.gmra.mrb[8].mxu1 %vm585_vm0, %v2836_v0  ;;  %v3168_v0 = vmul.f32 %v9017_v12, %v8319_v29 }
 0x384   : > { %6103 = vmatpush3.bf16.msra.mxu1 %v6661_v9  ;;  %6098 = vmatprep.mubr.msk.bf16.mxu1 %vm585_vm0, %v2837_v22  ;;  %v3305_v9 = vpop.permute.xlu0 %3304 }
 0x385   : > { %6104 = vmatprep.subr.bf16.mxu1 %v6662_v26  ;;  %v3175_v6 = vpack.c.bf16 %v3168_v0, %v3167_v8  ;;  %v3338_v4 = vmul.f32 %v3305_v9, %v8288_v62  ;;  %v6668_v9 = vld [vmem:[#allocation13 + $0x78] sm:$0xff]  }
 0x387   : > { %v3345_v0 = vpack.c.bf16 %v3338_v4, %v3337_v39 }
 0x388   : > { %6105 = vmatpush3.bf16.msra.mxu1 %v6662_v26  ;;  %v3310_v26 = vpop.permute.xlu1 %3309  ;;  %v3315_v22 = vpop.permute.xlu0 %3314 }
 0x389   : > { %6114 = vmatprep.subr.bf16.mxu1 %v6663_v17  ;;  %v3339_v62 = vmul.f32 %v3310_v26, %v8298_v50 }
 0x38b   : > { %6099 = vmatmul.mubr.msk.bf16.gmra.mrb[12].mxu1 %vm585_vm0, %v2838_v45  ;;  %v9021_v45 = vld [vmem:[#allocation47_spill] sm:$0xff] }
 0x38c   : > { %6106 = vmatprep.mubr.msk.bf16.mxu1 %vm585_vm0, %v3005_v24  ;;  %v3325_v40 = vpop.permute.xlu0 %3324  ;;  %v3172_v24 = vmul.f32 %v9021_v45, %v8337_v37 }
 0x38e   : > { %v3177_v14 = vpack.c.bf16 %v3172_v24, %v3171_v27 }
 0x390   : > { %v3335_v53 = vpop.permute.xlu0 %3334 }
 0x393   : > { %6107 = vmatmul.mubr.msk.bf16.vlgmr.msra.gmra.mrb[8].mxu1 %vm585_vm0, %v3006_v41  ;;  %v3173_v41 = vmul.f32 %v3160_v13, %v8339_v16 }
 0x394   : > { %6115 = vmatpush3.bf16.msra.mxu1 %v6663_v17  ;;  %6110 = vmatprep.mubr.msk.bf16.mxu1 %vm585_vm0, %v3007_v7  ;;  %v3320_v17 = vpop.permute.xlu1 %3319  ;;  %v6667_v7 = vld [vmem:[#allocation13 + $0x70] sm:$0xff]   ;;  %v3475_v8 = vpop.permute.xlu0 %3474 }
 0x395   : > { %6116 = vmatprep.subr.bf16.mxu1 %v6664_v63  ;;  %v3341_v13 = vmul.f32 %v3320_v17, %v8304_v1  ;;  %v3508_v50 = vmul.f32 %v3475_v8, %v8228_v43 }
 0x398   : > { %6117 = vmatpush3.bf16.msra.mxu1 %v6664_v63  ;;  %v3330_v21 = vpop.permute.xlu1 %3329  ;;  %v3174_v63 = vmul.f32 %v3165_v44, %v8405_v36  ;;  %v3342_v44 = vmul.f32 %v3325_v40, %v8306_v60  ;;  %v3485_v48 = vpop.permute.xlu0 %3484  ;;  %v6669_v60 = vld [vmem:[#allocation13 + $0x80] sm:$0xff]  }
 0x399   : > { %6126 = vmatprep.subr.bf16.mxu1 %v6665_v46  ;;  %v3510_v30 = vmul.f32 %v3485_v48, %v8268_v10 }
 0x39a   : > { %v3178_v12 = vpack.c.bf16 %v3174_v63, %v3173_v41  ;;  %v3347_v28 = vpack.c.bf16 %v3342_v44, %v3341_v13 }
 0x39b   : > { %6111 = vmatmul.mubr.msk.bf16.gmra.mrb[12].mxu1 %vm585_vm0, %v3008_v55  ;;  %v3288_v55 = vld [vmem:[#allocation2 + $0x4f] sm:$0xff] }
 0x39c   : > { %6118 = vmatprep.mubr.msk.bf16.mxu1 %vm585_vm0, %v3175_v6  ;;  %v3470_v18 = vpop.permute.xlu1 %3469  ;;  %v3495_v52 = vpop.permute.xlu0 %3494  ;;  %v3344_v1 = vmul.f32 %v3335_v53, %v3288_v55 }
 0x3a0   : > { %v3480_v20 = vpop.permute.xlu1 %3479  ;;  %v3505_v57 = vpop.permute.xlu0 %3504 }
 0x3a1   : > { %v3509_v27 = vmul.f32 %v3480_v20, %v8264_v3  ;;  %v6695_v3 = vld [vmem:[#allocation2 + $0x50] sm:$0xff] }
 0x3a3   : > { %6119 = vmatmul.mubr.msk.bf16.vlgmr.msra.gmra.mrb[8].mxu1 %vm585_vm0, %v3176_v23  ;;  %v3516_v43 = vpack.c.bf16 %v3510_v30, %v3509_v27 }
 0x3a4   : > { %6127 = vmatpush3.bf16.msra.mxu1 %v6665_v46  ;;  %6122 = vmatprep.mubr.msk.bf16.mxu1 %vm585_vm0, %v3177_v14  ;;  %v3340_v46 = vmul.f32 %v3315_v22, %v8291_v56  ;;  %v3490_v6 = vpop.permute.xlu1 %3489  ;;  %v3343_v56 = vmul.f32 %v3330_v21, %v8361_v58  ;;  %v3507_v22 = vmul.f32 %v3470_v18, %v8235_v51  ;;  %v3645_v24 = vpop.permute.xlu0 %3644 }
 0x3a5   : > { %6128 = vmatprep.subr.bf16.mxu1 %v6666_v19  ;;  %v3511_v58 = vmul.f32 %v3490_v6, %v8276_v25  ;;  %v3512_v51 = vmul.f32 %v3495_v52, %v8270_v33  ;;  %v3678_v25 = vmul.f32 %v3645_v24, %v8321_v15 }
 0x3a6   : > { %v3346_v61 = vpack.c.bf16 %v3340_v46, %v3339_v62  ;;  %v3348_v26 = vpack.c.bf16 %v3344_v1, %v3343_v56  ;;  %v3515_v17 = vpack.c.bf16 %v3508_v50, %v3507_v22 }
 0x3a7   : > { %v3517_v42 = vpack.c.bf16 %v3512_v51, %v3511_v58 }
 0x3a8   : > { %6129 = vmatpush3.bf16.msra.mxu1 %v6666_v19  ;;  %v3500_v40 = vpop.permute.xlu1 %3499  ;;  %v3514_v19 = vmul.f32 %v6695_v3, %v3505_v57  ;;  %v3655_v14 = vpop.permute.xlu0 %3654 }
 0x3a9   : > { %6138 = vmatprep.subr.bf16.mxu1 %v6667_v7  ;;  %v3513_v23 = vmul.f32 %v3500_v40, %v8383_v11  ;;  %v8485_v40 = vld [vmem:[#allocation17] sm:$0xff]  }
 0x3ab   : > { %6123 = vmatmul.mubr.msk.bf16.gmra.mrb[12].mxu1 %vm585_vm0, %v3178_v12  ;;  %v3518_v21 = vpack.c.bf16 %v3514_v19, %v3513_v23 }
 0x3ac   : > { %6130 = vmatprep.mubr.msk.bf16.mxu1 %vm585_vm0, %v3345_v0  ;;  %v3640_v45 = vpop.permute.xlu1 %3639  ;;  %v3665_v63 = vpop.permute.xlu0 %3664  ;;  %v6696_v0 = vld [vmem:[#allocation2 + $0x51] sm:$0xff] }
 0x3ad   : > { %v3677_v10 = vmul.f32 %v3640_v45, %v8319_v29  ;;  %v3682_v29 = vmul.f32 %v3665_v63, %v8339_v16 }
 0x3af   : > { %v3685_v53 = vpack.c.bf16 %v3678_v25, %v3677_v10 }
 0x3b0   : > { %v3650_v33 = vpop.permute.xlu1 %3649  ;;  %v3675_v8 = vpop.permute.xlu0 %3674 }
 0x3b1   : > { %v3679_v15 = vmul.f32 %v3650_v33, %v8331_v59  ;;  %v3684_v46 = vmul.f32 %v6696_v0, %v3675_v8 }
 0x3b3   : > { %6131 = vmatmul.mubr.msk.bf16.vlgmr.msra.gmra.mrb[8].mxu1 %vm585_vm0, %v3346_v61 }
 0x3b4   : > { %6139 = vmatpush3.bf16.msra.mxu1 %v6667_v7  ;;  %6134 = vmatprep.mubr.msk.bf16.mxu1 %vm585_vm0, %v3347_v28  ;;  %v3660_v41 = vpop.permute.xlu1 %3659  ;;  %v3680_v7 = vmul.f32 %v3655_v14, %v8324_v32 }
 0x3b5   : > { %6140 = vmatprep.subr.bf16.mxu1 %v6668_v9  ;;  %v3681_v11 = vmul.f32 %v3660_v41, %v8337_v37  ;;  %v8447_v37 = vpop.permute.xlu0 %3932 }
 0x3b6   : > { %v3686_v39 = vpack.c.bf16 %v3680_v7, %v3679_v15 }
 0x3b7   : > { %v3687_v4 = vpack.c.bf16 %v3682_v29, %v3681_v11 }
 0x3b8   : > { %6141 = vmatpush3.bf16.msra.mxu1 %v6668_v9  ;;  %v3670_v18 = vpop.permute.xlu1 %3669 }
 0x3b9   : > { %6150 = vmatprep.subr.bf16.mxu1 %v6669_v60  ;;  %v3683_v12 = vmul.f32 %v3670_v18, %v8405_v36  ;;  %v8451_v16 = vpop.permute.xlu0 %3942 }
 0x3bb   : > { %6135 = vmatmul.mubr.msk.bf16.gmra.mrb[12].mxu1 %vm585_vm0, %v3348_v26  ;;  %v3688_v13 = vpack.c.bf16 %v3684_v46, %v3683_v12 }
 0x3bc   : > { %6142 = vmatprep.mubr.msk.bf16.mxu1 %vm585_vm0, %v3515_v17  ;;  %v8445_v32 = vpop.permute.xlu1 %3927  ;;  %v6672_v17 = vld [vmem:[#allocation17 + $0x18] sm:$0xff]  }
 0x3bd   : > { %v8455_v20 = vpop.permute.xlu0 %3952 }
 0x3c0   : > { %v8449_v59 = vpop.permute.xlu1 %3937 }
 0x3c1   : > { %v8459_v36 = vpop.permute.xlu0 %3962 }
 0x3c3   : > { %6143 = vmatmul.mubr.msk.bf16.vlgmr.msra.gmra.mrb[8].mxu1 %vm585_vm0, %v3516_v43 }
 0x3c4   : > { %6151 = vmatpush3.bf16.msra.mxu1 %v6669_v60  ;;  %6146 = vmatprep.mubr.msk.bf16.mxu1 %vm585_vm0, %v3517_v42  ;;  %v8453_v44 = vpop.permute.xlu1 %3947  ;;  %v6671_v60 = vld [vmem:[#allocation17 + $0x10] sm:$0xff]  }
 0x3c5   : > { %6152 = vmatprep.subr.bf16.mxu1 %v6670_v34  ;;  %v8463_v61 = vpop.permute.xlu0 %3860  ;;  %6162 = vmatprep.subr.bf16.mxu0 %v6671_v60 }
 0x3c6   : > { %6163 = vmatpush3.bf16.msra.mxu0 %v6671_v60 }
 0x3c7   : > { %6164 = vmatprep.subr.bf16.mxu0 %v6672_v17 }
 0x3c8   : > { %6153 = vmatpush3.bf16.msra.mxu1 %v6670_v34  ;;  %v8457_v48 = vpop.permute.xlu1 %3957 }
 0x3c9   : > { %v8467_v28 = vpop.permute.xlu0 %3870 }
 0x3ca   : > { %6165 = vmatpush3.bf16.msra.mxu0 %v6672_v17 }
 0x3cb   : > { %6147 = vmatmul.mubr.msk.bf16.gmra.mrb[12].mxu1 %vm585_vm0, %v3518_v21  ;;  %6174 = vmatprep.subr.bf16.mxu0 %v8485_v40 }
 0x3cc   : > { %6154 = vmatprep.mubr.msk.bf16.mxu1 %vm585_vm0, %v3685_v53  ;;  %v8461_v62 = vpop.permute.xlu1 %3855 }
 0x3cd   : > { %v8471_v6 = vpop.permute.xlu0 %3880 }
 0x3d0   : > { %v8465_v9 = vpop.permute.xlu1 %3865 }
 0x3d1   : > { %v8475_v56 = vpop.permute.xlu0 %3890 }
 0x3d3   : > { %6155 = vmatmul.mubr.msk.bf16.vlgmr.msra.gmra.mrb[8].mxu1 %vm585_vm0, %v3686_v39 }
 0x3d4   : > { %6158 = vmatprep.mubr.msk.bf16.mxu1 %vm585_vm0, %v3687_v4  ;;  %v8469_v55 = vpop.permute.xlu1 %3875 }
 0x3d5   : > { %v8479_v22 = vpop.permute.xlu0 %4183 }
 0x3d8   : > { %v8473_v52 = vpop.permute.xlu1 %3885 }
 0x3d9   : > { %v8483_v26 = vpop.permute.xlu0 %4193 }
 0x3db   : > { %6159 = vmatmul.mubr.msk.bf16.gmra.mrb[12].mxu1 %vm585_vm0, %v3688_v13 }
 0x3dc   : > { %v8477_v1 = vpop.permute.xlu1 %4178 }
 0x3dd   : > { %v8490_v30 = vpop.permute.xlu0 %4203 }
 0x3e0   : > { %v8481_v50 = vpop.permute.xlu1 %4188 }
 0x3e1   : > { %v8494_v27 = vpop.permute.xlu0 %4213 }
 0x3e4   : > { %v8487_v57 = vpop.permute.xlu1 %4198 }
 0x3e5   : > { %v8498_v45 = vpop.permute.xlu0 %4353 }
 0x3e8   : > { %v8492_v58 = vpop.permute.xlu1 %4208 }
 0x3e9   : > { %v8502_v43 = vpop.permute.xlu0 %4363 }
 0x3ec   : > { %v8496_v51 = vpop.permute.xlu1 %4348 }
 0x3ed   : > { %v8506_v42 = vpop.permute.xlu0 %4373 }
 0x3f0   : > { %v8500_v24 = vpop.permute.xlu1 %4358 }
 0x3f1   : > { %v8510_v10 = vpop.permute.xlu0 %4383 }
 0x3f4   : > { %v8504_v34 = vpop.permute.xlu1 %4368 }
 0x3f5   : > { %v8514_v3 = vpop.permute.xlu0 %4523 }
 0x3f6   : > { %9024 = vst [vmem:[#allocation30_spill] sm:$0xff] %v8514_v3 }
 0x3f8   : > { %v8508_v23 = vpop.permute.xlu1 %4378 }
 0x3f9   : > { %v8518_v33 = vpop.permute.xlu0 %4533 }
 0x3fa   : > { %9026 = vst [vmem:[#allocation33_spill] sm:$0xff] %v8518_v33 }
 0x3fc   : > { %v8512_v25 = vpop.permute.xlu1 %4518 }
 0x3fd   : > { %9023 = vst [vmem:[#allocation31_spill] sm:$0xff] %v8512_v25  ;;  %v8522_v21 = vpop.permute.xlu0 %4543 }
 0x3fe   : > { %9028 = vst [vmem:[#allocation34_spill] sm:$0xff] %v8522_v21 }
 0x400   : > { %v8516_v19 = vpop.permute.xlu1 %4528 }
 0x401   : > { %9025 = vst [vmem:[#allocation32_spill] sm:$0xff] %v8516_v19  ;;  %v8526_v41 = vpop.permute.xlu0 %4553 }
 0x402   : > { %9030 = vst [vmem:[#allocation39_spill] sm:$0xff] %v8526_v41 }
 0x404   : > { %v8520_v14 = vpop.permute.xlu1 %4538 }
 0x405   : > { %9027 = vst [vmem:[#allocation35_spill] sm:$0xff] %v8520_v14  ;;  %v8530_v7 = vpop.permute.xlu0 %4693 }
 0x406   : > { %9032 = vst [vmem:[#allocation38_spill] sm:$0xff] %v8530_v7 }
 0x408   : > { %v8524_v53 = vpop.permute.xlu1 %4548 }
 0x409   : > { %9029 = vst [vmem:[#allocation37_spill] sm:$0xff] %v8524_v53  ;;  %v8534_v29 = vpop.permute.xlu0 %4703 }
 0x40a   : > { %9034 = vst [vmem:[#allocation42_spill] sm:$0xff] %v8534_v29 }
 0x40c   : > { %v8528_v63 = vpop.permute.xlu1 %4688 }
 0x40d   : > { %9031 = vst [vmem:[#allocation36_spill] sm:$0xff] %v8528_v63  ;;  %v8538_v39 = vpop.permute.xlu0 %4713 }
 0x40e   : > { %9036 = vst [vmem:[#allocation40_spill] sm:$0xff] %v8538_v39 }
 0x410   : > { %v8532_v11 = vpop.permute.xlu1 %4698 }
 0x411   : > { %9033 = vst [vmem:[#allocation41_spill] sm:$0xff] %v8532_v11  ;;  %v8542_v18 = vpop.permute.xlu0 %4723 }
 0x412   : > { %9038 = vst [vmem:[#allocation46_spill] sm:$0xff] %v8542_v18 }
 0x414   : > { %v8536_v15 = vpop.permute.xlu1 %4708 }
 0x415   : > { %9035 = vst [vmem:[#allocation43_spill] sm:$0xff] %v8536_v15  ;;  %v8546_v12 = vpop.permute.xlu0 %4863 }
 0x418   : > { %v8540_v4 = vpop.permute.xlu1 %4718 }
 0x419   : > { %9037 = vst [vmem:[#allocation45_spill] sm:$0xff] %v8540_v4  ;;  %v8550_v46 = vpop.permute.xlu0 %4873 }
 0x41c   : > { %v8544_v8 = vpop.permute.xlu1 %4858 }
 0x41d   : > { %v8554_v60 = vpop.permute.xlu0 %4883 }
 0x420   : > { %v8548_v0 = vpop.permute.xlu1 %4868 }
 0x421   : > { %v8558_v49 = vpop.permute.xlu0 %4893 }
 0x422   : > { %9040 = vst [vmem:[#allocation44_spill] sm:$0xff] %v8558_v49 }
 0x424   : > { %v8552_v13 = vpop.permute.xlu1 %4878 }
 0x425   : > { %v8562_v11 = vpop.permute.xlu0 %5033 }
 0x428   : > { %v8556_v17 = vpop.permute.xlu1 %4888 }
 0x429   : > { %9039 = vst [vmem:[#allocation47_spill] sm:$0xff] %v8556_v17  ;;  %v8568_v21 = vpop.permute.xlu0 %5043 }
 0x42c   : > { %v8560_v38 = vpop.permute.xlu1 %5028 }
 0x42d   : > { %v8574_v3 = vpop.permute.xlu0 %5053 }
 0x4a6   : > { %v6156_v54 = vpop.f32.mrb[8].mxu1 }
 0x4a7   : > { %v3800_v2 = vmul.f32 %v6156_v54, %v5720_v5  ;;  %v3752_v47 = vpop.f32.mrb[9].mxu1  ;;  %v8565_v54 = vpop.permute.xlu1 %5038 }
 0x4a8   : > { %v3798_v18 = vmul.f32 %v5720_v5, %v3752_v47  ;;  %v6157_v4 = vpop.f32.mrb[10].mxu1 }
 0x4a9   : > { %v3815_v39 = vadd.f32 %v5721_v31, %v3800_v2  ;;  %v3801_v15 = vmul.f32 %v6157_v4, %v5720_v5  ;;  %v3755_v29 = vpop.f32.mrb[11].mxu1 }
 0x4aa   : > { %v3813_v53 = vadd.f32 %v5721_v31, %v3798_v18  ;;  %v3799_v7 = vmul.f32 %v5720_v5, %v3755_v29 }
 0x4ab   : > { %v3823_v63 = vmax.f32 %v3815_v39, 0.0  ;;  %v3816_v17 = vadd.f32 %v5721_v31, %v3801_v15  ;;  %v8572_v25 = vpop.permute.xlu1 %5048 }
 0x4ac   : > { %v3821_v41 = vmax.f32 %v3813_v53, 0.0  ;;  %v3814_v49 = vadd.f32 %v5721_v31, %v3799_v7 }
 0x4ad   : > { %3831 = vst.msk [vmem:[#allocation2 + $0x20] sm:$0xff] %vm585_vm0, %v3823_v63  ;;  %v3824_v14 = vmax.f32 %v3816_v17, 0.0 }
 0x4ae   : > { %3829 = vst.msk [vmem:[#allocation2 + $0x10] sm:$0xff] %vm585_vm0, %v3821_v41  ;;  %v3822_v47 = vmax.f32 %v3814_v49, 0.0  ;;  %v6160_v19 = vpop.f32.mrb[12].mxu1 }
 0x4af   : > { %3832 = vst.msk [vmem:[#allocation2 + $0x28] sm:$0xff] %vm585_vm0, %v3824_v14  ;;  %v3804_v2 = vmul.f32 %v6160_v19, %v5720_v5  ;;  %v3768_v4 = vpop.f32.mrb[13].mxu1 }
 0x4b0   : > { %3830 = vst.msk [vmem:[#allocation2 + $0x18] sm:$0xff] %vm585_vm0, %v3822_v47  ;;  %v3802_v29 = vmul.f32 %v5720_v5, %v3768_v4  ;;  %v6161_v53 = vpop.f32.mrb[14].mxu1 }
 0x4b1   : > { %v3819_v7 = vadd.f32 %v5721_v31, %v3804_v2  ;;  %v3805_v15 = vmul.f32 %v6161_v53, %v5720_v5  ;;  %v3771_v63 = vpop.f32.mrb[15].mxu1  ;;  %v3965_v2 = vmul.f32 %v8445_v32, %v8221_v35  ;;  %v6674_v32 = vld [vmem:[#allocation17 + $0x8] sm:$0xff]  }
 0x4b2   : > { %v3817_v39 = vadd.f32 %v5721_v31, %v3802_v29  ;;  %v3803_v18 = vmul.f32 %v5720_v5, %v3771_v63 }
 0x4b3   : > { %v3827_v17 = vmax.f32 %v3819_v7, 0.0  ;;  %v3820_v33 = vadd.f32 %v5721_v31, %v3805_v15  ;;  %v8595_v7 = vpop.permute.xlu1 %5058 }
 0x4b4   : > { %v3825_v41 = vmax.f32 %v3817_v39, 0.0  ;;  %v3818_v49 = vadd.f32 %v5721_v31, %v3803_v18  ;;  %v8579_v47 = vld [vmem:[#allocation2 + $0x20] sm:$0xff]  ;;  %9041 = vst [vmem:[#allocation56_spill] sm:$0xff] %v8595_v7 }
 0x4b5   : > { %3835 = vst.msk [vmem:[#allocation2 + $0x40] sm:$0xff] %vm585_vm0, %v3827_v17  ;;  %v3828_v19 = vmax.f32 %v3820_v33, 0.0  ;;  %v8577_v14 = vld [vmem:[#allocation2 + $0x10] sm:$0xff]  ;;  %v3968_v53 = vmul.f32 %v8451_v16, %v8579_v47  ;;  %v3837_v16 = vld [vmem:[#allocation2 + $0x7] sm:$0xff] }
 0x4b6   : > { %3833 = vst.msk [vmem:[#allocation2 + $0x30] sm:$0xff] %vm585_vm0, %v3825_v41  ;;  %v3826_v5 = vmax.f32 %v3818_v49, 0.0  ;;  %v3966_v31 = vmul.f32 %v8447_v37, %v8577_v14  ;;  %v8597_v37 = vpop.permute.xlu0 %5063  ;;  %v8599_v15 = vld [vmem:[#allocation2 + $0x28] sm:$0xff] }
 0x4b7   : > { %3836 = vst.msk [vmem:[#allocation2 + $0x48] sm:$0xff] %vm585_vm0, %v3828_v19  ;;  %v8587_v4 = vld [vmem:[#allocation2 + $0x18] sm:$0xff]  ;;  %9042 = vst [vmem:[#allocation57_spill] sm:$0xff] %v8597_v37  ;;  %v8602_v63 = vld [vmem:[#allocation2 + $0xf] sm:$0xff]  ;;  %v3969_v18 = vmul.f32 %v8453_v44, %v8599_v15  ;;  %v5199_v44 = vpop.permute.xlu1 %5198 }
 0x4b8   : > { %3834 = vst.msk [vmem:[#allocation2 + $0x38] sm:$0xff] %vm585_vm0, %v3826_v5  ;;  %v3973_v33 = vpack.c.bf16 %v3966_v31, %v3965_v2  ;;  %v3967_v29 = vmul.f32 %v8449_v59, %v8587_v4  ;;  %v6675_v41 = vld [vmem:[#allocation17 + $0x20] sm:$0xff]   ;;  %v3894_v19 = vmul.f32 %v8463_v61, %v8602_v63  ;;  %v3893_v31 = vmul.f32 %v8461_v62, %v3837_v16 }
 0x4ba   : > { %6166 = vmatprep.mubr.msk.bf16.mxu0 %vm585_vm0, %v3973_v33  ;;  %v3974_v35 = vpack.c.bf16 %v3968_v53, %v3967_v29  ;;  %v5204_v33 = vpop.permute.xlu0 %5203  ;;  %v8623_v29 = vld [vmem:[#allocation2 + $0x17] sm:$0xff]  ;;  %v8625_v53 = vld [vmem:[#allocation2 + $0x1f] sm:$0xff]  ;;  %v3901_v61 = vpack.c.bf16 %v3894_v19, %v3893_v31 }
 0x4bb   : > { %v3896_v62 = vmul.f32 %v8467_v28, %v8625_v53  ;;  %v8653_v28 = vmul.f32 %v8562_v11, %v8579_v47  ;;  %v8673_v31 = vld [vmem:[#allocation2 + $0x19] sm:$0xff] }
 0x4bc   : > { %6167 = vmatmul.mubr.msk.bf16.vlgmr.msra.gmra.mrb[8].mxu0 %vm585_vm0, %v3974_v35  ;;  %v8607_v39 = vld [vmem:[#allocation2 + $0x40] sm:$0xff] }
 0x4bd   : > { %6175 = vmatpush3.bf16.msra.mxu0 %v8485_v40  ;;  %v8605_v59 = vld [vmem:[#allocation2 + $0x30] sm:$0xff]  ;;  %v3972_v5 = vmul.f32 %v8459_v36, %v8607_v39  ;;  %v3895_v36 = vmul.f32 %v8465_v9, %v8623_v29  ;;  %v8635_v35 = vld [vmem:[#allocation2 + $0x27] sm:$0xff]  ;;  %v8649_v9 = vmul.f32 %v8546_v12, %v8625_v53 }
 0x4be   : > { %v3970_v17 = vmul.f32 %v8455_v20, %v8605_v59  ;;  %6176 = vmatprep.subr.bf16.mxu0 %v6674_v32  ;;  %v5214_v19 = vpop.permute.xlu0 %5213  ;;  %v3897_v11 = vmul.f32 %v8469_v55, %v8635_v35  ;;  %v8701_v7 = vld [vmem:[#allocation2 + $0x41] sm:$0xff] }
 0x4bf   : > { %v8613_v49 = vld [vmem:[#allocation2 + $0x38] sm:$0xff]  ;;  %v3902_v12 = vpack.c.bf16 %v3896_v62, %v3895_v36  ;;  %v8693_v62 = vmul.f32 %v8565_v54, %v8599_v15  ;;  %v8711_v54 = vmul.f32 %v8574_v3, %v8607_v39 }
 0x4c0   : > { %v3975_v2 = vpack.c.bf16 %v3970_v17, %v3969_v18  ;;  %v3971_v40 = vmul.f32 %v8457_v48, %v8613_v49  ;;  %v8628_v48 = vld [vmem:[#allocation2 + $0x2f] sm:$0xff]  ;;  %v8639_v16 = vld [vmem:[#allocation2 + $0x3f] sm:$0xff]  ;;  %v8643_v18 = vmul.f32 %v8544_v8, %v8623_v29  ;;  %v5209_v17 = vpop.permute.xlu1 %5208  ;;  %v8707_v36 = vmul.f32 %v8572_v25, %v8613_v49 }
 0x4c1   : > { %6177 = vmatpush3.bf16.msra.mxu0 %v6674_v32  ;;  %v8637_v32 = vld [vmem:[#allocation2 + $0x37] sm:$0xff]  ;;  %v8661_v8 = vmul.f32 %v8550_v46, %v8628_v48  ;;  %v8697_v46 = vmul.f32 %v8568_v21, %v8605_v59  ;;  %9046 = vst [vmem:[#allocation61_spill] sm:$0xff] %v8711_v54 }
 0x4c2   : > { %6170 = vmatprep.mubr.msk.bf16.mxu0 %vm585_vm0, %v3975_v2  ;;  %v3976_v20 = vpack.c.bf16 %v3972_v5, %v3971_v40  ;;  %6186 = vmatprep.subr.bf16.mxu0 %v6675_v41  ;;  %9043 = vst [vmem:[#allocation58_spill] sm:$0xff] %v8643_v18  ;;  %v3898_v2 = vmul.f32 %v8471_v6, %v8628_v48  ;;  %v8699_v37 = vld [vmem:[#allocation2 + $0x39] sm:$0xff]  ;;  %9045 = vst [vmem:[#allocation60_spill] sm:$0xff] %v8707_v36 }
 0x4c3   : > { %v8657_v40 = vmul.f32 %v8548_v0, %v8635_v35  ;;  %v8665_v5 = vmul.f32 %v8552_v13, %v8637_v32  ;;  %v8669_v6 = vmul.f32 %v8554_v60, %v8639_v16  ;;  %v8675_v0 = vld [vmem:[#allocation2 + $0x21] sm:$0xff]  ;;  %v6676_v13 = vld [vmem:[#allocation17 + $0x28] sm:$0xff]   ;;  %v3899_v21 = vmul.f32 %v8473_v52, %v8637_v32 }
 0x4c4   : > { %6171 = vmatmul.mubr.msk.bf16.gmra.mrb[12].mxu0 %vm585_vm0, %v3976_v20  ;;  %v8681_v20 = vmul.f32 %v8560_v38, %v8587_v4  ;;  %v8685_v60 = vld [vmem:[#allocation2 + $0x31] sm:$0xff]  ;;  %v3903_v38 = vpack.c.bf16 %v3898_v2, %v3897_v11  ;;  %v8721_v18 = vmul.f32 %v5199_v44, %v8673_v31  ;;  %v8724_v25 = vmul.f32 %v5204_v33, %v8675_v0  ;;  %v5219_v55 = vpop.permute.xlu1 %5218  ;;  %v4160_v33 = vld [vmem:[#allocation2 + $0x9] sm:$0xff] }
 0x4c5   : > { %6178 = vmatprep.mubr.msk.bf16.mxu0 %vm585_vm0, %v3901_v61  ;;  %v8683_v61 = vld [vmem:[#allocation2 + $0x29] sm:$0xff]  ;;  %v8716_v2 = vld [vmem:[#allocation2 + $0x11] sm:$0xff]  ;;  %v3900_v44 = vmul.f32 %v8475_v56, %v8639_v16  ;;  %v4216_v36 = vmul.f32 %v8477_v1, %v4160_v33 }
 0x4c6   : > { %9044 = vst [vmem:[#allocation59_spill] sm:$0xff] %v8681_v20  ;;  %v5224_v20 = vpop.permute.xlu0 %5223  ;;  %v8730_v52 = vmul.f32 %v5209_v17, %v8683_v61  ;;  %v6677_v11 = vld [vmem:[#allocation17 + $0x30] sm:$0xff]   ;;  %v4217_v17 = vmul.f32 %v8479_v22, %v8716_v2  ;;  %v4219_v22 = vmul.f32 %v8483_v26, %v8675_v0  ;;  %v4223_v26 = vmul.f32 %v8494_v27, %v8701_v7 }
 0x4c7   : > { %v8743_v3 = vmul.f32 %v5224_v20, %v8701_v7  ;;  %v3904_v54 = vpack.c.bf16 %v3900_v44, %v3899_v21  ;;  %v4218_v20 = vmul.f32 %v8481_v50, %v8673_v31  ;;  %v6678_v21 = vld [vmem:[#allocation17 + $0x38] sm:$0xff]   ;;  %v4222_v50 = vmul.f32 %v8492_v58, %v8699_v37 }
 0x4c8   : > { %v4388_v58 = vmul.f32 %v8500_v24, %v8625_v53  ;;  %v4389_v27 = vmul.f32 %v8502_v43, %v8635_v35  ;;  %v4392_v24 = vmul.f32 %v8508_v23, %v8639_v16  ;;  %v9049_v23 = vld [vmem:[#allocation33_spill] sm:$0xff] }
 0x4c9   : > { %v4225_v1 = vpack.c.bf16 %v4219_v22, %v4218_v20  ;;  %v4559_v16 = vmul.f32 %v9049_v23, %v8599_v15  ;;  %v9051_v22 = vld [vmem:[#allocation32_spill] sm:$0xff]  ;;  %v9053_v15 = vld [vmem:[#allocation39_spill] sm:$0xff] }
 0x4ca   : > { %v9067_v23 = vld [vmem:[#allocation47_spill] sm:$0xff] }
 0x4cc   : > { %6179 = vmatmul.mubr.msk.bf16.vlgmr.msra.gmra.mrb[8].mxu0 %vm585_vm0, %v3902_v12  ;;  %v8733_v12 = vmul.f32 %v5214_v19, %v8685_v60 }
 0x4cd   : > { %6187 = vmatpush3.bf16.msra.mxu0 %v6675_v41  ;;  %6182 = vmatprep.mubr.msk.bf16.mxu0 %vm585_vm0, %v3903_v38  ;;  %v8740_v38 = vmul.f32 %v5219_v55, %v8699_v37  ;;  %v4224_v41 = vpack.c.bf16 %v4217_v17, %v4216_v36  ;;  %v4221_v55 = vmul.f32 %v8490_v30, %v8685_v60  ;;  %v6679_v36 = vld [vmem:[#allocation17 + $0x40] sm:$0xff]  }
 0x4ce   : > { %6188 = vmatprep.subr.bf16.mxu0 %v6676_v13  ;;  %v5245_v19 = vpack.c.bf16 %v8733_v12, %v8730_v52  ;;  %v4387_v30 = vmul.f32 %v8498_v45, %v8623_v29  ;;  %v4391_v45 = vmul.f32 %v8506_v42, %v8637_v32  ;;  %v4390_v29 = vmul.f32 %v8504_v34, %v8628_v48  ;;  %v6681_v42 = vld [vmem:[#allocation17 + $0x50] sm:$0xff]   ;;  %v9048_v48 = vld [vmem:[#allocation31_spill] sm:$0xff] }
 0x4cf   : > { %v5246_v56 = vpack.c.bf16 %v8743_v3, %v8740_v38  ;;  %v9047_v34 = vld [vmem:[#allocation30_spill] sm:$0xff]  ;;  %v4556_v35 = vmul.f32 %v9048_v48, %v8577_v14  ;;  %v5777_v52 = vld [vmem:[#allocation20] ss:$0 sm:$0xff] }
 0x4d0   : > { %v4396_v33 = vpack.c.bf16 %v4391_v45, %v4390_v29  ;;  %v4557_v53 = vmul.f32 %v9047_v34, %v8587_v4  ;;  %v4558_v4 = vmul.f32 %v9051_v22, %v8579_v47  ;;  %v9055_v47 = vld [vmem:[#allocation38_spill] sm:$0xff]  ;;  %v9058_v45 = vld [vmem:[#allocation43_spill] sm:$0xff]  ;;  %v9059_v29 = vld [vmem:[#allocation40_spill] sm:$0xff] }
 0x4d1   : > { %6189 = vmatpush3.bf16.msra.mxu0 %v6676_v13  ;;  %v4220_v13 = vmul.f32 %v8487_v57, %v8683_v61  ;;  %v4386_v57 = vmul.f32 %v8496_v51, %v8602_v63  ;;  %v4395_v51 = vpack.c.bf16 %v4389_v27, %v4388_v58  ;;  %v6680_v63 = vld [vmem:[#allocation17 + $0x48] sm:$0xff]   ;;  %v9057_v58 = vld [vmem:[#allocation42_spill] sm:$0xff] }
 0x4d2   : > { %6198 = vmatprep.subr.bf16.mxu0 %v6677_v11  ;;  %v4564_v17 = vpack.c.bf16 %v4557_v53, %v4556_v35  ;;  %v4565_v14 = vpack.c.bf16 %v4559_v16, %v4558_v4  ;;  %v4729_v27 = vmul.f32 %v9057_v58, %v8683_v61  ;;  %v9061_v61 = vld [vmem:[#allocation45_spill] sm:$0xff]  ;;  %v6686_v35 = vld [vmem:[#allocation17 + $0x78] sm:$0xff]  }
 0x4d3   : > { %v4226_v44 = vpack.c.bf16 %v4221_v55, %v4220_v13  ;;  %v9052_v55 = vld [vmem:[#allocation35_spill] sm:$0xff]  ;;  %v6685_v53 = vld [vmem:[#allocation17 + $0x70] sm:$0xff]  }
 0x4d4   : > { %6183 = vmatmul.mubr.msk.bf16.gmra.mrb[12].mxu0 %vm585_vm0, %v3904_v54  ;;  %v4227_v54 = vpack.c.bf16 %v4223_v26, %v4222_v50  ;;  %v4560_v13 = vmul.f32 %v9052_v55, %v8605_v59  ;;  %v6683_v26 = vld [vmem:[#allocation17 + $0x60] sm:$0xff]   ;;  %v9056_v59 = vld [vmem:[#allocation37_spill] sm:$0xff] }
 0x4d5   : > { %6190 = vmatprep.mubr.msk.bf16.mxu0 %vm585_vm0, %v4224_v41  ;;  %v8782_v41 = vld [vmem:[#allocation2 + $0x47] sm:$0xff]  ;;  %v9072_v4 = vld [vmem:[#allocation61_spill] sm:$0xff] }
 0x4d6   : > { %v4393_v43 = vmul.f32 %v8510_v10, %v8782_v41  ;;  %v9050_v10 = vld [vmem:[#allocation34_spill] sm:$0xff]  ;;  %v4902_v16 = vmul.f32 %v9067_v23, %v8782_v41  ;;  %v5017_v41 = vld [vmem:[#allocation2 + $0x50] sm:$0xff] }
 0x4d7   : > { %v4561_v20 = vmul.f32 %v9050_v10, %v8613_v49  ;;  %v9054_v49 = vld [vmem:[#allocation36_spill] sm:$0xff] }
 0x4d8   : > { %v4397_v32 = vpack.c.bf16 %v4393_v43, %v4392_v24  ;;  %v4677_v43 = vld [vmem:[#allocation2 + $0x49] sm:$0xff] }
 0x4d9   : > { %v9073_v55 = vld [vmem:[#allocation60_spill] sm:$0xff] }
 0x4dc   : > { %6191 = vmatmul.mubr.msk.bf16.vlgmr.msra.gmra.mrb[8].mxu0 %vm585_vm0, %v4225_v1  ;;  %v6682_v1 = vld [vmem:[#allocation17 + $0x58] sm:$0xff]  }
 0x4dd   : > { %6199 = vmatpush3.bf16.msra.mxu0 %v6677_v11  ;;  %6194 = vmatprep.mubr.msk.bf16.mxu0 %vm585_vm0, %v4226_v44  ;;  %v4394_v11 = vpack.c.bf16 %v4387_v30, %v4386_v57  ;;  %v4507_v44 = vld [vmem:[#allocation2 + $0x48] sm:$0xff]  ;;  %v4727_v30 = vmul.f32 %v9055_v47, %v8673_v31  ;;  %v4562_v57 = vmul.f32 %v9056_v59, %v8607_v39 }
 0x4de   : > { %6200 = vmatprep.subr.bf16.mxu0 %v6678_v21  ;;  %v4563_v50 = vmul.f32 %v9053_v15, %v4507_v44  ;;  %v4731_v31 = vmul.f32 %v9059_v29, %v8699_v37 }
 0x4e1   : > { %6201 = vmatpush3.bf16.msra.mxu0 %v6678_v21  ;;  %v4566_v21 = vpack.c.bf16 %v4561_v20, %v4560_v13  ;;  %v6687_v20 = vld [vmem:[#allocation17 + $0x80] sm:$0xff]   ;;  %v9074_v13 = vpack.c.bf16 %v9072_v4, %v9073_v55 }
 0x4e2   : > { %6210 = vmatprep.subr.bf16.mxu0 %v6679_v36 }
 0x4e4   : > { %6195 = vmatmul.mubr.msk.bf16.gmra.mrb[12].mxu0 %vm585_vm0, %v4227_v54  ;;  %v4567_v54 = vpack.c.bf16 %v4563_v50, %v4562_v57  ;;  %v5234_v50 = vpop.permute.xlu0 %5233 }
 0x4e5   : > { %6202 = vmatprep.mubr.msk.bf16.mxu0 %vm585_vm0, %v4394_v11 }
 0x4ec   : > { %6203 = vmatmul.mubr.msk.bf16.vlgmr.msra.gmra.mrb[8].mxu0 %vm585_vm0, %v4395_v51  ;;  %v9060_v51 = vld [vmem:[#allocation41_spill] sm:$0xff] }
 0x4ed   : > { %6211 = vmatpush3.bf16.msra.mxu0 %v6679_v36  ;;  %6206 = vmatprep.mubr.msk.bf16.mxu0 %vm585_vm0, %v4396_v33  ;;  %v4726_v36 = vmul.f32 %v9054_v49, %v8716_v2  ;;  %v4730_v2 = vmul.f32 %v9058_v45, %v8685_v60  ;;  %v4728_v39 = vmul.f32 %v9060_v51, %v8675_v0  ;;  %v6684_v33 = vld [vmem:[#allocation17 + $0x68] sm:$0xff]   ;;  %v9062_v60 = vld [vmem:[#allocation46_spill] sm:$0xff] }
 0x4ee   : > { %6212 = vmatprep.subr.bf16.mxu0 %v6680_v63  ;;  %v4733_v34 = vmul.f32 %v9062_v60, %v4677_v43  ;;  %v9063_v0 = vld [vmem:[#allocation58_spill] sm:$0xff] }
 0x4ef   : > { %v4734_v11 = vpack.c.bf16 %v4727_v30, %v4726_v36  ;;  %v4736_v24 = vpack.c.bf16 %v4731_v31, %v4730_v2  ;;  %v9064_v48 = vpack.c.bf16 %v8649_v9, %v9063_v0  ;;  %v9068_v9 = vld [vmem:[#allocation44_spill] sm:$0xff]  ;;  %v9082_v31 = vld [vmem:[#allocation50_spill] sm:$0xff] }
 0x4f1   : > { %6213 = vmatpush3.bf16.msra.mxu0 %v6680_v63  ;;  %v4735_v63 = vpack.c.bf16 %v4729_v27, %v4728_v39  ;;  %v9081_v27 = vld [vmem:[#allocation49_spill] sm:$0xff] }
 0x4f2   : > { %6222 = vmatprep.subr.bf16.mxu0 %v6681_v42 }
 0x4f4   : > { %6207 = vmatmul.mubr.msk.bf16.gmra.mrb[12].mxu0 %vm585_vm0, %v4397_v32  ;;  %v4847_v32 = vld [vmem:[#allocation2 + $0x4f] sm:$0xff] }
 0x4f5   : > { %6214 = vmatprep.mubr.msk.bf16.mxu0 %vm585_vm0, %v4564_v17  ;;  %v9065_v17 = vpack.c.bf16 %v8661_v8, %v8657_v40  ;;  %v4903_v10 = vmul.f32 %v9068_v9, %v4847_v32  ;;  %v9069_v40 = vld [vmem:[#allocation59_spill] sm:$0xff] }
 0x4f6   : > { %v9070_v8 = vpack.c.bf16 %v8653_v28, %v9069_v40  ;;  %v9076_v28 = vld [vmem:[#allocation57_spill] sm:$0xff] }
 0x4f7   : > { %v4907_v22 = vpack.c.bf16 %v4903_v10, %v4902_v16  ;;  %v9085_v16 = vld [vmem:[#allocation53_spill] sm:$0xff] }
 0x4fc   : > { %6215 = vmatmul.mubr.msk.bf16.vlgmr.msra.gmra.mrb[8].mxu0 %vm585_vm0, %v4565_v14  ;;  %v9075_v14 = vld [vmem:[#allocation56_spill] sm:$0xff] }
 0x4fd   : > { %6223 = vmatpush3.bf16.msra.mxu0 %v6681_v42  ;;  %6218 = vmatprep.mubr.msk.bf16.mxu0 %vm585_vm0, %v4566_v21  ;;  %v4732_v42 = vmul.f32 %v9061_v61, %v8701_v7  ;;  %v9066_v7 = vpack.c.bf16 %v8669_v6, %v8665_v5  ;;  %v6688_v5 = vld [vmem:[#allocation17 + $0x88] sm:$0xff]   ;;  %v9071_v6 = vpack.c.bf16 %v8697_v46, %v8693_v62  ;;  %v5229_v62 = vpop.permute.xlu1 %5228 }
 0x4fe   : > { %6224 = vmatprep.subr.bf16.mxu0 %v6682_v1  ;;  %v5073_v21 = vmul.f32 %v9076_v28, %v5017_v41  ;;  %v9077_v46 = vpack.c.bf16 %v8724_v25, %v8721_v18  ;;  %v5776_v18 = vld [vmem:[#allocation19] ss:$0 sm:$0xff] }
 0x4ff   : > { %v4737_v37 = vpack.c.bf16 %v4733_v34, %v4732_v42 }
 0x501   : > { %6225 = vmatpush3.bf16.msra.mxu0 %v6682_v1  ;;  %v5072_v1 = vmul.f32 %v9075_v14, %v4507_v44  ;;  %v5242_v44 = vmul.f32 %v5229_v62, %v4677_v43 }
 0x502   : > { %6234 = vmatprep.subr.bf16.mxu0 %v6683_v26 }
 0x503   : > { %v5077_v15 = vpack.c.bf16 %v5073_v21, %v5072_v1 }
 0x504   : > { %6219 = vmatmul.mubr.msk.bf16.gmra.mrb[12].mxu0 %vm585_vm0, %v4567_v54  ;;  %v9079_v54 = vld [vmem:[#allocation48_spill] sm:$0xff] }
 0x505   : > { %6226 = vmatprep.mubr.msk.bf16.mxu0 %vm585_vm0, %v4734_v11 }
 0x50c   : > { %6227 = vmatmul.mubr.msk.bf16.vlgmr.msra.gmra.mrb[8].mxu0 %vm585_vm0, %v4735_v63  ;;  %v9083_v63 = vld [vmem:[#allocation51_spill] sm:$0xff] }
 0x50d   : > { %6235 = vmatpush3.bf16.msra.mxu0 %v6683_v26  ;;  %6230 = vmatprep.mubr.msk.bf16.mxu0 %vm585_vm0, %v4736_v24  ;;  %v5187_v26 = vld [vmem:[#allocation2 + $0x51] sm:$0xff] }
 0x50e   : > { %6236 = vmatprep.subr.bf16.mxu0 %v6684_v33  ;;  %v5243_v49 = vmul.f32 %v5234_v50, %v5187_v26 }
 0x510   : > { %v5247_v36 = vpack.c.bf16 %v5243_v49, %v5242_v44 }
 0x511   : > { %6237 = vmatpush3.bf16.msra.mxu0 %v6684_v33 }
 0x512   : > { %6246 = vmatprep.subr.bf16.mxu0 %v6685_v53 }
 0x514   : > { %6231 = vmatmul.mubr.msk.bf16.gmra.mrb[12].mxu0 %vm585_vm0, %v4737_v37 }
 0x515   : > { %6238 = vmatprep.mubr.msk.bf16.mxu0 %vm585_vm0, %v9064_v48 }
 0x51c   : > { %6239 = vmatmul.mubr.msk.bf16.vlgmr.msra.gmra.mrb[8].mxu0 %vm585_vm0, %v9065_v17  ;;  %v9084_v17 = vld [vmem:[#allocation52_spill] sm:$0xff] }
 0x51d   : > { %6247 = vmatpush3.bf16.msra.mxu0 %v6685_v53  ;;  %6242 = vmatprep.mubr.msk.bf16.mxu0 %vm585_vm0, %v9066_v7 }
 0x51e   : > { %6248 = vmatprep.subr.bf16.mxu0 %v6686_v35 }
 0x521   : > { %6249 = vmatpush3.bf16.msra.mxu0 %v6686_v35 }
 0x522   : > { %6258 = vmatprep.subr.bf16.mxu0 %v6687_v20 }
 0x524   : > { %6243 = vmatmul.mubr.msk.bf16.gmra.mrb[12].mxu0 %vm585_vm0, %v4907_v22  ;;  %v9086_v22 = vld [vmem:[#allocation54_spill] sm:$0xff] }
 0x525   : > { %6250 = vmatprep.mubr.msk.bf16.mxu0 %vm585_vm0, %v9070_v8 }
 0x52c   : > { %6251 = vmatmul.mubr.msk.bf16.vlgmr.msra.gmra.mrb[8].mxu0 %vm585_vm0, %v9071_v6 }
 0x52d   : > { %6259 = vmatpush3.bf16.msra.mxu0 %v6687_v20  ;;  %6254 = vmatprep.mubr.msk.bf16.mxu0 %vm585_vm0, %v9074_v13 }
 0x52e   : > { %6260 = vmatprep.subr.bf16.mxu0 %v6688_v5 }
 0x531   : > { %6261 = vmatpush3.bf16.msra.mxu0 %v6688_v5  ;;  %v9087_v5 = vld [vmem:[#allocation55_spill] sm:$0xff] }
 0x534   : > { %6255 = vmatmul.mubr.msk.bf16.gmra.mrb[12].mxu0 %vm585_vm0, %v5077_v15 }
 0x535   : > { %6262 = vmatprep.mubr.msk.bf16.mxu0 %vm585_vm0, %v9077_v46 }
 0x53c   : > { %6263 = vmatmul.mubr.msk.bf16.vlgmr.msra.gmra.mrb[8].mxu0 %vm585_vm0, %v5245_v19 }
 0x53d   : > { %6266 = vmatprep.mubr.msk.bf16.mxu0 %vm585_vm0, %v5246_v56 }
 0x544   : > { %6267 = vmatmul.mubr.msk.bf16.gmra.mrb[12].mxu0 %vm585_vm0, %v5247_v36 }
 0x60f   : > { %v6264_v25 = vpop.f32.mrb[8].mxu0 }
 0x610   : > { %v5359_v12 = vmul.f32 %v6264_v25, %v5776_v18  ;;  %v5311_v19 = vpop.f32.mrb[9].mxu0 }
 0x611   : > { %v5357_v47 = vmul.f32 %v5776_v18, %v5311_v19  ;;  %v6265_v30 = vpop.f32.mrb[10].mxu0 }
 0x612   : > { %v5374_v3 = vadd.f32 %v5777_v52, %v5359_v12  ;;  %v5360_v38 = vmul.f32 %v6265_v30, %v5776_v18  ;;  %v5314_v56 = vpop.f32.mrb[11].mxu0 }
 0x613   : > { %v5372_v59 = vadd.f32 %v5777_v52, %v5357_v47  ;;  %v5358_v57 = vmul.f32 %v5776_v18, %v5314_v56 }
 0x614   : > { %v5382_v11 = vadd.f32 %v5374_v3, %v9079_v54  ;;  %v5375_v58 = vadd.f32 %v5777_v52, %v5360_v38 }
 0x615   : > { %v5380_v45 = vadd.f32 %v5372_v59, %v9081_v27  ;;  %v5373_v2 = vadd.f32 %v5777_v52, %v5358_v57 }
 0x616   : > { %v5390_v29 = vmax.f32 %v5382_v11, 0.0  ;;  %v5383_v51 = vadd.f32 %v5375_v58, %v9082_v31 }
 0x617   : > { %v5388_v39 = vmax.f32 %v5380_v45, 0.0  ;;  %v5381_v33 = vadd.f32 %v5373_v2, %v9083_v63  ;;  %v6268_v24 = vpop.f32.mrb[12].mxu0 }
 0x618   : > { %5398 = vst.msk [vmem:[%s8879_s19 + $0x10] sm:$0xff] %vm585_vm0, %v5390_v29  ;;  %v5391_v43 = vmax.f32 %v5383_v51, 0.0  ;;  %v5363_v61 = vmul.f32 %v6268_v24, %v5776_v18  ;;  %v5327_v42 = vpop.f32.mrb[13].mxu0 }
 0x619   : > { %5396 = vst.msk [vmem:[%s8879_s19] sm:$0xff] %vm585_vm0, %v5388_v39  ;;  %v5389_v60 = vmax.f32 %v5381_v33, 0.0  ;;  %v5361_v34 = vmul.f32 %v5776_v18, %v5327_v42  ;;  %v6269_v53 = vpop.f32.mrb[14].mxu0 }
 0x61a   : > { %5399 = vst.msk [vmem:[%s8879_s19 + $0x18] sm:$0xff] %vm585_vm0, %v5391_v43  ;;  %v5378_v37 = vadd.f32 %v5777_v52, %v5363_v61  ;;  %v5364_v0 = vmul.f32 %v6269_v53, %v5776_v18  ;;  %v5330_v48 = vpop.f32.mrb[15].mxu0 }
 0x61b   : > { %5397 = vst.msk [vmem:[%s8879_s19 + $0x8] sm:$0xff] %vm585_vm0, %v5389_v60  ;;  %v5376_v35 = vadd.f32 %v5777_v52, %v5361_v34  ;;  %v5362_v32 = vmul.f32 %v5776_v18, %v5330_v48 }
 0x61c   : > { %v5386_v7 = vadd.f32 %v5378_v37, %v9084_v17  ;;  %v5379_v23 = vadd.f32 %v5777_v52, %v5364_v0 }
 0x61d   : > { %v5384_v9 = vadd.f32 %v5376_v35, %v9085_v16  ;;  %v5377_v10 = vadd.f32 %v5777_v52, %v5362_v32 }
 0x61e   : > { %v5394_v20 = vmax.f32 %v5386_v7, 0.0  ;;  %v5387_v40 = vadd.f32 %v5379_v23, %v9086_v22 }
 0x61f   : > { %v5392_v8 = vmax.f32 %v5384_v9, 0.0  ;;  %v5385_v6 = vadd.f32 %v5377_v10, %v9087_v5 }
 0x620   : > { %5402 = vst.msk [vmem:[%s8879_s19 + $0x30] sm:$0xff] %vm585_vm0, %v5394_v20  ;;  %v5395_v41 = vmax.f32 %v5387_v40, 0.0 }
 0x621   : > { %5400 = vst.msk [vmem:[%s8879_s19 + $0x20] sm:$0xff] %vm585_vm0, %v5392_v8  ;;  %v5393_v4 = vmax.f32 %v5385_v6, 0.0 }
 0x622   : > { %5403 = vst.msk [vmem:[%s8879_s19 + $0x38] sm:$0xff] %vm585_vm0, %v5395_v41 }
 0x623   : > { %5401 = vst.msk [vmem:[%s8879_s19 + $0x28] sm:$0xff] %vm585_vm0, %v5393_v4 }
 0x624 PF: > { %p28_p5 = scmp.ge.s32.totalorder %s7479_s30, 4   ;;  %s9088_s21 = smov %s7085_s22 }
 0x625   : > { %s9089_s22 = smov %s7089_s23  ;;  %s9090_s23 = smov %s7490_s4 }
 0x626   : > { %s9091_s24 = smov %s7479_s30  ;;  %30 = sbr.rel (!%p28_p5) target bundleno = 15 (0xf), region = 188 }
 0x62d   :  { %5426 = vsyncpa [#allocation4], 1 }
 0x62e   :  { %5428 = vsyncpa [#allocation4 + $0x1], 1 }
 0x62f   :  { %5429 = vsyncpa [#allocation6], 1 }
 0x630   :  { %5430 = vsyncpa [#allocation9], 1 }
 0x631   :  { %5431 = vsyncpa [#allocation12], 1 }
 0x632   :  { %5432 = vsyncpa [#allocation15], 1 }
 0x633   :  { %5433 = vsyncpa [#allocation18], 1 }
 0x634   :  { %5434 = vsyncpa [#allocation21], 1 }

</bundles_post_ra>
